<compile_context>
chip_gen: v7x
topology: tpu7x:2x2x1
jax: 0.10.0
libtpu: 0.0.40
codegen_flags: <defaults>
</compile_context>

<pallas_src>
import functools

import jax
import jax.numpy as jnp
from jax import lax
from jax.experimental import pallas as pl
from jax.experimental.pallas import tpu as pltpu

NER_CLASSES = ['O', 'B_Abstract', 'I_Abstract', 'B_Location', 'I_Location',
               'B_Metric', 'I_Metric', 'B_Thing', 'I_Thing', 'B_Time', 'I_Time',
               'B_Organization', 'I_Organization', 'B_Physical', 'I_Physical',
               'B_Person', 'I_Person', 'X', '[CLS]', '[SEP]', '[PAD]']
NUM_TAGS = len(NER_CLASSES)          # 21
CLS_PAD = 128                        # lane-dense classifier output width

# scaled-down BERT config (768 -> 64), synthetic deterministic weights
HIDDEN = 64
N_HEADS = 4
HEAD_DIM = HIDDEN // N_HEADS
FFN = 128
N_LAYERS = 2
VOCAB = 128
MAX_POS = 64
LN_EPS = 1e-12
LSTM_HIDDEN = HIDDEN // 2            # bidirectional -> output HIDDEN again

_VMEM = pl.BlockSpec(memory_space=pltpu.MemorySpace.VMEM)


# ----------------------------------------------------------------------------
# in-kernel helpers (operate on f32 values)
# ----------------------------------------------------------------------------
def _layernorm(x, g, b_, eps=LN_EPS):
    mu = jnp.mean(x, axis=-1, keepdims=True)
    var = jnp.mean(jnp.square(x - mu), axis=-1, keepdims=True)
    return (x - mu) * lax.rsqrt(var + eps) * g + b_


def _gelu(x):
    # TODO(synk): HF BERT uses erf GELU; tanh approximation used here (small
    # systematic numerical difference).
    c = 0.7978845608028654
    return 0.5 * x * (1.0 + jnp.tanh(c * (x + 0.044715 * x * x * x)))


def _bf16(x):
    return x.astype(jnp.bfloat16)


# ----------------------------------------------------------------------------
# Fused BERT encoder: grid=(batch "parallel", layers "arbitrary"),
# per-batch residual stream resident in VMEM across the layer axis.
# ----------------------------------------------------------------------------
def _encoder_kernel(x_ref, mask_ref, embg_ref, embb_ref,
                    wqkv_ref, bqkv_ref, wo_ref, bo_ref,
                    ln1g_ref, ln1b_ref, w1_ref, b1_ref, w2_ref, b2_ref,
                    ln2g_ref, ln2b_ref, o_ref, *, seq, n_heads, head_dim):
    l = pl.program_id(1)
    hid = n_heads * head_dim

    @pl.when(l == 0)
    def _():
        # fused embedding LayerNorm (no residual add, no extra launch)
        o_ref[...] = _layernorm(x_ref[...], embg_ref[...], embb_ref[...])

    x = o_ref[...]                                       # residual stream [S, H]

    # fused Q|K|V projection (one MXU matmul, bf16 operands, f32 accumulate);
    # the 1/sqrt(head_dim) scale is pre-folded into the Q columns at init.
    qkv = (jnp.dot(_bf16(x), wqkv_ref[...],
                   preferred_element_type=jnp.float32) + bqkv_ref[...])
    qkv_bf = _bf16(qkv)                                  # single hoisted cast

    # all heads at once: [nH, S, Dh]
    q = qkv_bf[:, 0:hid].reshape(seq, n_heads, head_dim).transpose(1, 0, 2)
    k = qkv_bf[:, hid:2 * hid].reshape(seq, n_heads, head_dim).transpose(1, 0, 2)
    v = qkv_bf[:, 2 * hid:3 * hid].reshape(seq, n_heads, head_dim).transpose(1, 0, 2)

    # batched-over-heads attention, mask broadcast from [1, S] (no [B,nH,S,S]
    # tensor, no ctx scratch / masked 16-lane stores).
    sc = jnp.einsum('hqd,hkd->hqk', q, k,
                    preferred_element_type=jnp.float32)             # [nH, S, S]
    sc = sc + mask_ref[...].reshape(1, 1, seq)
    m = jnp.max(sc, axis=-1, keepdims=True)
    e = jnp.exp(sc - m)
    p = e * pl.reciprocal(jnp.sum(e, axis=-1, keepdims=True), approx=True)
    ctx = jnp.einsum('hqk,hkd->hqd', _bf16(p), v,
                     preferred_element_type=jnp.float32)            # [nH, S, Dh]
    ctx = ctx.transpose(1, 0, 2).reshape(seq, hid)                  # [S, H]
    # TODO(synk): at real bert-base sizes (S>=512) switch to a blocked
    # flash-attention KV grid with online softmax, keep qkv in bf16, raise
    # vmem_limit_bytes, and alias the embeddings input to the output
    # (input_output_aliases) to bound VMEM (v7x: 64 MiB physical).

    # attention output projection + residual + LayerNorm
    attn = (jnp.dot(_bf16(ctx), wo_ref[...],
                    preferred_element_type=jnp.float32) + bo_ref[...])
    x1 = _layernorm(attn + x, ln1g_ref[...], ln1b_ref[...])

    # FFN (GELU) + residual + LayerNorm
    ffn = (jnp.dot(_bf16(x1), w1_ref[...],
                   preferred_element_type=jnp.float32) + b1_ref[...])
    ffn = _gelu(ffn)
    ffn = (jnp.dot(_bf16(ffn), w2_ref[...],
                   preferred_element_type=jnp.float32) + b2_ref[...])
    o_ref[...] = _layernorm(ffn + x1, ln2g_ref[...], ln2b_ref[...])


def encoder_forward(enc, emb_ln_g, emb_ln_b, x_emb, add_mask, batch, seq):
    h = HIDDEN
    grid_spec = pltpu.PrefetchScalarGridSpec(
        num_scalar_prefetch=0,
        grid=(batch, N_LAYERS),
        in_specs=[
            pl.BlockSpec((None, seq, h), lambda b, l: (b, 0, 0)),    # embeddings
            pl.BlockSpec((None, 1, seq), lambda b, l: (b, 0, 0)),    # additive mask
            pl.BlockSpec((1, h), lambda b, l: (0, 0)),               # emb LN gamma
            pl.BlockSpec((1, h), lambda b, l: (0, 0)),               # emb LN beta
            pl.BlockSpec((None, h, 3 * h), lambda b, l: (l, 0, 0)),  # wqkv
            pl.BlockSpec((None, 1, 3 * h), lambda b, l: (l, 0, 0)),  # bqkv
            pl.BlockSpec((None, h, h), lambda b, l: (l, 0, 0)),      # wo
            pl.BlockSpec((None, 1, h), lambda b, l: (l, 0, 0)),      # bo
            pl.BlockSpec((None, 1, h), lambda b, l: (l, 0, 0)),      # ln1 gamma
            pl.BlockSpec((None, 1, h), lambda b, l: (l, 0, 0)),      # ln1 beta
            pl.BlockSpec((None, h, FFN), lambda b, l: (l, 0, 0)),    # w1
            pl.BlockSpec((None, 1, FFN), lambda b, l: (l, 0, 0)),    # b1
            pl.BlockSpec((None, FFN, h), lambda b, l: (l, 0, 0)),    # w2
            pl.BlockSpec((None, 1, h), lambda b, l: (l, 0, 0)),      # b2
            pl.BlockSpec((None, 1, h), lambda b, l: (l, 0, 0)),      # ln2 gamma
            pl.BlockSpec((None, 1, h), lambda b, l: (l, 0, 0)),      # ln2 beta
        ],
        out_specs=pl.BlockSpec((None, seq, h), lambda b, l: (b, 0, 0)),
    )
    # TODO(synk): when scaling to real layer sizes on v6e, raise vmem_limit_bytes
    # (and consider pipeline_mode=pl.Buffered(2) on the weight specs) so that
    # layer-weight double-buffering stays resident and DMA stays hidden.
    return pl.pallas_call(
        functools.partial(_encoder_kernel, seq=seq,
                          n_heads=N_HEADS, head_dim=HEAD_DIM),
        out_shape=jax.ShapeDtypeStruct((batch, seq, h), jnp.float32),
        grid_spec=grid_spec,
        compiler_params=pltpu.CompilerParams(
            dimension_semantics=("parallel", "arbitrary")),
    )(x_emb, add_mask, emb_ln_g, emb_ln_b,
      enc['wqkv'], enc['bqkv'], enc['wo'], enc['bo'],
      enc['ln1_g'], enc['ln1_b'], enc['w1'], enc['b1'],
      enc['w2'], enc['b2'], enc['ln2_g'], enc['ln2_b'])


# ----------------------------------------------------------------------------
# Fused BiLSTM + classifier: one kernel, both directions interleaved in the
# same unrolled time loop, per-timestep lane-dense [batch,128] partial logits.
# ----------------------------------------------------------------------------
def _bilstm_cls_kernel(x_ref, wih_ref, whh_ref, bias_ref,
                       wf_ref, wb_ref, cb_ref, o_ref, bwd_sc,
                       *, seq, batch, hh):
    # x_ref: [S*B, H] time-major.  Hoisted input projections for BOTH
    # directions: two big matmuls instead of one per timestep per direction.
    x_bf = _bf16(x_ref[...])
    xp_f = (jnp.dot(x_bf, wih_ref[0],
                    preferred_element_type=jnp.float32) + bias_ref[0])
    xp_b = (jnp.dot(x_bf, wih_ref[1],
                    preferred_element_type=jnp.float32) + bias_ref[1])
    whh_f = whh_ref[0]                                   # bf16 [hh, 4*hh]
    whh_b = whh_ref[1]
    wf = wf_ref[...]                                     # bf16 [hh, CLS_PAD]
    wb = wb_ref[...]

    h_f = jnp.zeros((batch, hh), jnp.float32)
    c_f = jnp.zeros((batch, hh), jnp.float32)
    h_b = jnp.zeros((batch, hh), jnp.float32)
    c_b = jnp.zeros((batch, hh), jnp.float32)

    def step(gate_rows, h, c, whh):
        gates = gate_rows + jnp.dot(_bf16(h), whh,
                                    preferred_element_type=jnp.float32)  # [B,4hh]
        # full-width sigmoid, tanh only on the g slice (gate order i,f,g,o)
        sig = jax.nn.sigmoid(gates)
        g_g = jnp.tanh(gates[:, 2 * hh:3 * hh])
        i_g = sig[:, 0:hh]
        f_g = sig[:, hh:2 * hh]
        o_g = sig[:, 3 * hh:4 * hh]
        c = f_g * c + i_g * g_g
        h = o_g * jnp.tanh(c)
        return h, c

    # Statically unrolled recurrence; the two independent directions are
    # interleaved so their tiny MXU/EUP chains overlap on 1-TC chips.
    # TODO(synk): for long sequences use lax.fori_loop(unroll=k) + VMEM scratch
    # for h/c instead of full Python unrolling (code size / vreg spills).
    for t in range(seq):
        rf = t * batch                 # forward time index
        rb = (seq - 1 - t) * batch     # backward processes time in reverse
        h_f, c_f = step(xp_f[rf:rf + batch, :], h_f, c_f, whh_f)
        h_b, c_b = step(xp_b[rb:rb + batch, :], h_b, c_b, whh_b)
        # fused classifier partials: lane-dense [batch, 128] stores; backward
        # is written already time-realigned (no wrapper-side reverse).
        o_ref[rf:rf + batch, :] = jnp.dot(_bf16(h_f), wf,
                                          preferred_element_type=jnp.float32)
        bwd_sc[rb:rb + batch, :] = jnp.dot(_bf16(h_b), wb,
                                           preferred_element_type=jnp.float32)

    o_ref[...] = o_ref[...] + bwd_sc[...] + cb_ref[...]


def bilstm_classifier(hidden_bsh, params):
    b, s, hdim = hidden_bsh.shape
    # single wrapper-side transpose to time-major (no stack / reverse copies)
    x_tm = hidden_bsh.transpose(1, 0, 2).reshape(s * b, hdim)       # [S*B, H]
    return pl.pallas_call(
        functools.partial(_bilstm_cls_kernel, seq=s, batch=b, hh=LSTM_HIDDEN),
        out_shape=jax.ShapeDtypeStruct((s * b, CLS_PAD), jnp.float32),
        in_specs=[_VMEM] * 7,
        out_specs=_VMEM,
        scratch_shapes=[pltpu.VMEM((s * b, CLS_PAD), jnp.float32)],
    )(x_tm, params['lstm']['w_ih'], params['lstm']['w_hh'],
      params['lstm']['bias'], params['cls_wf'], params['cls_wb'],
      params['cls_b'])


# ----------------------------------------------------------------------------
# Parameters (deterministic synthetic init; matmul weights stored in bf16)
# ----------------------------------------------------------------------------
def init_params(key):
    keys = iter(jax.random.split(key, 64))

    def nrm(shape, scale=0.02):
        return scale * jax.random.normal(next(keys), shape, dtype=jnp.float32)

    params = {
        'word_emb': nrm((VOCAB, HIDDEN)),
        'pos_emb': nrm((MAX_POS, HIDDEN)),
        'type_emb': nrm((2, HIDDEN)),
        'emb_ln_g': jnp.ones((1, HIDDEN), jnp.float32),
        'emb_ln_b': jnp.zeros((1, HIDDEN), jnp.float32),
    }

    attn_scale = 1.0 / float(HEAD_DIM) ** 0.5
    wqkv, bqkv, wo, bo = [], [], [], []
    ln1g, ln1b, w1, b1, w2, b2, ln2g, ln2b = ([] for _ in range(8))
    for _ in range(N_LAYERS):
        wq, wk, wv = (nrm((HIDDEN, HIDDEN)) for _ in range(3))
        # fold 1/sqrt(head_dim) into the Q columns (bias is zero anyway)
        wqkv.append(jnp.concatenate([wq * attn_scale, wk, wv], axis=1))  # [H,3H]
        bqkv.append(jnp.zeros((1, 3 * HIDDEN), jnp.float32))
        wo.append(nrm((HIDDEN, HIDDEN)))
        bo.append(jnp.zeros((1, HIDDEN), jnp.float32))
        ln1g.append(jnp.ones((1, HIDDEN), jnp.float32))
        ln1b.append(jnp.zeros((1, HIDDEN), jnp.float32))
        w1.append(nrm((HIDDEN, FFN)))
        b1.append(jnp.zeros((1, FFN), jnp.float32))
        w2.append(nrm((FFN, HIDDEN)))
        b2.append(jnp.zeros((1, HIDDEN), jnp.float32))
        ln2g.append(jnp.ones((1, HIDDEN), jnp.float32))
        ln2b.append(jnp.zeros((1, HIDDEN), jnp.float32))

    params['enc'] = {
        'wqkv': jnp.stack(wqkv).astype(jnp.bfloat16),
        'bqkv': jnp.stack(bqkv),
        'wo': jnp.stack(wo).astype(jnp.bfloat16),
        'bo': jnp.stack(bo),
        'ln1_g': jnp.stack(ln1g), 'ln1_b': jnp.stack(ln1b),
        'w1': jnp.stack(w1).astype(jnp.bfloat16), 'b1': jnp.stack(b1),
        'w2': jnp.stack(w2).astype(jnp.bfloat16), 'b2': jnp.stack(b2),
        'ln2_g': jnp.stack(ln2g), 'ln2_b': jnp.stack(ln2b),
    }

    # LSTM: dir 0 = forward, dir 1 = backward; gate order i,f,g,o (PyTorch).
    # NOTE: when loading a real checkpoint, bias must be b_ih + b_hh summed.
    params['lstm'] = {
        'w_ih': jnp.stack([nrm((HIDDEN, 4 * LSTM_HIDDEN)),
                           nrm((HIDDEN, 4 * LSTM_HIDDEN))]).astype(jnp.bfloat16),
        'w_hh': jnp.stack([nrm((LSTM_HIDDEN, 4 * LSTM_HIDDEN)),
                           nrm((LSTM_HIDDEN, 4 * LSTM_HIDDEN))]).astype(jnp.bfloat16),
        'bias': jnp.zeros((2, 1, 4 * LSTM_HIDDEN), jnp.float32),
    }

    cls_w = nrm((2 * LSTM_HIDDEN, NUM_TAGS))                        # [2*hh, 21]
    cls_w_pad = jnp.zeros((2 * LSTM_HIDDEN, CLS_PAD),
                          jnp.float32).at[:, :NUM_TAGS].set(cls_w)
    params['cls_wf'] = cls_w_pad[:LSTM_HIDDEN].astype(jnp.bfloat16)
    params['cls_wb'] = cls_w_pad[LSTM_HIDDEN:].astype(jnp.bfloat16)
    params['cls_b'] = jnp.zeros((1, CLS_PAD), jnp.float32)
    return params


# ----------------------------------------------------------------------------
# Forward pass (matches BertNer.forward with batch_labels=None -> (logits,))
# ----------------------------------------------------------------------------
def bert_ner_forward(params, input_ids, attention_mask):
    b, s = input_ids.shape

    # BERT embeddings (gather + adds are XLA glue; LN fused into encoder kernel)
    x = (params['word_emb'][input_ids]
         + params['pos_emb'][:s][None, :, :]
         + params['type_emb'][0][None, None, :])                    # [B, S, H]
    add_mask = ((1.0 - attention_mask.astype(jnp.float32))
                * -10000.0)[:, None, :]                              # [B, 1, S]

    last_hidden = encoder_forward(params['enc'], params['emb_ln_g'],
                                  params['emb_ln_b'], x, add_mask, b, s)

    # nn.Dropout is defined but unused in forward (identity at eval).
    logits_pad = bilstm_classifier(last_hidden, params)              # [S*B, 128]
    logits = (logits_pad.reshape(s, b, CLS_PAD)
              .transpose(1, 0, 2)[:, :, :NUM_TAGS])                  # [B, S, 21]

    # TODO(synk): CRF negative log-likelihood (only computed when batch_labels
    # is provided) is not implemented; with batch_labels=None the module
    # returns (logits,) which is reproduced here.
    return (logits,)


# ----------------------------------------------------------------------------
if __name__ == "__main__":
    key = jax.random.PRNGKey(0)
    pkey, ikey = jax.random.split(key)
    params = init_params(pkey)

    B, S = 2, 8
    input_ids = jax.random.randint(ikey, (B, S), 0, VOCAB, dtype=jnp.int32)
    attention_mask = jnp.ones((B, S), jnp.int32).at[1, 6:].set(0)
    bert_input = {"input_ids": input_ids, "attention_mask": attention_mask}

    fwd = jax.jit(bert_ner_forward)
    outputs = fwd(params, bert_input["input_ids"], bert_input["attention_mask"])
    logits = jax.block_until_ready(outputs[0])
    assert logits.shape == (B, S, NUM_TAGS)
    assert bool(jnp.all(jnp.isfinite(logits)))
    print("KERNEL_OK")
</pallas_src>

<mosaic_0001>
module attributes {stable_mosaic.version = 11 : i64} {
  func.func @_encoder_kernel(%arg0: i32, %arg1: i32, %arg2: memref<1x8x64xf32, #tpu.memory_space<vmem>>, %arg3: memref<1x1x8xf32, #tpu.memory_space<vmem>>, %arg4: memref<1x64xf32, #tpu.memory_space<vmem>>, %arg5: memref<1x64xf32, #tpu.memory_space<vmem>>, %arg6: memref<1x64x192xbf16, #tpu.memory_space<vmem>>, %arg7: memref<1x1x192xf32, #tpu.memory_space<vmem>>, %arg8: memref<1x64x64xbf16, #tpu.memory_space<vmem>>, %arg9: memref<1x1x64xf32, #tpu.memory_space<vmem>>, %arg10: memref<1x1x64xf32, #tpu.memory_space<vmem>>, %arg11: memref<1x1x64xf32, #tpu.memory_space<vmem>>, %arg12: memref<1x64x128xbf16, #tpu.memory_space<vmem>>, %arg13: memref<1x1x128xf32, #tpu.memory_space<vmem>>, %arg14: memref<1x128x64xbf16, #tpu.memory_space<vmem>>, %arg15: memref<1x1x64xf32, #tpu.memory_space<vmem>>, %arg16: memref<1x1x64xf32, #tpu.memory_space<vmem>>, %arg17: memref<1x1x64xf32, #tpu.memory_space<vmem>>, %arg18: memref<1x8x64xf32, #tpu.memory_space<vmem>>) attributes {dimension_semantics = [#tpu.dimension_semantics<parallel>, #tpu.dimension_semantics<arbitrary>], iteration_bounds = array<i64: 2, 2>, scalar_prefetch = 0 : i64, scratch_operands = 0 : i64, tpu.core_type = #tpu.core_type<tc>, window_params = [{transform_indices = @transform_0, window_bounds = array<i64: 1, 8, 64>}, {transform_indices = @transform_1, window_bounds = array<i64: 1, 1, 8>}, {pipeline_mode = #tpu.pipeline_mode<synchronous>, transform_indices = @transform_2, window_bounds = array<i64: 1, 64>}, {pipeline_mode = #tpu.pipeline_mode<synchronous>, transform_indices = @transform_3, window_bounds = array<i64: 1, 64>}, {transform_indices = @transform_4, window_bounds = array<i64: 1, 64, 192>}, {transform_indices = @transform_5, window_bounds = array<i64: 1, 1, 192>}, {transform_indices = @transform_6, window_bounds = array<i64: 1, 64, 64>}, {transform_indices = @transform_7, window_bounds = array<i64: 1, 1, 64>}, {transform_indices = @transform_8, window_bounds = array<i64: 1, 1, 64>}, {transform_indices = @transform_9, window_bounds = array<i64: 1, 1, 64>}, {transform_indices = @transform_10, window_bounds = array<i64: 1, 64, 128>}, {transform_indices = @transform_11, window_bounds = array<i64: 1, 1, 128>}, {transform_indices = @transform_12, window_bounds = array<i64: 1, 128, 64>}, {transform_indices = @transform_13, window_bounds = array<i64: 1, 1, 64>}, {transform_indices = @transform_14, window_bounds = array<i64: 1, 1, 64>}, {transform_indices = @transform_15, window_bounds = array<i64: 1, 1, 64>}, {transform_indices = @transform_16, window_bounds = array<i64: 1, 8, 64>}]} {
    %c0_i32 = arith.constant 0 : i32
    %0 = arith.cmpi eq, %arg1, %c0_i32 : i32
    %1 = arith.extui %0 : i1 to i32
    %c0_i32_0 = arith.constant 0 : i32
    %2 = arith.cmpi ne, %1, %c0_i32_0 : i32
    scf.if %2 {
      %c0_66 = arith.constant 0 : index
      %c0_67 = arith.constant 0 : index
      %c0_68 = arith.constant 0 : index
      %137 = vector.load %arg2[%c0_66, %c0_67, %c0_68] : memref<1x8x64xf32, #tpu.memory_space<vmem>>, vector<1x8x64xf32>
      %138 = vector.shape_cast %137 : vector<1x8x64xf32> to vector<8x64xf32>
      %c0_69 = arith.constant 0 : index
      %c0_70 = arith.constant 0 : index
      %139 = vector.load %arg4[%c0_69, %c0_70] : memref<1x64xf32, #tpu.memory_space<vmem>>, vector<1x64xf32>
      %c0_71 = arith.constant 0 : index
      %c0_72 = arith.constant 0 : index
      %140 = vector.load %arg5[%c0_71, %c0_72] : memref<1x64xf32, #tpu.memory_space<vmem>>, vector<1x64xf32>
      %cst_73 = arith.constant dense<0.000000e+00> : vector<8xf32>
      %141 = vector.multi_reduction <add>, %138, %cst_73 [1] : vector<8x64xf32> to vector<8xf32>
      %142 = vector.shape_cast %141 : vector<8xf32> to vector<8x1xf32>
      %cst_74 = arith.constant 6.400000e+01 : f32
      %143 = vector.broadcast %cst_74 : f32 to vector<8x1xf32>
      %144 = arith.divf %142, %143 : vector<8x1xf32>
      %145 = vector.broadcast %144 : vector<8x1xf32> to vector<8x64xf32>
      %146 = arith.subf %138, %145 : vector<8x64xf32>
      %147 = arith.mulf %146, %146 : vector<8x64xf32>
      %cst_75 = arith.constant dense<0.000000e+00> : vector<8xf32>
      %148 = vector.multi_reduction <add>, %147, %cst_75 [1] : vector<8x64xf32> to vector<8xf32>
      %149 = vector.shape_cast %148 : vector<8xf32> to vector<8x1xf32>
      %cst_76 = arith.constant 6.400000e+01 : f32
      %150 = vector.broadcast %cst_76 : f32 to vector<8x1xf32>
      %151 = arith.divf %149, %150 : vector<8x1xf32>
      %152 = vector.broadcast %144 : vector<8x1xf32> to vector<8x64xf32>
      %153 = arith.subf %138, %152 : vector<8x64xf32>
      %cst_77 = arith.constant 9.99999996E-13 : f32
      %154 = vector.broadcast %cst_77 : f32 to vector<8x1xf32>
      %155 = arith.addf %151, %154 : vector<8x1xf32>
      %156 = math.rsqrt %155 : vector<8x1xf32>
      %157 = vector.broadcast %156 : vector<8x1xf32> to vector<8x64xf32>
      %158 = arith.mulf %153, %157 : vector<8x64xf32>
      %159 = vector.broadcast %139 : vector<1x64xf32> to vector<8x64xf32>
      %160 = arith.mulf %158, %159 : vector<8x64xf32>
      %161 = vector.broadcast %140 : vector<1x64xf32> to vector<8x64xf32>
      %162 = arith.addf %160, %161 : vector<8x64xf32>
      %c0_78 = arith.constant 0 : index
      %c0_79 = arith.constant 0 : index
      %c0_80 = arith.constant 0 : index
      %163 = vector.load %arg18[%c0_78, %c0_79, %c0_80] : memref<1x8x64xf32, #tpu.memory_space<vmem>>, vector<1x8x64xf32>
      %164 = vector.shape_cast %163 : vector<1x8x64xf32> to vector<8x64xf32>
      %165 = vector.shape_cast %162 : vector<8x64xf32> to vector<1x8x64xf32>
      tpu.vector_store %arg18[%c0_78, %c0_79, %c0_80], %165 {strides = array<i32>} : memref<1x8x64xf32, #tpu.memory_space<vmem>>, vector<1x8x64xf32>,
    } else {
    }
    %c0 = arith.constant 0 : index
    %c0_1 = arith.constant 0 : index
    %c0_2 = arith.constant 0 : index
    %3 = vector.load %arg18[%c0, %c0_1, %c0_2] : memref<1x8x64xf32, #tpu.memory_space<vmem>>, vector<1x8x64xf32>
    %4 = vector.shape_cast %3 : vector<1x8x64xf32> to vector<8x64xf32>
    %5 = arith.truncf %4 : vector<8x64xf32> to vector<8x64xbf16>
    %c0_3 = arith.constant 0 : index
    %c0_4 = arith.constant 0 : index
    %c0_5 = arith.constant 0 : index
    %6 = vector.load %arg6[%c0_3, %c0_4, %c0_5] : memref<1x64x192xbf16, #tpu.memory_space<vmem>>, vector<1x64x192xbf16>
    %7 = vector.shape_cast %6 : vector<1x64x192xbf16> to vector<64x192xbf16>
    %cst = arith.constant dense<0.000000e+00> : vector<8x192xf32>
    %8 = tpu.matmul %5, %7, %cst {dimension_numbers = #tpu.dot_dimension_numbers<[1], [0], [0], [1], [0, 0, 1, 1], [], []>} : vector<8x64xbf16>, vector<64x192xbf16>, vector<8x192xf32> -> vector<8x192xf32>
    %c0_6 = arith.constant 0 : index
    %c0_7 = arith.constant 0 : index
    %c0_8 = arith.constant 0 : index
    %9 = vector.load %arg7[%c0_6, %c0_7, %c0_8] : memref<1x1x192xf32, #tpu.memory_space<vmem>>, vector<1x1x192xf32>
    %10 = vector.shape_cast %9 : vector<1x1x192xf32> to vector<1x192xf32>
    %11 = vector.broadcast %10 : vector<1x192xf32> to vector<8x192xf32>
    %12 = arith.addf %8, %11 : vector<8x192xf32>
    %13 = arith.truncf %12 : vector<8x192xf32> to vector<8x192xbf16>
    %14 = vector.extract_strided_slice %13 {offsets = [0, 0], sizes = [8, 64], strides = [1, 1]} : vector<8x192xbf16> to vector<8x64xbf16>
    %15 = vector.shape_cast %14 : vector<8x64xbf16> to vector<8x4x16xbf16>
    %16 = tpu.transpose %15, [1, 0, 2] : vector<8x4x16xbf16> -> vector<4x8x16xbf16>
    %17 = vector.extract_strided_slice %13 {offsets = [0, 64], sizes = [8, 64], strides = [1, 1]} : vector<8x192xbf16> to vector<8x64xbf16>
    %18 = vector.shape_cast %17 : vector<8x64xbf16> to vector<8x4x16xbf16>
    %19 = tpu.transpose %18, [1, 0, 2] : vector<8x4x16xbf16> -> vector<4x8x16xbf16>
    %20 = vector.extract_strided_slice %13 {offsets = [0, 128], sizes = [8, 64], strides = [1, 1]} : vector<8x192xbf16> to vector<8x64xbf16>
    %21 = vector.shape_cast %20 : vector<8x64xbf16> to vector<8x4x16xbf16>
    %22 = tpu.transpose %21, [1, 0, 2] : vector<8x4x16xbf16> -> vector<4x8x16xbf16>
    "tpu.trace_start"() <{level = 10 : i32, message = "hqd,hkd->hqk"}> : () -> ()
    %cst_9 = arith.constant dense<0.000000e+00> : vector<4x8x8xf32>
    %23 = tpu.matmul %16, %19, %cst_9 {dimension_numbers = #tpu.dot_dimension_numbers<[2], [2], [1], [1], [0, 0, 0, 1, 1, 1], [0], [0]>} : vector<4x8x16xbf16>, vector<4x8x16xbf16>, vector<4x8x8xf32> -> vector<4x8x8xf32>
    "tpu.trace_stop"() : () -> ()
    %c0_10 = arith.constant 0 : index
    %c0_11 = arith.constant 0 : index
    %c0_12 = arith.constant 0 : index
    %24 = vector.load %arg3[%c0_10, %c0_11, %c0_12] : memref<1x1x8xf32, #tpu.memory_space<vmem>>, vector<1x1x8xf32>
    %25 = vector.shape_cast %24 : vector<1x1x8xf32> to vector<1x8xf32>
    %26 = vector.shape_cast %25 : vector<1x8xf32> to vector<1x1x8xf32>
    %27 = vector.broadcast %26 : vector<1x1x8xf32> to vector<4x8x8xf32>
    %28 = arith.addf %23, %27 : vector<4x8x8xf32>
    %cst_13 = arith.constant dense<0xFF800000> : vector<4x8xf32>
    %29 = vector.multi_reduction <maximumf>, %28, %cst_13 [2] : vector<4x8x8xf32> to vector<4x8xf32>
    %30 = vector.shape_cast %29 : vector<4x8xf32> to vector<4x8x1xf32>
    %31 = vector.broadcast %30 : vector<4x8x1xf32> to vector<4x8x8xf32>
    %32 = arith.subf %28, %31 : vector<4x8x8xf32>
    %33 = math.exp %32 : vector<4x8x8xf32>
    %cst_14 = arith.constant dense<0.000000e+00> : vector<4x8xf32>
    %34 = vector.multi_reduction <add>, %33, %cst_14 [2] : vector<4x8x8xf32> to vector<4x8xf32>
    %35 = vector.shape_cast %34 : vector<4x8xf32> to vector<4x8x1xf32>
    %36 = tpu.reciprocal %35 {approx = true} : vector<4x8x1xf32> -> vector<4x8x1xf32>
    %37 = vector.broadcast %36 : vector<4x8x1xf32> to vector<4x8x8xf32>
    %38 = arith.mulf %33, %37 : vector<4x8x8xf32>
    %39 = arith.truncf %38 : vector<4x8x8xf32> to vector<4x8x8xbf16>
    "tpu.trace_start"() <{level = 10 : i32, message = "hqk,hkd->hqd"}> : () -> ()
    %cst_15 = arith.constant dense<0.000000e+00> : vector<4x8x16xf32>
    %40 = tpu.matmul %39, %22, %cst_15 {dimension_numbers = #tpu.dot_dimension_numbers<[2], [1], [1], [2], [0, 0, 0, 1, 1, 2], [0], [0]>} : vector<4x8x8xbf16>, vector<4x8x16xbf16>, vector<4x8x16xf32> -> vector<4x8x16xf32>
    "tpu.trace_stop"() : () -> ()
    %41 = tpu.transpose %40, [1, 0, 2] : vector<4x8x16xf32> -> vector<8x4x16xf32>
    %42 = vector.shape_cast %41 : vector<8x4x16xf32> to vector<8x64xf32>
    %43 = arith.truncf %42 : vector<8x64xf32> to vector<8x64xbf16>
    %c0_16 = arith.constant 0 : index
    %c0_17 = arith.constant 0 : index
    %c0_18 = arith.constant 0 : index
    %44 = vector.load %arg8[%c0_16, %c0_17, %c0_18] : memref<1x64x64xbf16, #tpu.memory_space<vmem>>, vector<1x64x64xbf16>
    %45 = vector.shape_cast %44 : vector<1x64x64xbf16> to vector<64x64xbf16>
    %cst_19 = arith.constant dense<0.000000e+00> : vector<8x64xf32>
    %46 = tpu.matmul %43, %45, %cst_19 {dimension_numbers = #tpu.dot_dimension_numbers<[1], [0], [0], [1], [0, 0, 1, 1], [], []>} : vector<8x64xbf16>, vector<64x64xbf16>, vector<8x64xf32> -> vector<8x64xf32>
    %c0_20 = arith.constant 0 : index
    %c0_21 = arith.constant 0 : index
    %c0_22 = arith.constant 0 : index
    %47 = vector.load %arg9[%c0_20, %c0_21, %c0_22] : memref<1x1x64xf32, #tpu.memory_space<vmem>>, vector<1x1x64xf32>
    %48 = vector.shape_cast %47 : vector<1x1x64xf32> to vector<1x64xf32>
    %49 = vector.broadcast %48 : vector<1x64xf32> to vector<8x64xf32>
    %50 = arith.addf %46, %49 : vector<8x64xf32>
    %51 = arith.addf %50, %4 : vector<8x64xf32>
    %c0_23 = arith.constant 0 : index
    %c0_24 = arith.constant 0 : index
    %c0_25 = arith.constant 0 : index
    %52 = vector.load %arg10[%c0_23, %c0_24, %c0_25] : memref<1x1x64xf32, #tpu.memory_space<vmem>>, vector<1x1x64xf32>
    %53 = vector.shape_cast %52 : vector<1x1x64xf32> to vector<1x64xf32>
    %c0_26 = arith.constant 0 : index
    %c0_27 = arith.constant 0 : index
    %c0_28 = arith.constant 0 : index
    %54 = vector.load %arg11[%c0_26, %c0_27, %c0_28] : memref<1x1x64xf32, #tpu.memory_space<vmem>>, vector<1x1x64xf32>
    %55 = vector.shape_cast %54 : vector<1x1x64xf32> to vector<1x64xf32>
    %cst_29 = arith.constant dense<0.000000e+00> : vector<8xf32>
    %56 = vector.multi_reduction <add>, %51, %cst_29 [1] : vector<8x64xf32> to vector<8xf32>
    %57 = vector.shape_cast %56 : vector<8xf32> to vector<8x1xf32>
    %cst_30 = arith.constant 6.400000e+01 : f32
    %58 = vector.broadcast %cst_30 : f32 to vector<8x1xf32>
    %59 = arith.divf %57, %58 : vector<8x1xf32>
    %60 = vector.broadcast %59 : vector<8x1xf32> to vector<8x64xf32>
    %61 = arith.subf %51, %60 : vector<8x64xf32>
    %62 = arith.mulf %61, %61 : vector<8x64xf32>
    %cst_31 = arith.constant dense<0.000000e+00> : vector<8xf32>
    %63 = vector.multi_reduction <add>, %62, %cst_31 [1] : vector<8x64xf32> to vector<8xf32>
    %64 = vector.shape_cast %63 : vector<8xf32> to vector<8x1xf32>
    %cst_32 = arith.constant 6.400000e+01 : f32
    %65 = vector.broadcast %cst_32 : f32 to vector<8x1xf32>
    %66 = arith.divf %64, %65 : vector<8x1xf32>
    %67 = vector.broadcast %59 : vector<8x1xf32> to vector<8x64xf32>
    %68 = arith.subf %51, %67 : vector<8x64xf32>
    %cst_33 = arith.constant 9.99999996E-13 : f32
    %69 = vector.broadcast %cst_33 : f32 to vector<8x1xf32>
    %70 = arith.addf %66, %69 : vector<8x1xf32>
    %71 = math.rsqrt %70 : vector<8x1xf32>
    %72 = vector.broadcast %71 : vector<8x1xf32> to vector<8x64xf32>
    %73 = arith.mulf %68, %72 : vector<8x64xf32>
    %74 = vector.broadcast %53 : vector<1x64xf32> to vector<8x64xf32>
    %75 = arith.mulf %73, %74 : vector<8x64xf32>
    %76 = vector.broadcast %55 : vector<1x64xf32> to vector<8x64xf32>
    %77 = arith.addf %75, %76 : vector<8x64xf32>
    %78 = arith.truncf %77 : vector<8x64xf32> to vector<8x64xbf16>
    %c0_34 = arith.constant 0 : index
    %c0_35 = arith.constant 0 : index
    %c0_36 = arith.constant 0 : index
    %79 = vector.load %arg12[%c0_34, %c0_35, %c0_36] : memref<1x64x128xbf16, #tpu.memory_space<vmem>>, vector<1x64x128xbf16>
    %80 = vector.shape_cast %79 : vector<1x64x128xbf16> to vector<64x128xbf16>
    %cst_37 = arith.constant dense<0.000000e+00> : vector<8x128xf32>
    %81 = tpu.matmul %78, %80, %cst_37 {dimension_numbers = #tpu.dot_dimension_numbers<[1], [0], [0], [1], [0, 0, 1, 1], [], []>} : vector<8x64xbf16>, vector<64x128xbf16>, vector<8x128xf32> -> vector<8x128xf32>
    %c0_38 = arith.constant 0 : index
    %c0_39 = arith.constant 0 : index
    %c0_40 = arith.constant 0 : index
    %82 = vector.load %arg13[%c0_38, %c0_39, %c0_40] : memref<1x1x128xf32, #tpu.memory_space<vmem>>, vector<1x1x128xf32>
    %83 = vector.shape_cast %82 : vector<1x1x128xf32> to vector<1x128xf32>
    %84 = vector.broadcast %83 : vector<1x128xf32> to vector<8x128xf32>
    %85 = arith.addf %81, %84 : vector<8x128xf32>
    %cst_41 = arith.constant 5.000000e-01 : f32
    %86 = vector.broadcast %cst_41 : f32 to vector<8x128xf32>
    %87 = arith.mulf %86, %85 : vector<8x128xf32>
    %cst_42 = arith.constant 4.471500e-02 : f32
    %88 = vector.broadcast %cst_42 : f32 to vector<8x128xf32>
    %89 = arith.mulf %88, %85 : vector<8x128xf32>
    %90 = arith.mulf %89, %85 : vector<8x128xf32>
    %91 = arith.mulf %90, %85 : vector<8x128xf32>
    %92 = arith.addf %85, %91 : vector<8x128xf32>
    %cst_43 = arith.constant 0.797884583 : f32
    %93 = vector.broadcast %cst_43 : f32 to vector<8x128xf32>
    %94 = arith.mulf %93, %92 : vector<8x128xf32>
    %95 = math.tanh %94 : vector<8x128xf32>
    %cst_44 = arith.constant 1.000000e+00 : f32
    %96 = vector.broadcast %cst_44 : f32 to vector<8x128xf32>
    %97 = arith.addf %96, %95 : vector<8x128xf32>
    %98 = arith.mulf %87, %97 : vector<8x128xf32>
    %99 = arith.truncf %98 : vector<8x128xf32> to vector<8x128xbf16>
    %c0_45 = arith.constant 0 : index
    %c0_46 = arith.constant 0 : index
    %c0_47 = arith.constant 0 : index
    %100 = vector.load %arg14[%c0_45, %c0_46, %c0_47] : memref<1x128x64xbf16, #tpu.memory_space<vmem>>, vector<1x128x64xbf16>
    %101 = vector.shape_cast %100 : vector<1x128x64xbf16> to vector<128x64xbf16>
    %cst_48 = arith.constant dense<0.000000e+00> : vector<8x64xf32>
    %102 = tpu.matmul %99, %101, %cst_48 {dimension_numbers = #tpu.dot_dimension_numbers<[1], [0], [0], [1], [0, 0, 1, 1], [], []>} : vector<8x128xbf16>, vector<128x64xbf16>, vector<8x64xf32> -> vector<8x64xf32>
    %c0_49 = arith.constant 0 : index
    %c0_50 = arith.constant 0 : index
    %c0_51 = arith.constant 0 : index
    %103 = vector.load %arg15[%c0_49, %c0_50, %c0_51] : memref<1x1x64xf32, #tpu.memory_space<vmem>>, vector<1x1x64xf32>
    %104 = vector.shape_cast %103 : vector<1x1x64xf32> to vector<1x64xf32>
    %105 = vector.broadcast %104 : vector<1x64xf32> to vector<8x64xf32>
    %106 = arith.addf %102, %105 : vector<8x64xf32>
    %107 = arith.addf %106, %77 : vector<8x64xf32>
    %c0_52 = arith.constant 0 : index
    %c0_53 = arith.constant 0 : index
    %c0_54 = arith.constant 0 : index
    %108 = vector.load %arg16[%c0_52, %c0_53, %c0_54] : memref<1x1x64xf32, #tpu.memory_space<vmem>>, vector<1x1x64xf32>
    %109 = vector.shape_cast %108 : vector<1x1x64xf32> to vector<1x64xf32>
    %c0_55 = arith.constant 0 : index
    %c0_56 = arith.constant 0 : index
    %c0_57 = arith.constant 0 : index
    %110 = vector.load %arg17[%c0_55, %c0_56, %c0_57] : memref<1x1x64xf32, #tpu.memory_space<vmem>>, vector<1x1x64xf32>
    %111 = vector.shape_cast %110 : vector<1x1x64xf32> to vector<1x64xf32>
    %cst_58 = arith.constant dense<0.000000e+00> : vector<8xf32>
    %112 = vector.multi_reduction <add>, %107, %cst_58 [1] : vector<8x64xf32> to vector<8xf32>
    %113 = vector.shape_cast %112 : vector<8xf32> to vector<8x1xf32>
    %cst_59 = arith.constant 6.400000e+01 : f32
    %114 = vector.broadcast %cst_59 : f32 to vector<8x1xf32>
    %115 = arith.divf %113, %114 : vector<8x1xf32>
    %116 = vector.broadcast %115 : vector<8x1xf32> to vector<8x64xf32>
    %117 = arith.subf %107, %116 : vector<8x64xf32>
    %118 = arith.mulf %117, %117 : vector<8x64xf32>
    %cst_60 = arith.constant dense<0.000000e+00> : vector<8xf32>
    %119 = vector.multi_reduction <add>, %118, %cst_60 [1] : vector<8x64xf32> to vector<8xf32>
    %120 = vector.shape_cast %119 : vector<8xf32> to vector<8x1xf32>
    %cst_61 = arith.constant 6.400000e+01 : f32
    %121 = vector.broadcast %cst_61 : f32 to vector<8x1xf32>
    %122 = arith.divf %120, %121 : vector<8x1xf32>
    %123 = vector.broadcast %115 : vector<8x1xf32> to vector<8x64xf32>
    %124 = arith.subf %107, %123 : vector<8x64xf32>
    %cst_62 = arith.constant 9.99999996E-13 : f32
    %125 = vector.broadcast %cst_62 : f32 to vector<8x1xf32>
    %126 = arith.addf %122, %125 : vector<8x1xf32>
    %127 = math.rsqrt %126 : vector<8x1xf32>
    %128 = vector.broadcast %127 : vector<8x1xf32> to vector<8x64xf32>
    %129 = arith.mulf %124, %128 : vector<8x64xf32>
    %130 = vector.broadcast %109 : vector<1x64xf32> to vector<8x64xf32>
    %131 = arith.mulf %129, %130 : vector<8x64xf32>
    %132 = vector.broadcast %111 : vector<1x64xf32> to vector<8x64xf32>
    %133 = arith.addf %131, %132 : vector<8x64xf32>
    %c0_63 = arith.constant 0 : index
    %c0_64 = arith.constant 0 : index
    %c0_65 = arith.constant 0 : index
    %134 = vector.load %arg18[%c0_63, %c0_64, %c0_65] : memref<1x8x64xf32, #tpu.memory_space<vmem>>, vector<1x8x64xf32>
    %135 = vector.shape_cast %134 : vector<1x8x64xf32> to vector<8x64xf32>
    %136 = vector.shape_cast %133 : vector<8x64xf32> to vector<1x8x64xf32>
    tpu.vector_store %arg18[%c0_63, %c0_64, %c0_65], %136 {strides = array<i32>} : memref<1x8x64xf32, #tpu.memory_space<vmem>>, vector<1x8x64xf32>,
    return
  }
  func.func @transform_0(%arg0: i32, %arg1: i32) -> (i32, i32, i32) {
    %c0_i32 = arith.constant 0 : i32
    %c0_i32_0 = arith.constant 0 : i32
    %c0_i32_1 = arith.constant 0 : i32
    return %arg0, %c0_i32, %c0_i32_0 : i32, i32, i32
  }
  func.func @transform_1(%arg0: i32, %arg1: i32) -> (i32, i32, i32) {
    %c0_i32 = arith.constant 0 : i32
    %c0_i32_0 = arith.constant 0 : i32
    %c0_i32_1 = arith.constant 0 : i32
    return %arg0, %c0_i32, %c0_i32_0 : i32, i32, i32
  }
  func.func @transform_2(%arg0: i32, %arg1: i32) -> (i32, i32) {
    %c0_i32 = arith.constant 0 : i32
    %c0_i32_0 = arith.constant 0 : i32
    %c0_i32_1 = arith.constant 0 : i32
    return %c0_i32, %c0_i32_0 : i32, i32
  }
  func.func @transform_3(%arg0: i32, %arg1: i32) -> (i32, i32) {
    %c0_i32 = arith.constant 0 : i32
    %c0_i32_0 = arith.constant 0 : i32
    %c0_i32_1 = arith.constant 0 : i32
    return %c0_i32, %c0_i32_0 : i32, i32
  }
  func.func @transform_4(%arg0: i32, %arg1: i32) -> (i32, i32, i32) {
    %c0_i32 = arith.constant 0 : i32
    %c0_i32_0 = arith.constant 0 : i32
    %c0_i32_1 = arith.constant 0 : i32
    return %arg1, %c0_i32, %c0_i32_0 : i32, i32, i32
  }
  func.func @transform_5(%arg0: i32, %arg1: i32) -> (i32, i32, i32) {
    %c0_i32 = arith.constant 0 : i32
    %c0_i32_0 = arith.constant 0 : i32
    %c0_i32_1 = arith.constant 0 : i32
    return %arg1, %c0_i32, %c0_i32_0 : i32, i32, i32
  }
  func.func @transform_6(%arg0: i32, %arg1: i32) -> (i32, i32, i32) {
    %c0_i32 = arith.constant 0 : i32
    %c0_i32_0 = arith.constant 0 : i32
    %c0_i32_1 = arith.constant 0 : i32
    return %arg1, %c0_i32, %c0_i32_0 : i32, i32, i32
  }
  func.func @transform_7(%arg0: i32, %arg1: i32) -> (i32, i32, i32) {
    %c0_i32 = arith.constant 0 : i32
    %c0_i32_0 = arith.constant 0 : i32
    %c0_i32_1 = arith.constant 0 : i32
    return %arg1, %c0_i32, %c0_i32_0 : i32, i32, i32
  }
  func.func @transform_8(%arg0: i32, %arg1: i32) -> (i32, i32, i32) {
    %c0_i32 = arith.constant 0 : i32
    %c0_i32_0 = arith.constant 0 : i32
    %c0_i32_1 = arith.constant 0 : i32
    return %arg1, %c0_i32, %c0_i32_0 : i32, i32, i32
  }
  func.func @transform_9(%arg0: i32, %arg1: i32) -> (i32, i32, i32) {
    %c0_i32 = arith.constant 0 : i32
    %c0_i32_0 = arith.constant 0 : i32
    %c0_i32_1 = arith.constant 0 : i32
    return %arg1, %c0_i32, %c0_i32_0 : i32, i32, i32
  }
  func.func @transform_10(%arg0: i32, %arg1: i32) -> (i32, i32, i32) {
    %c0_i32 = arith.constant 0 : i32
    %c0_i32_0 = arith.constant 0 : i32
    %c0_i32_1 = arith.constant 0 : i32
    return %arg1, %c0_i32, %c0_i32_0 : i32, i32, i32
  }
  func.func @transform_11(%arg0: i32, %arg1: i32) -> (i32, i32, i32) {
    %c0_i32 = arith.constant 0 : i32
    %c0_i32_0 = arith.constant 0 : i32
    %c0_i32_1 = arith.constant 0 : i32
    return %arg1, %c0_i32, %c0_i32_0 : i32, i32, i32
  }
  func.func @transform_12(%arg0: i32, %arg1: i32) -> (i32, i32, i32) {
    %c0_i32 = arith.constant 0 : i32
    %c0_i32_0 = arith.constant 0 : i32
    %c0_i32_1 = arith.constant 0 : i32
    return %arg1, %c0_i32, %c0_i32_0 : i32, i32, i32
  }
  func.func @transform_13(%arg0: i32, %arg1: i32) -> (i32, i32, i32) {
    %c0_i32 = arith.constant 0 : i32
    %c0_i32_0 = arith.constant 0 : i32
    %c0_i32_1 = arith.constant 0 : i32
    return %arg1, %c0_i32, %c0_i32_0 : i32, i32, i32
  }
  func.func @transform_14(%arg0: i32, %arg1: i32) -> (i32, i32, i32) {
    %c0_i32 = arith.constant 0 : i32
    %c0_i32_0 = arith.constant 0 : i32
    %c0_i32_1 = arith.constant 0 : i32
    return %arg1, %c0_i32, %c0_i32_0 : i32, i32, i32
  }
  func.func @transform_15(%arg0: i32, %arg1: i32) -> (i32, i32, i32) {
    %c0_i32 = arith.constant 0 : i32
    %c0_i32_0 = arith.constant 0 : i32
    %c0_i32_1 = arith.constant 0 : i32
    return %arg1, %c0_i32, %c0_i32_0 : i32, i32, i32
  }
  func.func @transform_16(%arg0: i32, %arg1: i32) -> (i32, i32, i32) {
    %c0_i32 = arith.constant 0 : i32
    %c0_i32_0 = arith.constant 0 : i32
    %c0_i32_1 = arith.constant 0 : i32
    return %arg0, %c0_i32, %c0_i32_0 : i32, i32, i32
  }
}

module attributes {stable_mosaic.version = 11 : i64} {
  func.func @_bilstm_cls_kernel(%arg0: memref<16x64xf32, #tpu.memory_space<vmem>>, %arg1: memref<2x64x128xbf16, #tpu.memory_space<vmem>>, %arg2: memref<2x32x128xbf16, #tpu.memory_space<vmem>>, %arg3: memref<2x1x128xf32, #tpu.memory_space<vmem>>, %arg4: memref<32x128xbf16, #tpu.memory_space<vmem>>, %arg5: memref<32x128xbf16, #tpu.memory_space<vmem>>, %arg6: memref<1x128xf32, #tpu.memory_space<vmem>>, %arg7: memref<16x128xf32, #tpu.memory_space<vmem>>, %arg8: memref<16x128xf32, #tpu.memory_space<vmem>>) attributes {dimension_semantics = [], scalar_prefetch = 0 : i64, scratch_operands = 1 : i64, tpu.core_type = #tpu.core_type<tc>} {
    %c0 = arith.constant 0 : index
    %c0_0 = arith.constant 0 : index
    %0 = vector.load %arg0[%c0, %c0_0] : memref<16x64xf32, #tpu.memory_space<vmem>>, vector<16x64xf32>
    %1 = arith.truncf %0 : vector<16x64xf32> to vector<16x64xbf16>
    %c0_1 = arith.constant 0 : index
    %c0_2 = arith.constant 0 : index
    %c0_3 = arith.constant 0 : index
    %2 = vector.load %arg1[%c0_1, %c0_2, %c0_3] : memref<2x64x128xbf16, #tpu.memory_space<vmem>>, vector<1x64x128xbf16>
    %3 = vector.shape_cast %2 : vector<1x64x128xbf16> to vector<64x128xbf16>
    %cst = arith.constant dense<0.000000e+00> : vector<16x128xf32>
    %4 = tpu.matmul %1, %3, %cst {dimension_numbers = #tpu.dot_dimension_numbers<[1], [0], [0], [1], [0, 0, 1, 1], [], []>} : vector<16x64xbf16>, vector<64x128xbf16>, vector<16x128xf32> -> vector<16x128xf32>
    %c0_4 = arith.constant 0 : index
    %c0_5 = arith.constant 0 : index
    %c0_6 = arith.constant 0 : index
    %5 = vector.load %arg3[%c0_4, %c0_5, %c0_6] : memref<2x1x128xf32, #tpu.memory_space<vmem>>, vector<1x1x128xf32>
    %6 = vector.shape_cast %5 : vector<1x1x128xf32> to vector<1x128xf32>
    %7 = vector.broadcast %6 : vector<1x128xf32> to vector<16x128xf32>
    %8 = arith.addf %4, %7 : vector<16x128xf32>
    %c1 = arith.constant 1 : index
    %c0_7 = arith.constant 0 : index
    %c0_8 = arith.constant 0 : index
    %9 = vector.load %arg1[%c1, %c0_7, %c0_8] : memref<2x64x128xbf16, #tpu.memory_space<vmem>>, vector<1x64x128xbf16>
    %10 = vector.shape_cast %9 : vector<1x64x128xbf16> to vector<64x128xbf16>
    %cst_9 = arith.constant dense<0.000000e+00> : vector<16x128xf32>
    %11 = tpu.matmul %1, %10, %cst_9 {dimension_numbers = #tpu.dot_dimension_numbers<[1], [0], [0], [1], [0, 0, 1, 1], [], []>} : vector<16x64xbf16>, vector<64x128xbf16>, vector<16x128xf32> -> vector<16x128xf32>
    %c1_10 = arith.constant 1 : index
    %c0_11 = arith.constant 0 : index
    %c0_12 = arith.constant 0 : index
    %12 = vector.load %arg3[%c1_10, %c0_11, %c0_12] : memref<2x1x128xf32, #tpu.memory_space<vmem>>, vector<1x1x128xf32>
    %13 = vector.shape_cast %12 : vector<1x1x128xf32> to vector<1x128xf32>
    %14 = vector.broadcast %13 : vector<1x128xf32> to vector<16x128xf32>
    %15 = arith.addf %11, %14 : vector<16x128xf32>
    %c0_13 = arith.constant 0 : index
    %c0_14 = arith.constant 0 : index
    %c0_15 = arith.constant 0 : index
    %16 = vector.load %arg2[%c0_13, %c0_14, %c0_15] : memref<2x32x128xbf16, #tpu.memory_space<vmem>>, vector<1x32x128xbf16>
    %17 = vector.shape_cast %16 : vector<1x32x128xbf16> to vector<32x128xbf16>
    %c1_16 = arith.constant 1 : index
    %c0_17 = arith.constant 0 : index
    %c0_18 = arith.constant 0 : index
    %18 = vector.load %arg2[%c1_16, %c0_17, %c0_18] : memref<2x32x128xbf16, #tpu.memory_space<vmem>>, vector<1x32x128xbf16>
    %19 = vector.shape_cast %18 : vector<1x32x128xbf16> to vector<32x128xbf16>
    %c0_19 = arith.constant 0 : index
    %c0_20 = arith.constant 0 : index
    %20 = vector.load %arg4[%c0_19, %c0_20] : memref<32x128xbf16, #tpu.memory_space<vmem>>, vector<32x128xbf16>
    %c0_21 = arith.constant 0 : index
    %c0_22 = arith.constant 0 : index
    %21 = vector.load %arg5[%c0_21, %c0_22] : memref<32x128xbf16, #tpu.memory_space<vmem>>, vector<32x128xbf16>
    %cst_23 = arith.constant 0.000000e+00 : f32
    %22 = vector.broadcast %cst_23 : f32 to vector<2x32xf32>
    %cst_24 = arith.constant 0.000000e+00 : f32
    %23 = vector.broadcast %cst_24 : f32 to vector<2x32xf32>
    %cst_25 = arith.constant 0.000000e+00 : f32
    %24 = vector.broadcast %cst_25 : f32 to vector<2x32xf32>
    %cst_26 = arith.constant 0.000000e+00 : f32
    %25 = vector.broadcast %cst_26 : f32 to vector<2x32xf32>
    %26 = vector.extract_strided_slice %8 {offsets = [0, 0], sizes = [2, 128], strides = [1, 1]} : vector<16x128xf32> to vector<2x128xf32>
    %27 = arith.truncf %22 : vector<2x32xf32> to vector<2x32xbf16>
    %cst_27 = arith.constant dense<0.000000e+00> : vector<2x128xf32>
    %28 = tpu.matmul %27, %17, %cst_27 {dimension_numbers = #tpu.dot_dimension_numbers<[1], [0], [0], [1], [0, 0, 1, 1], [], []>} : vector<2x32xbf16>, vector<32x128xbf16>, vector<2x128xf32> -> vector<2x128xf32>
    %29 = arith.addf %26, %28 : vector<2x128xf32>
    %30 = arith.negf %29 : vector<2x128xf32>
    %31 = math.exp %30 : vector<2x128xf32>
    %cst_28 = arith.constant 1.000000e+00 : f32
    %32 = vector.broadcast %cst_28 : f32 to vector<2x128xf32>
    %33 = arith.addf %32, %31 : vector<2x128xf32>
    %34 = arith.divf %32, %33 : vector<2x128xf32>
    %35 = vector.extract_strided_slice %29 {offsets = [0, 64], sizes = [2, 32], strides = [1, 1]} : vector<2x128xf32> to vector<2x32xf32>
    %36 = math.tanh %35 : vector<2x32xf32>
    %37 = vector.extract_strided_slice %34 {offsets = [0, 0], sizes = [2, 32], strides = [1, 1]} : vector<2x128xf32> to vector<2x32xf32>
    %38 = vector.extract_strided_slice %34 {offsets = [0, 32], sizes = [2, 32], strides = [1, 1]} : vector<2x128xf32> to vector<2x32xf32>
    %39 = vector.extract_strided_slice %34 {offsets = [0, 96], sizes = [2, 32], strides = [1, 1]} : vector<2x128xf32> to vector<2x32xf32>
    %40 = arith.mulf %38, %23 : vector<2x32xf32>
    %41 = arith.mulf %37, %36 : vector<2x32xf32>
    %42 = arith.addf %40, %41 : vector<2x32xf32>
    %43 = math.tanh %42 : vector<2x32xf32>
    %44 = arith.mulf %39, %43 : vector<2x32xf32>
    %45 = vector.extract_strided_slice %15 {offsets = [14, 0], sizes = [2, 128], strides = [1, 1]} : vector<16x128xf32> to vector<2x128xf32>
    %46 = arith.truncf %24 : vector<2x32xf32> to vector<2x32xbf16>
    %cst_29 = arith.constant dense<0.000000e+00> : vector<2x128xf32>
    %47 = tpu.matmul %46, %19, %cst_29 {dimension_numbers = #tpu.dot_dimension_numbers<[1], [0], [0], [1], [0, 0, 1, 1], [], []>} : vector<2x32xbf16>, vector<32x128xbf16>, vector<2x128xf32> -> vector<2x128xf32>
    %48 = arith.addf %45, %47 : vector<2x128xf32>
    %49 = arith.negf %48 : vector<2x128xf32>
    %50 = math.exp %49 : vector<2x128xf32>
    %cst_30 = arith.constant 1.000000e+00 : f32
    %51 = vector.broadcast %cst_30 : f32 to vector<2x128xf32>
    %52 = arith.addf %51, %50 : vector<2x128xf32>
    %53 = arith.divf %51, %52 : vector<2x128xf32>
    %54 = vector.extract_strided_slice %48 {offsets = [0, 64], sizes = [2, 32], strides = [1, 1]} : vector<2x128xf32> to vector<2x32xf32>
    %55 = math.tanh %54 : vector<2x32xf32>
    %56 = vector.extract_strided_slice %53 {offsets = [0, 0], sizes = [2, 32], strides = [1, 1]} : vector<2x128xf32> to vector<2x32xf32>
    %57 = vector.extract_strided_slice %53 {offsets = [0, 32], sizes = [2, 32], strides = [1, 1]} : vector<2x128xf32> to vector<2x32xf32>
    %58 = vector.extract_strided_slice %53 {offsets = [0, 96], sizes = [2, 32], strides = [1, 1]} : vector<2x128xf32> to vector<2x32xf32>
    %59 = arith.mulf %57, %25 : vector<2x32xf32>
    %60 = arith.mulf %56, %55 : vector<2x32xf32>
    %61 = arith.addf %59, %60 : vector<2x32xf32>
    %62 = math.tanh %61 : vector<2x32xf32>
    %63 = arith.mulf %58, %62 : vector<2x32xf32>
    %64 = arith.truncf %44 : vector<2x32xf32> to vector<2x32xbf16>
    %cst_31 = arith.constant dense<0.000000e+00> : vector<2x128xf32>
    %65 = tpu.matmul %64, %20, %cst_31 {dimension_numbers = #tpu.dot_dimension_numbers<[1], [0], [0], [1], [0, 0, 1, 1], [], []>} : vector<2x32xbf16>, vector<32x128xbf16>, vector<2x128xf32> -> vector<2x128xf32>
    %c0_32 = arith.constant 0 : index
    %c0_33 = arith.constant 0 : index
    %66 = vector.load %arg7[%c0_32, %c0_33] : memref<16x128xf32, #tpu.memory_space<vmem>>, vector<2x128xf32>
    tpu.vector_store %arg7[%c0_32, %c0_33], %65 {strides = array<i32>} : memref<16x128xf32, #tpu.memory_space<vmem>>, vector<2x128xf32>,
    %67 = arith.truncf %63 : vector<2x32xf32> to vector<2x32xbf16>
    %cst_34 = arith.constant dense<0.000000e+00> : vector<2x128xf32>
    %68 = tpu.matmul %67, %21, %cst_34 {dimension_numbers = #tpu.dot_dimension_numbers<[1], [0], [0], [1], [0, 0, 1, 1], [], []>} : vector<2x32xbf16>, vector<32x128xbf16>, vector<2x128xf32> -> vector<2x128xf32>
    %c14 = arith.constant 14 : index
    %c0_35 = arith.constant 0 : index
    %69 = vector.load %arg8[%c14, %c0_35] : memref<16x128xf32, #tpu.memory_space<vmem>>, vector<2x128xf32>
    tpu.vector_store %arg8[%c14, %c0_35], %68 {strides = array<i32>} : memref<16x128xf32, #tpu.memory_space<vmem>>, vector<2x128xf32>,
    %70 = vector.extract_strided_slice %8 {offsets = [2, 0], sizes = [2, 128], strides = [1, 1]} : vector<16x128xf32> to vector<2x128xf32>
    %71 = arith.truncf %44 : vector<2x32xf32> to vector<2x32xbf16>
    %cst_36 = arith.constant dense<0.000000e+00> : vector<2x128xf32>
    %72 = tpu.matmul %71, %17, %cst_36 {dimension_numbers = #tpu.dot_dimension_numbers<[1], [0], [0], [1], [0, 0, 1, 1], [], []>} : vector<2x32xbf16>, vector<32x128xbf16>, vector<2x128xf32> -> vector<2x128xf32>
    %73 = arith.addf %70, %72 : vector<2x128xf32>
    %74 = arith.negf %73 : vector<2x128xf32>
    %75 = math.exp %74 : vector<2x128xf32>
    %cst_37 = arith.constant 1.000000e+00 : f32
    %76 = vector.broadcast %cst_37 : f32 to vector<2x128xf32>
    %77 = arith.addf %76, %75 : vector<2x128xf32>
    %78 = arith.divf %76, %77 : vector<2x128xf32>
    %79 = vector.extract_strided_slice %73 {offsets = [0, 64], sizes = [2, 32], strides = [1, 1]} : vector<2x128xf32> to vector<2x32xf32>
    %80 = math.tanh %79 : vector<2x32xf32>
    %81 = vector.extract_strided_slice %78 {offsets = [0, 0], sizes = [2, 32], strides = [1, 1]} : vector<2x128xf32> to vector<2x32xf32>
    %82 = vector.extract_strided_slice %78 {offsets = [0, 32], sizes = [2, 32], strides = [1, 1]} : vector<2x128xf32> to vector<2x32xf32>
    %83 = vector.extract_strided_slice %78 {offsets = [0, 96], sizes = [2, 32], strides = [1, 1]} : vector<2x128xf32> to vector<2x32xf32>
    %84 = arith.mulf %82, %42 : vector<2x32xf32>
    %85 = arith.mulf %81, %80 : vector<2x32xf32>
    %86 = arith.addf %84, %85 : vector<2x32xf32>
    %87 = math.tanh %86 : vector<2x32xf32>
    %88 = arith.mulf %83, %87 : vector<2x32xf32>
    %89 = vector.extract_strided_slice %15 {offsets = [12, 0], sizes = [2, 128], strides = [1, 1]} : vector<16x128xf32> to vector<2x128xf32>
    %90 = arith.truncf %63 : vector<2x32xf32> to vector<2x32xbf16>
    %cst_38 = arith.constant dense<0.000000e+00> : vector<2x128xf32>
    %91 = tpu.matmul %90, %19, %cst_38 {dimension_numbers = #tpu.dot_dimension_numbers<[1], [0], [0], [1], [0, 0, 1, 1], [], []>} : vector<2x32xbf16>, vector<32x128xbf16>, vector<2x128xf32> -> vector<2x128xf32>
    %92 = arith.addf %89, %91 : vector<2x128xf32>
    %93 = arith.negf %92 : vector<2x128xf32>
    %94 = math.exp %93 : vector<2x128xf32>
    %cst_39 = arith.constant 1.000000e+00 : f32
    %95 = vector.broadcast %cst_39 : f32 to vector<2x128xf32>
    %96 = arith.addf %95, %94 : vector<2x128xf32>
    %97 = arith.divf %95, %96 : vector<2x128xf32>
    %98 = vector.extract_strided_slice %92 {offsets = [0, 64], sizes = [2, 32], strides = [1, 1]} : vector<2x128xf32> to vector<2x32xf32>
    %99 = math.tanh %98 : vector<2x32xf32>
    %100 = vector.extract_strided_slice %97 {offsets = [0, 0], sizes = [2, 32], strides = [1, 1]} : vector<2x128xf32> to vector<2x32xf32>
    %101 = vector.extract_strided_slice %97 {offsets = [0, 32], sizes = [2, 32], strides = [1, 1]} : vector<2x128xf32> to vector<2x32xf32>
    %102 = vector.extract_strided_slice %97 {offsets = [0, 96], sizes = [2, 32], strides = [1, 1]} : vector<2x128xf32> to vector<2x32xf32>
    %103 = arith.mulf %101, %61 : vector<2x32xf32>
    %104 = arith.mulf %100, %99 : vector<2x32xf32>
    %105 = arith.addf %103, %104 : vector<2x32xf32>
    %106 = math.tanh %105 : vector<2x32xf32>
    %107 = arith.mulf %102, %106 : vector<2x32xf32>
    %108 = arith.truncf %88 : vector<2x32xf32> to vector<2x32xbf16>
    %cst_40 = arith.constant dense<0.000000e+00> : vector<2x128xf32>
    %109 = tpu.matmul %108, %20, %cst_40 {dimension_numbers = #tpu.dot_dimension_numbers<[1], [0], [0], [1], [0, 0, 1, 1], [], []>} : vector<2x32xbf16>, vector<32x128xbf16>, vector<2x128xf32> -> vector<2x128xf32>
    %c2 = arith.constant 2 : index
    %c0_41 = arith.constant 0 : index
    %110 = vector.load %arg7[%c2, %c0_41] : memref<16x128xf32, #tpu.memory_space<vmem>>, vector<2x128xf32>
    tpu.vector_store %arg7[%c2, %c0_41], %109 {strides = array<i32>} : memref<16x128xf32, #tpu.memory_space<vmem>>, vector<2x128xf32>,
    %111 = arith.truncf %107 : vector<2x32xf32> to vector<2x32xbf16>
    %cst_42 = arith.constant dense<0.000000e+00> : vector<2x128xf32>
    %112 = tpu.matmul %111, %21, %cst_42 {dimension_numbers = #tpu.dot_dimension_numbers<[1], [0], [0], [1], [0, 0, 1, 1], [], []>} : vector<2x32xbf16>, vector<32x128xbf16>, vector<2x128xf32> -> vector<2x128xf32>
    %c12 = arith.constant 12 : index
    %c0_43 = arith.constant 0 : index
    %113 = vector.load %arg8[%c12, %c0_43] : memref<16x128xf32, #tpu.memory_space<vmem>>, vector<2x128xf32>
    tpu.vector_store %arg8[%c12, %c0_43], %112 {strides = array<i32>} : memref<16x128xf32, #tpu.memory_space<vmem>>, vector<2x128xf32>,
    %114 = vector.extract_strided_slice %8 {offsets = [4, 0], sizes = [2, 128], strides = [1, 1]} : vector<16x128xf32> to vector<2x128xf32>
    %115 = arith.truncf %88 : vector<2x32xf32> to vector<2x32xbf16>
    %cst_44 = arith.constant dense<0.000000e+00> : vector<2x128xf32>
    %116 = tpu.matmul %115, %17, %cst_44 {dimension_numbers = #tpu.dot_dimension_numbers<[1], [0], [0], [1], [0, 0, 1, 1], [], []>} : vector<2x32xbf16>, vector<32x128xbf16>, vector<2x128xf32> -> vector<2x128xf32>
    %117 = arith.addf %114, %116 : vector<2x128xf32>
    %118 = arith.negf %117 : vector<2x128xf32>
    %119 = math.exp %118 : vector<2x128xf32>
    %cst_45 = arith.constant 1.000000e+00 : f32
    %120 = vector.broadcast %cst_45 : f32 to vector<2x128xf32>
    %121 = arith.addf %120, %119 : vector<2x128xf32>
    %122 = arith.divf %120, %121 : vector<2x128xf32>
    %123 = vector.extract_strided_slice %117 {offsets = [0, 64], sizes = [2, 32], strides = [1, 1]} : vector<2x128xf32> to vector<2x32xf32>
    %124 = math.tanh %123 : vector<2x32xf32>
    %125 = vector.extract_strided_slice %122 {offsets = [0, 0], sizes = [2, 32], strides = [1, 1]} : vector<2x128xf32> to vector<2x32xf32>
    %126 = vector.extract_strided_slice %122 {offsets = [0, 32], sizes = [2, 32], strides = [1, 1]} : vector<2x128xf32> to vector<2x32xf32>
    %127 = vector.extract_strided_slice %122 {offsets = [0, 96], sizes = [2, 32], strides = [1, 1]} : vector<2x128xf32> to vector<2x32xf32>
    %128 = arith.mulf %126, %86 : vector<2x32xf32>
    %129 = arith.mulf %125, %124 : vector<2x32xf32>
    %130 = arith.addf %128, %129 : vector<2x32xf32>
    %131 = math.tanh %130 : vector<2x32xf32>
    %132 = arith.mulf %127, %131 : vector<2x32xf32>
    %133 = vector.extract_strided_slice %15 {offsets = [10, 0], sizes = [2, 128], strides = [1, 1]} : vector<16x128xf32> to vector<2x128xf32>
    %134 = arith.truncf %107 : vector<2x32xf32> to vector<2x32xbf16>
    %cst_46 = arith.constant dense<0.000000e+00> : vector<2x128xf32>
    %135 = tpu.matmul %134, %19, %cst_46 {dimension_numbers = #tpu.dot_dimension_numbers<[1], [0], [0], [1], [0, 0, 1, 1], [], []>} : vector<2x32xbf16>, vector<32x128xbf16>, vector<2x128xf32> -> vector<2x128xf32>
    %136 = arith.addf %133, %135 : vector<2x128xf32>
    %137 = arith.negf %136 : vector<2x128xf32>
    %138 = math.exp %137 : vector<2x128xf32>
    %cst_47 = arith.constant 1.000000e+00 : f32
    %139 = vector.broadcast %cst_47 : f32 to vector<2x128xf32>
    %140 = arith.addf %139, %138 : vector<2x128xf32>
    %141 = arith.divf %139, %140 : vector<2x128xf32>
    %142 = vector.extract_strided_slice %136 {offsets = [0, 64], sizes = [2, 32], strides = [1, 1]} : vector<2x128xf32> to vector<2x32xf32>
    %143 = math.tanh %142 : vector<2x32xf32>
    %144 = vector.extract_strided_slice %141 {offsets = [0, 0], sizes = [2, 32], strides = [1, 1]} : vector<2x128xf32> to vector<2x32xf32>
    %145 = vector.extract_strided_slice %141 {offsets = [0, 32], sizes = [2, 32], strides = [1, 1]} : vector<2x128xf32> to vector<2x32xf32>
    %146 = vector.extract_strided_slice %141 {offsets = [0, 96], sizes = [2, 32], strides = [1, 1]} : vector<2x128xf32> to vector<2x32xf32>
    %147 = arith.mulf %145, %105 : vector<2x32xf32>
    %148 = arith.mulf %144, %143 : vector<2x32xf32>
    %149 = arith.addf %147, %148 : vector<2x32xf32>
    %150 = math.tanh %149 : vector<2x32xf32>
    %151 = arith.mulf %146, %150 : vector<2x32xf32>
    %152 = arith.truncf %132 : vector<2x32xf32> to vector<2x32xbf16>
    %cst_48 = arith.constant dense<0.000000e+00> : vector<2x128xf32>
    %153 = tpu.matmul %152, %20, %cst_48 {dimension_numbers = #tpu.dot_dimension_numbers<[1], [0], [0], [1], [0, 0, 1, 1], [], []>} : vector<2x32xbf16>, vector<32x128xbf16>, vector<2x128xf32> -> vector<2x128xf32>
    %c4 = arith.constant 4 : index
    %c0_49 = arith.constant 0 : index
    %154 = vector.load %arg7[%c4, %c0_49] : memref<16x128xf32, #tpu.memory_space<vmem>>, vector<2x128xf32>
    tpu.vector_store %arg7[%c4, %c0_49], %153 {strides = array<i32>} : memref<16x128xf32, #tpu.memory_space<vmem>>, vector<2x128xf32>,
    %155 = arith.truncf %151 : vector<2x32xf32> to vector<2x32xbf16>
    %cst_50 = arith.constant dense<0.000000e+00> : vector<2x128xf32>
    %156 = tpu.matmul %155, %21, %cst_50 {dimension_numbers = #tpu.dot_dimension_numbers<[1], [0], [0], [1], [0, 0, 1, 1], [], []>} : vector<2x32xbf16>, vector<32x128xbf16>, vector<2x128xf32> -> vector<2x128xf32>
    %c10 = arith.constant 10 : index
    %c0_51 = arith.constant 0 : index
    %157 = vector.load %arg8[%c10, %c0_51] : memref<16x128xf32, #tpu.memory_space<vmem>>, vector<2x128xf32>
    tpu.vector_store %arg8[%c10, %c0_51], %156 {strides = array<i32>} : memref<16x128xf32, #tpu.memory_space<vmem>>, vector<2x128xf32>,
    %158 = vector.extract_strided_slice %8 {offsets = [6, 0], sizes = [2, 128], strides = [1, 1]} : vector<16x128xf32> to vector<2x128xf32>
    %159 = arith.truncf %132 : vector<2x32xf32> to vector<2x32xbf16>
    %cst_52 = arith.constant dense<0.000000e+00> : vector<2x128xf32>
    %160 = tpu.matmul %159, %17, %cst_52 {dimension_numbers = #tpu.dot_dimension_numbers<[1], [0], [0], [1], [0, 0, 1, 1], [], []>} : vector<2x32xbf16>, vector<32x128xbf16>, vector<2x128xf32> -> vector<2x128xf32>
    %161 = arith.addf %158, %160 : vector<2x128xf32>
    %162 = arith.negf %161 : vector<2x128xf32>
    %163 = math.exp %162 : vector<2x128xf32>
    %cst_53 = arith.constant 1.000000e+00 : f32
    %164 = vector.broadcast %cst_53 : f32 to vector<2x128xf32>
    %165 = arith.addf %164, %163 : vector<2x128xf32>
    %166 = arith.divf %164, %165 : vector<2x128xf32>
    %167 = vector.extract_strided_slice %161 {offsets = [0, 64], sizes = [2, 32], strides = [1, 1]} : vector<2x128xf32> to vector<2x32xf32>
    %168 = math.tanh %167 : vector<2x32xf32>
    %169 = vector.extract_strided_slice %166 {offsets = [0, 0], sizes = [2, 32], strides = [1, 1]} : vector<2x128xf32> to vector<2x32xf32>
    %170 = vector.extract_strided_slice %166 {offsets = [0, 32], sizes = [2, 32], strides = [1, 1]} : vector<2x128xf32> to vector<2x32xf32>
    %171 = vector.extract_strided_slice %166 {offsets = [0, 96], sizes = [2, 32], strides = [1, 1]} : vector<2x128xf32> to vector<2x32xf32>
    %172 = arith.mulf %170, %130 : vector<2x32xf32>
    %173 = arith.mulf %169, %168 : vector<2x32xf32>
    %174 = arith.addf %172, %173 : vector<2x32xf32>
    %175 = math.tanh %174 : vector<2x32xf32>
    %176 = arith.mulf %171, %175 : vector<2x32xf32>
    %177 = vector.extract_strided_slice %15 {offsets = [8, 0], sizes = [2, 128], strides = [1, 1]} : vector<16x128xf32> to vector<2x128xf32>
    %178 = arith.truncf %151 : vector<2x32xf32> to vector<2x32xbf16>
    %cst_54 = arith.constant dense<0.000000e+00> : vector<2x128xf32>
    %179 = tpu.matmul %178, %19, %cst_54 {dimension_numbers = #tpu.dot_dimension_numbers<[1], [0], [0], [1], [0, 0, 1, 1], [], []>} : vector<2x32xbf16>, vector<32x128xbf16>, vector<2x128xf32> -> vector<2x128xf32>
    %180 = arith.addf %177, %179 : vector<2x128xf32>
    %181 = arith.negf %180 : vector<2x128xf32>
    %182 = math.exp %181 : vector<2x128xf32>
    %cst_55 = arith.constant 1.000000e+00 : f32
    %183 = vector.broadcast %cst_55 : f32 to vector<2x128xf32>
    %184 = arith.addf %183, %182 : vector<2x128xf32>
    %185 = arith.divf %183, %184 : vector<2x128xf32>
    %186 = vector.extract_strided_slice %180 {offsets = [0, 64], sizes = [2, 32], strides = [1, 1]} : vector<2x128xf32> to vector<2x32xf32>
    %187 = math.tanh %186 : vector<2x32xf32>
    %188 = vector.extract_strided_slice %185 {offsets = [0, 0], sizes = [2, 32], strides = [1, 1]} : vector<2x128xf32> to vector<2x32xf32>
    %189 = vector.extract_strided_slice %185 {offsets = [0, 32], sizes = [2, 32], strides = [1, 1]} : vector<2x128xf32> to vector<2x32xf32>
    %190 = vector.extract_strided_slice %185 {offsets = [0, 96], sizes = [2, 32], strides = [1, 1]} : vector<2x128xf32> to vector<2x32xf32>
    %191 = arith.mulf %189, %149 : vector<2x32xf32>
    %192 = arith.mulf %188, %187 : vector<2x32xf32>
    %193 = arith.addf %191, %192 : vector<2x32xf32>
    %194 = math.tanh %193 : vector<2x32xf32>
    %195 = arith.mulf %190, %194 : vector<2x32xf32>
    %196 = arith.truncf %176 : vector<2x32xf32> to vector<2x32xbf16>
    %cst_56 = arith.constant dense<0.000000e+00> : vector<2x128xf32>
    %197 = tpu.matmul %196, %20, %cst_56 {dimension_numbers = #tpu.dot_dimension_numbers<[1], [0], [0], [1], [0, 0, 1, 1], [], []>} : vector<2x32xbf16>, vector<32x128xbf16>, vector<2x128xf32> -> vector<2x128xf32>
    %c6 = arith.constant 6 : index
    %c0_57 = arith.constant 0 : index
    %198 = vector.load %arg7[%c6, %c0_57] : memref<16x128xf32, #tpu.memory_space<vmem>>, vector<2x128xf32>
    tpu.vector_store %arg7[%c6, %c0_57], %197 {strides = array<i32>} : memref<16x128xf32, #tpu.memory_space<vmem>>, vector<2x128xf32>,
    %199 = arith.truncf %195 : vector<2x32xf32> to vector<2x32xbf16>
    %cst_58 = arith.constant dense<0.000000e+00> : vector<2x128xf32>
    %200 = tpu.matmul %199, %21, %cst_58 {dimension_numbers = #tpu.dot_dimension_numbers<[1], [0], [0], [1], [0, 0, 1, 1], [], []>} : vector<2x32xbf16>, vector<32x128xbf16>, vector<2x128xf32> -> vector<2x128xf32>
    %c8 = arith.constant 8 : index
    %c0_59 = arith.constant 0 : index
    %201 = vector.load %arg8[%c8, %c0_59] : memref<16x128xf32, #tpu.memory_space<vmem>>, vector<2x128xf32>
    tpu.vector_store %arg8[%c8, %c0_59], %200 {strides = array<i32>} : memref<16x128xf32, #tpu.memory_space<vmem>>, vector<2x128xf32>,
    %202 = vector.extract_strided_slice %8 {offsets = [8, 0], sizes = [2, 128], strides = [1, 1]} : vector<16x128xf32> to vector<2x128xf32>
    %203 = arith.truncf %176 : vector<2x32xf32> to vector<2x32xbf16>
    %cst_60 = arith.constant dense<0.000000e+00> : vector<2x128xf32>
    %204 = tpu.matmul %203, %17, %cst_60 {dimension_numbers = #tpu.dot_dimension_numbers<[1], [0], [0], [1], [0, 0, 1, 1], [], []>} : vector<2x32xbf16>, vector<32x128xbf16>, vector<2x128xf32> -> vector<2x128xf32>
    %205 = arith.addf %202, %204 : vector<2x128xf32>
    %206 = arith.negf %205 : vector<2x128xf32>
    %207 = math.exp %206 : vector<2x128xf32>
    %cst_61 = arith.constant 1.000000e+00 : f32
    %208 = vector.broadcast %cst_61 : f32 to vector<2x128xf32>
    %209 = arith.addf %208, %207 : vector<2x128xf32>
    %210 = arith.divf %208, %209 : vector<2x128xf32>
    %211 = vector.extract_strided_slice %205 {offsets = [0, 64], sizes = [2, 32], strides = [1, 1]} : vector<2x128xf32> to vector<2x32xf32>
    %212 = math.tanh %211 : vector<2x32xf32>
    %213 = vector.extract_strided_slice %210 {offsets = [0, 0], sizes = [2, 32], strides = [1, 1]} : vector<2x128xf32> to vector<2x32xf32>
    %214 = vector.extract_strided_slice %210 {offsets = [0, 32], sizes = [2, 32], strides = [1, 1]} : vector<2x128xf32> to vector<2x32xf32>
    %215 = vector.extract_strided_slice %210 {offsets = [0, 96], sizes = [2, 32], strides = [1, 1]} : vector<2x128xf32> to vector<2x32xf32>
    %216 = arith.mulf %214, %174 : vector<2x32xf32>
    %217 = arith.mulf %213, %212 : vector<2x32xf32>
    %218 = arith.addf %216, %217 : vector<2x32xf32>
    %219 = math.tanh %218 : vector<2x32xf32>
    %220 = arith.mulf %215, %219 : vector<2x32xf32>
    %221 = vector.extract_strided_slice %15 {offsets = [6, 0], sizes = [2, 128], strides = [1, 1]} : vector<16x128xf32> to vector<2x128xf32>
    %222 = arith.truncf %195 : vector<2x32xf32> to vector<2x32xbf16>
    %cst_62 = arith.constant dense<0.000000e+00> : vector<2x128xf32>
    %223 = tpu.matmul %222, %19, %cst_62 {dimension_numbers = #tpu.dot_dimension_numbers<[1], [0], [0], [1], [0, 0, 1, 1], [], []>} : vector<2x32xbf16>, vector<32x128xbf16>, vector<2x128xf32> -> vector<2x128xf32>
    %224 = arith.addf %221, %223 : vector<2x128xf32>
    %225 = arith.negf %224 : vector<2x128xf32>
    %226 = math.exp %225 : vector<2x128xf32>
    %cst_63 = arith.constant 1.000000e+00 : f32
    %227 = vector.broadcast %cst_63 : f32 to vector<2x128xf32>
    %228 = arith.addf %227, %226 : vector<2x128xf32>
    %229 = arith.divf %227, %228 : vector<2x128xf32>
    %230 = vector.extract_strided_slice %224 {offsets = [0, 64], sizes = [2, 32], strides = [1, 1]} : vector<2x128xf32> to vector<2x32xf32>
    %231 = math.tanh %230 : vector<2x32xf32>
    %232 = vector.extract_strided_slice %229 {offsets = [0, 0], sizes = [2, 32], strides = [1, 1]} : vector<2x128xf32> to vector<2x32xf32>
    %233 = vector.extract_strided_slice %229 {offsets = [0, 32], sizes = [2, 32], strides = [1, 1]} : vector<2x128xf32> to vector<2x32xf32>
    %234 = vector.extract_strided_slice %229 {offsets = [0, 96], sizes = [2, 32], strides = [1, 1]} : vector<2x128xf32> to vector<2x32xf32>
    %235 = arith.mulf %233, %193 : vector<2x32xf32>
    %236 = arith.mulf %232, %231 : vector<2x32xf32>
    %237 = arith.addf %235, %236 : vector<2x32xf32>
    %238 = math.tanh %237 : vector<2x32xf32>
    %239 = arith.mulf %234, %238 : vector<2x32xf32>
    %240 = arith.truncf %220 : vector<2x32xf32> to vector<2x32xbf16>
    %cst_64 = arith.constant dense<0.000000e+00> : vector<2x128xf32>
    %241 = tpu.matmul %240, %20, %cst_64 {dimension_numbers = #tpu.dot_dimension_numbers<[1], [0], [0], [1], [0, 0, 1, 1], [], []>} : vector<2x32xbf16>, vector<32x128xbf16>, vector<2x128xf32> -> vector<2x128xf32>
    %c8_65 = arith.constant 8 : index
    %c0_66 = arith.constant 0 : index
    %242 = vector.load %arg7[%c8_65, %c0_66] : memref<16x128xf32, #tpu.memory_space<vmem>>, vector<2x128xf32>
    tpu.vector_store %arg7[%c8_65, %c0_66], %241 {strides = array<i32>} : memref<16x128xf32, #tpu.memory_space<vmem>>, vector<2x128xf32>,
    %243 = arith.truncf %239 : vector<2x32xf32> to vector<2x32xbf16>
    %cst_67 = arith.constant dense<0.000000e+00> : vector<2x128xf32>
    %244 = tpu.matmul %243, %21, %cst_67 {dimension_numbers = #tpu.dot_dimension_numbers<[1], [0], [0], [1], [0, 0, 1, 1], [], []>} : vector<2x32xbf16>, vector<32x128xbf16>, vector<2x128xf32> -> vector<2x128xf32>
    %c6_68 = arith.constant 6 : index
    %c0_69 = arith.constant 0 : index
    %245 = vector.load %arg8[%c6_68, %c0_69] : memref<16x128xf32, #tpu.memory_space<vmem>>, vector<2x128xf32>
    tpu.vector_store %arg8[%c6_68, %c0_69], %244 {strides = array<i32>} : memref<16x128xf32, #tpu.memory_space<vmem>>, vector<2x128xf32>,
    %246 = vector.extract_strided_slice %8 {offsets = [10, 0], sizes = [2, 128], strides = [1, 1]} : vector<16x128xf32> to vector<2x128xf32>
    %247 = arith.truncf %220 : vector<2x32xf32> to vector<2x32xbf16>
    %cst_70 = arith.constant dense<0.000000e+00> : vector<2x128xf32>
    %248 = tpu.matmul %247, %17, %cst_70 {dimension_numbers = #tpu.dot_dimension_numbers<[1], [0], [0], [1], [0, 0, 1, 1], [], []>} : vector<2x32xbf16>, vector<32x128xbf16>, vector<2x128xf32> -> vector<2x128xf32>
    %249 = arith.addf %246, %248 : vector<2x128xf32>
    %250 = arith.negf %249 : vector<2x128xf32>
    %251 = math.exp %250 : vector<2x128xf32>
    %cst_71 = arith.constant 1.000000e+00 : f32
    %252 = vector.broadcast %cst_71 : f32 to vector<2x128xf32>
    %253 = arith.addf %252, %251 : vector<2x128xf32>
    %254 = arith.divf %252, %253 : vector<2x128xf32>
    %255 = vector.extract_strided_slice %249 {offsets = [0, 64], sizes = [2, 32], strides = [1, 1]} : vector<2x128xf32> to vector<2x32xf32>
    %256 = math.tanh %255 : vector<2x32xf32>
    %257 = vector.extract_strided_slice %254 {offsets = [0, 0], sizes = [2, 32], strides = [1, 1]} : vector<2x128xf32> to vector<2x32xf32>
    %258 = vector.extract_strided_slice %254 {offsets = [0, 32], sizes = [2, 32], strides = [1, 1]} : vector<2x128xf32> to vector<2x32xf32>
    %259 = vector.extract_strided_slice %254 {offsets = [0, 96], sizes = [2, 32], strides = [1, 1]} : vector<2x128xf32> to vector<2x32xf32>
    %260 = arith.mulf %258, %218 : vector<2x32xf32>
    %261 = arith.mulf %257, %256 : vector<2x32xf32>
    %262 = arith.addf %260, %261 : vector<2x32xf32>
    %263 = math.tanh %262 : vector<2x32xf32>
    %264 = arith.mulf %259, %263 : vector<2x32xf32>
    %265 = vector.extract_strided_slice %15 {offsets = [4, 0], sizes = [2, 128], strides = [1, 1]} : vector<16x128xf32> to vector<2x128xf32>
    %266 = arith.truncf %239 : vector<2x32xf32> to vector<2x32xbf16>
    %cst_72 = arith.constant dense<0.000000e+00> : vector<2x128xf32>
    %267 = tpu.matmul %266, %19, %cst_72 {dimension_numbers = #tpu.dot_dimension_numbers<[1], [0], [0], [1], [0, 0, 1, 1], [], []>} : vector<2x32xbf16>, vector<32x128xbf16>, vector<2x128xf32> -> vector<2x128xf32>
    %268 = arith.addf %265, %267 : vector<2x128xf32>
    %269 = arith.negf %268 : vector<2x128xf32>
    %270 = math.exp %269 : vector<2x128xf32>
    %cst_73 = arith.constant 1.000000e+00 : f32
    %271 = vector.broadcast %cst_73 : f32 to vector<2x128xf32>
    %272 = arith.addf %271, %270 : vector<2x128xf32>
    %273 = arith.divf %271, %272 : vector<2x128xf32>
    %274 = vector.extract_strided_slice %268 {offsets = [0, 64], sizes = [2, 32], strides = [1, 1]} : vector<2x128xf32> to vector<2x32xf32>
    %275 = math.tanh %274 : vector<2x32xf32>
    %276 = vector.extract_strided_slice %273 {offsets = [0, 0], sizes = [2, 32], strides = [1, 1]} : vector<2x128xf32> to vector<2x32xf32>
    %277 = vector.extract_strided_slice %273 {offsets = [0, 32], sizes = [2, 32], strides = [1, 1]} : vector<2x128xf32> to vector<2x32xf32>
    %278 = vector.extract_strided_slice %273 {offsets = [0, 96], sizes = [2, 32], strides = [1, 1]} : vector<2x128xf32> to vector<2x32xf32>
    %279 = arith.mulf %277, %237 : vector<2x32xf32>
    %280 = arith.mulf %276, %275 : vector<2x32xf32>
    %281 = arith.addf %279, %280 : vector<2x32xf32>
    %282 = math.tanh %281 : vector<2x32xf32>
    %283 = arith.mulf %278, %282 : vector<2x32xf32>
    %284 = arith.truncf %264 : vector<2x32xf32> to vector<2x32xbf16>
    %cst_74 = arith.constant dense<0.000000e+00> : vector<2x128xf32>
    %285 = tpu.matmul %284, %20, %cst_74 {dimension_numbers = #tpu.dot_dimension_numbers<[1], [0], [0], [1], [0, 0, 1, 1], [], []>} : vector<2x32xbf16>, vector<32x128xbf16>, vector<2x128xf32> -> vector<2x128xf32>
    %c10_75 = arith.constant 10 : index
    %c0_76 = arith.constant 0 : index
    %286 = vector.load %arg7[%c10_75, %c0_76] : memref<16x128xf32, #tpu.memory_space<vmem>>, vector<2x128xf32>
    tpu.vector_store %arg7[%c10_75, %c0_76], %285 {strides = array<i32>} : memref<16x128xf32, #tpu.memory_space<vmem>>, vector<2x128xf32>,
    %287 = arith.truncf %283 : vector<2x32xf32> to vector<2x32xbf16>
    %cst_77 = arith.constant dense<0.000000e+00> : vector<2x128xf32>
    %288 = tpu.matmul %287, %21, %cst_77 {dimension_numbers = #tpu.dot_dimension_numbers<[1], [0], [0], [1], [0, 0, 1, 1], [], []>} : vector<2x32xbf16>, vector<32x128xbf16>, vector<2x128xf32> -> vector<2x128xf32>
    %c4_78 = arith.constant 4 : index
    %c0_79 = arith.constant 0 : index
    %289 = vector.load %arg8[%c4_78, %c0_79] : memref<16x128xf32, #tpu.memory_space<vmem>>, vector<2x128xf32>
    tpu.vector_store %arg8[%c4_78, %c0_79], %288 {strides = array<i32>} : memref<16x128xf32, #tpu.memory_space<vmem>>, vector<2x128xf32>,
    %290 = vector.extract_strided_slice %8 {offsets = [12, 0], sizes = [2, 128], strides = [1, 1]} : vector<16x128xf32> to vector<2x128xf32>
    %291 = arith.truncf %264 : vector<2x32xf32> to vector<2x32xbf16>
    %cst_80 = arith.constant dense<0.000000e+00> : vector<2x128xf32>
    %292 = tpu.matmul %291, %17, %cst_80 {dimension_numbers = #tpu.dot_dimension_numbers<[1], [0], [0], [1], [0, 0, 1, 1], [], []>} : vector<2x32xbf16>, vector<32x128xbf16>, vector<2x128xf32> -> vector<2x128xf32>
    %293 = arith.addf %290, %292 : vector<2x128xf32>
    %294 = arith.negf %293 : vector<2x128xf32>
    %295 = math.exp %294 : vector<2x128xf32>
    %cst_81 = arith.constant 1.000000e+00 : f32
    %296 = vector.broadcast %cst_81 : f32 to vector<2x128xf32>
    %297 = arith.addf %296, %295 : vector<2x128xf32>
    %298 = arith.divf %296, %297 : vector<2x128xf32>
    %299 = vector.extract_strided_slice %293 {offsets = [0, 64], sizes = [2, 32], strides = [1, 1]} : vector<2x128xf32> to vector<2x32xf32>
    %300 = math.tanh %299 : vector<2x32xf32>
    %301 = vector.extract_strided_slice %298 {offsets = [0, 0], sizes = [2, 32], strides = [1, 1]} : vector<2x128xf32> to vector<2x32xf32>
    %302 = vector.extract_strided_slice %298 {offsets = [0, 32], sizes = [2, 32], strides = [1, 1]} : vector<2x128xf32> to vector<2x32xf32>
    %303 = vector.extract_strided_slice %298 {offsets = [0, 96], sizes = [2, 32], strides = [1, 1]} : vector<2x128xf32> to vector<2x32xf32>
    %304 = arith.mulf %302, %262 : vector<2x32xf32>
    %305 = arith.mulf %301, %300 : vector<2x32xf32>
    %306 = arith.addf %304, %305 : vector<2x32xf32>
    %307 = math.tanh %306 : vector<2x32xf32>
    %308 = arith.mulf %303, %307 : vector<2x32xf32>
    %309 = vector.extract_strided_slice %15 {offsets = [2, 0], sizes = [2, 128], strides = [1, 1]} : vector<16x128xf32> to vector<2x128xf32>
    %310 = arith.truncf %283 : vector<2x32xf32> to vector<2x32xbf16>
    %cst_82 = arith.constant dense<0.000000e+00> : vector<2x128xf32>
    %311 = tpu.matmul %310, %19, %cst_82 {dimension_numbers = #tpu.dot_dimension_numbers<[1], [0], [0], [1], [0, 0, 1, 1], [], []>} : vector<2x32xbf16>, vector<32x128xbf16>, vector<2x128xf32> -> vector<2x128xf32>
    %312 = arith.addf %309, %311 : vector<2x128xf32>
    %313 = arith.negf %312 : vector<2x128xf32>
    %314 = math.exp %313 : vector<2x128xf32>
    %cst_83 = arith.constant 1.000000e+00 : f32
    %315 = vector.broadcast %cst_83 : f32 to vector<2x128xf32>
    %316 = arith.addf %315, %314 : vector<2x128xf32>
    %317 = arith.divf %315, %316 : vector<2x128xf32>
    %318 = vector.extract_strided_slice %312 {offsets = [0, 64], sizes = [2, 32], strides = [1, 1]} : vector<2x128xf32> to vector<2x32xf32>
    %319 = math.tanh %318 : vector<2x32xf32>
    %320 = vector.extract_strided_slice %317 {offsets = [0, 0], sizes = [2, 32], strides = [1, 1]} : vector<2x128xf32> to vector<2x32xf32>
    %321 = vector.extract_strided_slice %317 {offsets = [0, 32], sizes = [2, 32], strides = [1, 1]} : vector<2x128xf32> to vector<2x32xf32>
    %322 = vector.extract_strided_slice %317 {offsets = [0, 96], sizes = [2, 32], strides = [1, 1]} : vector<2x128xf32> to vector<2x32xf32>
    %323 = arith.mulf %321, %281 : vector<2x32xf32>
    %324 = arith.mulf %320, %319 : vector<2x32xf32>
    %325 = arith.addf %323, %324 : vector<2x32xf32>
    %326 = math.tanh %325 : vector<2x32xf32>
    %327 = arith.mulf %322, %326 : vector<2x32xf32>
    %328 = arith.truncf %308 : vector<2x32xf32> to vector<2x32xbf16>
    %cst_84 = arith.constant dense<0.000000e+00> : vector<2x128xf32>
    %329 = tpu.matmul %328, %20, %cst_84 {dimension_numbers = #tpu.dot_dimension_numbers<[1], [0], [0], [1], [0, 0, 1, 1], [], []>} : vector<2x32xbf16>, vector<32x128xbf16>, vector<2x128xf32> -> vector<2x128xf32>
    %c12_85 = arith.constant 12 : index
    %c0_86 = arith.constant 0 : index
    %330 = vector.load %arg7[%c12_85, %c0_86] : memref<16x128xf32, #tpu.memory_space<vmem>>, vector<2x128xf32>
    tpu.vector_store %arg7[%c12_85, %c0_86], %329 {strides = array<i32>} : memref<16x128xf32, #tpu.memory_space<vmem>>, vector<2x128xf32>,
    %331 = arith.truncf %327 : vector<2x32xf32> to vector<2x32xbf16>
    %cst_87 = arith.constant dense<0.000000e+00> : vector<2x128xf32>
    %332 = tpu.matmul %331, %21, %cst_87 {dimension_numbers = #tpu.dot_dimension_numbers<[1], [0], [0], [1], [0, 0, 1, 1], [], []>} : vector<2x32xbf16>, vector<32x128xbf16>, vector<2x128xf32> -> vector<2x128xf32>
    %c2_88 = arith.constant 2 : index
    %c0_89 = arith.constant 0 : index
    %333 = vector.load %arg8[%c2_88, %c0_89] : memref<16x128xf32, #tpu.memory_space<vmem>>, vector<2x128xf32>
    tpu.vector_store %arg8[%c2_88, %c0_89], %332 {strides = array<i32>} : memref<16x128xf32, #tpu.memory_space<vmem>>, vector<2x128xf32>,
    %334 = vector.extract_strided_slice %8 {offsets = [14, 0], sizes = [2, 128], strides = [1, 1]} : vector<16x128xf32> to vector<2x128xf32>
    %335 = arith.truncf %308 : vector<2x32xf32> to vector<2x32xbf16>
    %cst_90 = arith.constant dense<0.000000e+00> : vector<2x128xf32>
    %336 = tpu.matmul %335, %17, %cst_90 {dimension_numbers = #tpu.dot_dimension_numbers<[1], [0], [0], [1], [0, 0, 1, 1], [], []>} : vector<2x32xbf16>, vector<32x128xbf16>, vector<2x128xf32> -> vector<2x128xf32>
    %337 = arith.addf %334, %336 : vector<2x128xf32>
    %338 = arith.negf %337 : vector<2x128xf32>
    %339 = math.exp %338 : vector<2x128xf32>
    %cst_91 = arith.constant 1.000000e+00 : f32
    %340 = vector.broadcast %cst_91 : f32 to vector<2x128xf32>
    %341 = arith.addf %340, %339 : vector<2x128xf32>
    %342 = arith.divf %340, %341 : vector<2x128xf32>
    %343 = vector.extract_strided_slice %337 {offsets = [0, 64], sizes = [2, 32], strides = [1, 1]} : vector<2x128xf32> to vector<2x32xf32>
    %344 = math.tanh %343 : vector<2x32xf32>
    %345 = vector.extract_strided_slice %342 {offsets = [0, 0], sizes = [2, 32], strides = [1, 1]} : vector<2x128xf32> to vector<2x32xf32>
    %346 = vector.extract_strided_slice %342 {offsets = [0, 32], sizes = [2, 32], strides = [1, 1]} : vector<2x128xf32> to vector<2x32xf32>
    %347 = vector.extract_strided_slice %342 {offsets = [0, 96], sizes = [2, 32], strides = [1, 1]} : vector<2x128xf32> to vector<2x32xf32>
    %348 = arith.mulf %346, %306 : vector<2x32xf32>
    %349 = arith.mulf %345, %344 : vector<2x32xf32>
    %350 = arith.addf %348, %349 : vector<2x32xf32>
    %351 = math.tanh %350 : vector<2x32xf32>
    %352 = arith.mulf %347, %351 : vector<2x32xf32>
    %353 = vector.extract_strided_slice %15 {offsets = [0, 0], sizes = [2, 128], strides = [1, 1]} : vector<16x128xf32> to vector<2x128xf32>
    %354 = arith.truncf %327 : vector<2x32xf32> to vector<2x32xbf16>
    %cst_92 = arith.constant dense<0.000000e+00> : vector<2x128xf32>
    %355 = tpu.matmul %354, %19, %cst_92 {dimension_numbers = #tpu.dot_dimension_numbers<[1], [0], [0], [1], [0, 0, 1, 1], [], []>} : vector<2x32xbf16>, vector<32x128xbf16>, vector<2x128xf32> -> vector<2x128xf32>
    %356 = arith.addf %353, %355 : vector<2x128xf32>
    %357 = arith.negf %356 : vector<2x128xf32>
    %358 = math.exp %357 : vector<2x128xf32>
    %cst_93 = arith.constant 1.000000e+00 : f32
    %359 = vector.broadcast %cst_93 : f32 to vector<2x128xf32>
    %360 = arith.addf %359, %358 : vector<2x128xf32>
    %361 = arith.divf %359, %360 : vector<2x128xf32>
    %362 = vector.extract_strided_slice %356 {offsets = [0, 64], sizes = [2, 32], strides = [1, 1]} : vector<2x128xf32> to vector<2x32xf32>
    %363 = math.tanh %362 : vector<2x32xf32>
    %364 = vector.extract_strided_slice %361 {offsets = [0, 0], sizes = [2, 32], strides = [1, 1]} : vector<2x128xf32> to vector<2x32xf32>
    %365 = vector.extract_strided_slice %361 {offsets = [0, 32], sizes = [2, 32], strides = [1, 1]} : vector<2x128xf32> to vector<2x32xf32>
    %366 = vector.extract_strided_slice %361 {offsets = [0, 96], sizes = [2, 32], strides = [1, 1]} : vector<2x128xf32> to vector<2x32xf32>
    %367 = arith.mulf %365, %325 : vector<2x32xf32>
    %368 = arith.mulf %364, %363 : vector<2x32xf32>
    %369 = arith.addf %367, %368 : vector<2x32xf32>
    %370 = math.tanh %369 : vector<2x32xf32>
    %371 = arith.mulf %366, %370 : vector<2x32xf32>
    %372 = arith.truncf %352 : vector<2x32xf32> to vector<2x32xbf16>
    %cst_94 = arith.constant dense<0.000000e+00> : vector<2x128xf32>
    %373 = tpu.matmul %372, %20, %cst_94 {dimension_numbers = #tpu.dot_dimension_numbers<[1], [0], [0], [1], [0, 0, 1, 1], [], []>} : vector<2x32xbf16>, vector<32x128xbf16>, vector<2x128xf32> -> vector<2x128xf32>
    %c14_95 = arith.constant 14 : index
    %c0_96 = arith.constant 0 : index
    %374 = vector.load %arg7[%c14_95, %c0_96] : memref<16x128xf32, #tpu.memory_space<vmem>>, vector<2x128xf32>
    tpu.vector_store %arg7[%c14_95, %c0_96], %373 {strides = array<i32>} : memref<16x128xf32, #tpu.memory_space<vmem>>, vector<2x128xf32>,
    %375 = arith.truncf %371 : vector<2x32xf32> to vector<2x32xbf16>
    %cst_97 = arith.constant dense<0.000000e+00> : vector<2x128xf32>
    %376 = tpu.matmul %375, %21, %cst_97 {dimension_numbers = #tpu.dot_dimension_numbers<[1], [0], [0], [1], [0, 0, 1, 1], [], []>} : vector<2x32xbf16>, vector<32x128xbf16>, vector<2x128xf32> -> vector<2x128xf32>
    %c0_98 = arith.constant 0 : index
    %c0_99 = arith.constant 0 : index
    %377 = vector.load %arg8[%c0_98, %c0_99] : memref<16x128xf32, #tpu.memory_space<vmem>>, vector<2x128xf32>
    tpu.vector_store %arg8[%c0_98, %c0_99], %376 {strides = array<i32>} : memref<16x128xf32, #tpu.memory_space<vmem>>, vector<2x128xf32>,
    %c0_100 = arith.constant 0 : index
    %c0_101 = arith.constant 0 : index
    %378 = vector.load %arg7[%c0_100, %c0_101] : memref<16x128xf32, #tpu.memory_space<vmem>>, vector<16x128xf32>
    %c0_102 = arith.constant 0 : index
    %c0_103 = arith.constant 0 : index
    %379 = vector.load %arg8[%c0_102, %c0_103] : memref<16x128xf32, #tpu.memory_space<vmem>>, vector<16x128xf32>
    %380 = arith.addf %378, %379 : vector<16x128xf32>
    %c0_104 = arith.constant 0 : index
    %c0_105 = arith.constant 0 : index
    %381 = vector.load %arg6[%c0_104, %c0_105] : memref<1x128xf32, #tpu.memory_space<vmem>>, vector<1x128xf32>
    %382 = vector.broadcast %381 : vector<1x128xf32> to vector<16x128xf32>
    %383 = arith.addf %380, %382 : vector<16x128xf32>
    %c0_106 = arith.constant 0 : index
    %c0_107 = arith.constant 0 : index
    %384 = vector.load %arg7[%c0_106, %c0_107] : memref<16x128xf32, #tpu.memory_space<vmem>>, vector<16x128xf32>
    tpu.vector_store %arg7[%c0_106, %c0_107], %383 {strides = array<i32>} : memref<16x128xf32, #tpu.memory_space<vmem>>, vector<16x128xf32>,
    return
  }
}

</mosaic_0001>

<bundles_post_ra>
// kernel: bert_ner_forward.2
= control target key start
LH: loop header
LB: loop body
LE: loop exit
PB: predicated region body
PF: predicated region fallthrough
CT: control target
= control target key end

     0   :  { %s2953_s21 = smov 0   ;;  %s2955_s22 = smov 0   ;;  %s3383_s0 = inlined_call_operand.vmem [shape: f32[2,8,64], index: 0, kind: input, shape index: {}]   ;;  %s3384_s1 = inlined_call_operand.vmem [shape: f32[2,1,8], index: 1, kind: input, shape index: {}]   ;;  %s3385_s2 = inlined_call_operand.vmem [shape: f32[1,64], index: 2, kind: input, shape index: {}]   ;;  %s3386_s3 = inlined_call_operand.vmem [shape: f32[1,64], index: 3, kind: input, shape index: {}]   ;;  %s3387_s4 = inlined_call_operand.vmem [shape: bf16[2,64,192], index: 4, kind: input, shape index: {}]   ;;  %s3388_s5 = inlined_call_operand.vmem [shape: f32[2,1,192], index: 5, kind: input, shape index: {}]   ;;  %s3389_s6 = inlined_call_operand.vmem [shape: bf16[2,64,64], index: 6, kind: input, shape index: {}]   ;;  %s3390_s7 = inlined_call_operand.vmem [shape: f32[2,1,64], index: 7, kind: input, shape index: {}]   ;;  %s3391_s8 = inlined_call_operand.vmem [shape: f32[2,1,64], index: 8, kind: input, shape index: {}]   ;;  %s3392_s9 = inlined_call_operand.vmem [shape: f32[2,1,64], index: 9, kind: input, shape index: {}]   ;;  %s3393_s10 = inlined_call_operand.vmem [shape: bf16[2,64,128], index: 10, kind: input, shape index: {}]   ;;  %s3394_s11 = inlined_call_operand.vmem [shape: f32[2,1,128], index: 11, kind: input, shape index: {}]   ;;  %s3395_s12 = inlined_call_operand.vmem [shape: bf16[2,128,64], index: 12, kind: input, shape index: {}]   ;;  %s3396_s13 = inlined_call_operand.vmem [shape: f32[2,1,64], index: 13, kind: input, shape index: {}]   ;;  %s3397_s14 = inlined_call_operand.vmem [shape: f32[2,1,64], index: 14, kind: input, shape index: {}]   ;;  %s3398_s15 = inlined_call_operand.vmem [shape: f32[2,1,64], index: 15, kind: input, shape index: {}]   ;;  %s3399_s16 = inlined_call_operand.vmem [shape: f32[2,8,64], index: 16, kind: output, shape index: {}]  }
   0x1   :  { %3407 = sst [smem:[#allocation11_spill]] %s3383_s0  ;;  %s2957_s23 = smov 0  }
   0x2   :  { %3408 = sst [smem:[#allocation12_spill]] %s3384_s1  ;;  %s2959_s24 = smov 0  }
   0x3   :  { %3409 = sst [smem:[#allocation13_spill]] %s3385_s2  ;;  %s2961_s25 = smov 0  }
   0x4   :  { %3410 = sst [smem:[#allocation14_spill]] %s3386_s3 }
   0x5   :  { %3411 = sst [smem:[#allocation15_spill]] %s3387_s4 }
   0x6   :  { %3412 = sst [smem:[#allocation16_spill]] %s3388_s5 }
   0x7   :  { %3413 = sst [smem:[#allocation17_spill]] %s3389_s6 }
   0x8   :  { %3414 = sst [smem:[#allocation18_spill]] %s3399_s16 }
   0x9 LB: > { %3415 = sst [smem:[#allocation2_spill]] %s2838_s21  ;;  %s35_s26 = sadd.s32 1, %s2846_s23  ;;  %s2854_s25 = sphi %s2961_s25, %s26_s25   ;;  %s2850_s24 = sphi %s2959_s24, %s3446_s24   ;;  %s2846_s23 = sphi %s2957_s23, %s3445_s23   ;;  %s2842_s22 = sphi %s2955_s22, %s3444_s22   ;;  %s2838_s21 = sphi %s2953_s21, %s3443_s21  }
   0xa   : > { %3416 = sst [smem:[#allocation3_spill]] %s2846_s23  ;;  %s38_s27 = sadd.s32 1, %s2850_s24 }
   0xb   : > { %3417 = sst [smem:[#allocation4_spill]] %s2850_s24  ;;  %p36_p0 = scmp.ge.s32.totalorder %s35_s26, 2 }
   0xc   : > { %3418 = sst [smem:[#allocation5_spill]] %s2854_s25  ;;  %p2519_p1 = scmp.ge.s32.totalorder %s2854_s25, 1 }
   0xd   : > { %p586_p2 = scmp.lt.s32.totalorder %s2854_s25, 5  ;;  %s3448_s26 = smov (%p36_p0, %s35_s26), 0 }
   0xe   : > { %3419 = sst [smem:[#allocation6_spill]] %s3448_s26  ;;  %s3450_s27 = smov (!%p36_p0, %s38_s27), %s2850_s24 }
   0xf   : > { %p587_p3 = pnand %p2519_p1, %p586_p2  ;;  %p40_p4 = scmp.ge.s32.totalorder %s3450_s27, 2 }
  0x11   : > { %s3452_s27 = smov (%p40_p4, %s3450_s27), 0  ;;  %590 = sbr.rel (%p587_p3) target bundleno = 3108 (0xc24), region = 84 }
  0x12   : > { %3420 = sst [smem:[#allocation7_spill]] %s3452_s27 }
  0x18   : > { %p682_p5 = scmp.lt.s32.totalorder %s2842_s22, 1  ;;  %p689_p6 = scmp.lt.s32.totalorder %s2838_s21, 1 }
  0x19   : > { %s3423_s20 = sld [smem:[#allocation11_spill]]  ;;  %s3424_s4 = sld [smem:[#allocation15_spill]] }
  0x1a   : > { %s3454_s22 = smov (!%p682_p5, %s2842_s22), 1  ;;  %s3426_s5 = sld [smem:[#allocation16_spill]] }
  0x1b   : > { %3421 = sst [smem:[#allocation8_spill]] %s3454_s22  ;;  %s2520_s29 = sshll.u32 %s3454_s22, 3 }
  0x1c   : > { %s2989_s28 = scalar_select %p689_p6, %s2838_s21, 1 }
  0x1d   : > { %s3427_s6 = sld [smem:[#allocation17_spill]]  ;;  %s3429_s0 = sld [smem:[#allocation18_spill]] }
  0x1e   : > { %s2581_s26 = sshll.u32 %s2989_s28, 6  ;;  %s2523_s3 = sshll.u32 %s2989_s28, 1 }
  0x1f   : > { %s685_s27 = scalar_lea.vmem %s3423_s20, %s2520_s29  ;;  %s3003_s25 = scalar_lea.vmem %s3424_s4, %s2581_s26 }
  0x20   : > { %3425 = sst [smem:[#allocation9_spill]] %s3003_s25  ;;  %s3009_s16 = scalar_lea.vmem %s3426_s5, %s2523_s3 }
  0x21   : > { %s2582_s30 = sshll.u32 %s2989_s28, 5  ;;  %s3041_s19 = scalar_lea.vmem %s3395_s12, %s2581_s26 }
  0x22   : > { %s3032_s5 = scalar_lea.vmem %s3393_s10, %s2582_s30  ;;  %s727_s24 = scalar_lea.vmem %s3396_s13, %s2989_s28 }
  0x23   : > { %s3015_s1 = scalar_lea.vmem %s3427_s6, %s2582_s30  ;;  %s730_s2 = scalar_lea.vmem %s3397_s14, %s2989_s28 }
  0x24   : > { %3428 = sst [smem:[#allocation10_spill]] %s3015_s1  ;;  %s733_s21 = scalar_lea.vmem %s3398_s15, %s2989_s28 }
  0x25   : > { %s3058_s6 = scalar_lea.vmem %s3429_s0, %s2520_s29  ;;  %s3430_s1 = sld [smem:[#allocation2_spill]] }
  0x2b   : > { %p2531_p7 = scmp.ne.s32.totalorder %s3430_s1, 0 }
  0x2c   : > { %v743_v0 = vld [vmem:[%s685_s27] sm:$0xff] (!%p2531_p7)  ;;  %vm746_vm0 = vcmask (!%p2531_p7), 523264   ;;  %s3431_s27 = sld [smem:[#allocation13_spill]] (!%p2531_p7)  ;;  %s3432_s22 = sld [smem:[#allocation14_spill]] (!%p2531_p7) }
  0x2d   : > { %742 = sbr.rel (%p2531_p7) target bundleno = 359 (0x167), region = 88  ;;  %v747_v1 = vsel (!%p2531_p7), %vm746_vm0, %v743_v0, 0.0 }
  0x2e   : > { %748 = vadd.xlane.f32.xlu0 (!%p2531_p7), %v747_v1 }
  0x32   : > { %v2532_v11 = vld [vmem:[%s3431_s27] ss:$0 sm:$0xff] (!%p2531_p7) }
  0x33   : > { %v2533_v13 = vld [vmem:[%s3432_s22] ss:$0 sm:$0xff] (!%p2531_p7) }
  0xbb   : > { %v749_v2 = vpop.xlane.xlu0 %748 }
  0xbc   : > { %v751_v3 = vmul.f32 0.015625, %v749_v2 }
  0xbe   : > { %v752_v4 = vsub.f32 %v743_v0, %v751_v3 }
  0xc0   : > { %v753_v5 = vmul.f32 %v752_v4, %v752_v4 }
  0xc2   : > { %v754_v6 = vsel %vm746_vm0, %v753_v5, 0.0 }
  0xc3   : > { %755 = vadd.xlane.f32.xlu0 %v754_v6 }
 0x150   : > { %v756_v7 = vpop.xlane.xlu0 %755 }
 0x151   : > { %v757_v8 = vmul.f32 0.015625, %v756_v7 }
 0x153   : > { %v758_v9 = vadd.f32 1e-12, %v757_v8 }
 0x155   : > { %2764 = vrsqrt.f32 %v758_v9 }
 0x15f   : > { %v2765_v10 = vpop.eup %2764 }
 0x160   : > { %v760_v12 = vmul.f32 %v2765_v10, %v752_v4 }
 0x162   : > { %v767_v14 = vmul.f32 %v2532_v11, %v760_v12 }
 0x164   : > { %v774_v15 = vadd.f32 %v2533_v13, %v767_v14 }
 0x166   : > { %775 = vst.msk [vmem:[%s3058_s6] sm:$0xff] %vm746_vm0, %v774_v15 }
 0x167 PF: > { %s3433_s23 = sld [smem:[#allocation9_spill]]  ;;  %v2856_v18 = vmov 0   ;;  %vm838_vm1 = vcmask 523264   ;;  %v788_v27 = vlaneseq  ;;  %v3090_v30 = vld [vmem:[%s3009_s16] sm:$0x3]  ;;  %s2857_s4 = smov 80  }
 0x168   : > { %874 = vmatprep.mubr.bf16.mxu1 %v2856_v18  ;;  %s2858_s25 = smov 112   ;;  %s2859_s3 = smov 64   ;;  %v2861_v38 = vmov 1983009808   ;;  %v2862_v40 = vmov 1934713408  }
 0x169   : > { %v3086_v28 = vshrl.u32 %v788_v27, 7  ;;  %s2860_s30 = smov 96   ;;  %v893_v39 = vunpack.c.l.s4 %v2861_v38  ;;  %v910_v41 = vunpack.c.l.s4 %v2862_v40  ;;  %v2863_v57 = vmov 0.0   ;;  %s3434_s16 = sld [smem:[#allocation8_spill]] }
 0x16a   : > { %2632 = vmatprep.subr.bf16.mxu0 %v2863_v57  ;;  %vm2864_vm2 = vmmov 0   ;;  %vm1398_vm3 = vcmask 130048   ;;  %s3435_s1 = sld [smem:[#allocation12_spill]]  ;;  %vm1583_vm4 = vcmask 64512   ;;  %vm1635_vm5 = vcmask 1043456   ;;  %s3437_s29 = sld [smem:[#allocation10_spill]] }
 0x16b   : > { %v790_v29 = vsub.s32 0, %v3086_v28  ;;  %v894_v42 = vunpack.c.0.s8 %v893_v39  ;;  %v911_v43 = vunpack.c.0.s8 %v910_v41  ;;  %2634 = vmatprep.mubr.msk.bf16.mxu0 %vm2864_vm2, %v2863_v57  ;;  %s2865_s27 = smov 32   ;;  %s2866_s20 = smov 16   ;;  %vm1966_vm6 = vcmask 261120  }
 0x16c   : > { %s2867_s18 = smov 48   ;;  %vm1968_vm7 = vcmask 392192   ;;  %s3440_s17 = scalar_lea.vmem %s3392_s9, %s2989_s28 }
 0x16d   : > { %v2766_v16 = vld [vmem:[%s3433_s23 + $0x4] ss:$8 sps:$4 sm:$0xff]   ;;  %v2768_v17 = vld [vmem:[%s3433_s23] ss:$8 sps:$4 sm:$0xff]   ;;  %v2769_v19 = vld [vmem:[%s3433_s23 + $0x14] ss:$8 sps:$4 sm:$0xff]   ;;  %v791_v31 = vrot.slane %v3090_v30, %v790_v29  ;;  %v3099_v44 = vsub.s32 %v894_v42, %v3086_v28  ;;  %v3102_v47 = vsub.s32 %v911_v43, %v3086_v28 }
 0x16e   : > { %842 = vmatprep.subr.bf16.mxu1 %v2766_v16  ;;  %v2771_v20 = vld [vmem:[%s3433_s23 + $0x10] ss:$8 sps:$4 sm:$0xff]   ;;  %v2772_v21 = vld [vmem:[%s3433_s23 + $0x24] ss:$8 sps:$4 sm:$0xff]   ;;  %v2774_v22 = vld [vmem:[%s3433_s23 + $0x20] ss:$8 sps:$4 sm:$0xff]  }
 0x16f   : > { %843 = vmatpush1.bf16.msra.mxu1 %v2768_v17  ;;  %v2775_v23 = vld [vmem:[%s3433_s23 + $0x34] ss:$8 sps:$4 sm:$0xff]   ;;  %v2777_v24 = vld [vmem:[%s3433_s23 + $0x30] ss:$8 sps:$4 sm:$0xff]   ;;  %v3081_v25 = vld [vmem:[%s3058_s6] sm:$0xff] }
 0x170   : > { %844 = vmatprep.subr.bf16.mxu1 %v2769_v19  ;;  %v777_v26 = vpack.c.bf16 %v3081_v25, %v3081_v25  ;;  %s3436_s26 = scalar_lea.vmem %s3435_s1, %s3434_s16 }
 0x173   : > { %845 = vmatpush1.bf16.msra.mxu1 %v2771_v20 }
 0x174   : > { %846 = vmatprep.subr.bf16.mxu1 %v2772_v21 }
 0x177   : > { %847 = vmatpush1.bf16.msra.mxu1 %v2774_v22 }
 0x178   : > { %848 = vmatprep.subr.bf16.mxu1 %v2775_v23 }
 0x17b   : > { %849 = vmatpush1.bf16.msra.mxu1 %v2777_v24 }
 0x17c   : > { %2620 = vmatprep.subr.bf16.mxu1 %v2863_v57 }
 0x17e   : > { %2542 = vmatmul.mubr.msk.bf16.vlgmr.msra.gmra.mrb[0].mxu1 %vm838_vm1, %v777_v26 }
 0x17f   : > { %2622 = vmatprep.mubr.msk.bf16.mxu1 %vm2864_vm2, %v2863_v57 }
 0x251   : > { %v876_v32 = vpop.f32.mrb[0].mxu1 }
 0x252   : > { %v877_v33 = vadd.f32 %v876_v32, %v791_v31  ;;  %v3093_v34 = vpop.f32.mrb[1].mxu1 }
 0x253   : > { %v880_v35 = vpop.f32.mrb[2].mxu1 }
 0x254   : > { %v883_v36 = vpack.c.bf16 %v877_v33, %v877_v33  ;;  %v881_v37 = vpop.f32.mrb[3].mxu1 }
 0x256   : > { %890 = vrot.lane.b32.xlu1 %v883_v36, %s2857_s4  ;;  %886 = vrot.lane.b32.xlu0 %v883_v36, %s2858_s25  ;;  %v898_v55 = vrot.slane %v883_v36, %v3099_v44 }
 0x25a   : > { %1053 = vrot.lane.b32.xlu1 %v883_v36, %s2859_s3  ;;  %888 = vrot.lane.b32.xlu0 %v883_v36, %s2860_s30 }
 0x2c8   : > { %v891_v45 = vpop.permute.xlu1 %890  ;;  %v887_v46 = vpop.permute.xlu0 %886 }
 0x2c9   : > { %v940_v48 = vrot.slane %v891_v45, %v3099_v44  ;;  %v932_v49 = vrot.slane %v887_v46, %v3099_v44  ;;  %1055 = vrot.lane.b32.xlu0 %v887_v46, %s2859_s3 }
 0x2cb   : > { %v941_v50 = vcombine.low %v932_v49, %v940_v48  ;;  %v942_v51 = vcombine.high %v932_v49, %v940_v48 }
 0x2cc   : > { %v889_v52 = vpop.permute.xlu0 %888  ;;  %v1054_v48 = vpop.permute.xlu1 %1053 }
 0x2cd   : > { %v949_v53 = vrot.slane %v941_v50, %v3102_v47  ;;  %v906_v54 = vrot.slane %v889_v52, %v3099_v44  ;;  %1059 = vrot.lane.b32.xlu0 %v891_v45, %s2859_s3  ;;  %1057 = vrot.lane.b32.xlu1 %v889_v52, %s2859_s3  ;;  %v956_v56 = vrot.slane %v942_v51, %v3102_v47 }
 0x2cf   : > { %v907_v58 = vcombine.low %v898_v55, %v906_v54  ;;  %v908_v59 = vcombine.high %v898_v55, %v906_v54  ;;  %v957_v60 = vcombine.high %v949_v53, %v2856_v18  ;;  %v958_v63 = vcombine.high %v956_v56, %v2856_v18 }
 0x2d0   : > { %v964_v0 = vshrl.u32 %v949_v53, 16  ;;  %v980_v6 = vshrl.u32 %v956_v56, 16 }
 0x2d1   : > { %v915_v61 = vrot.slane %v907_v58, %v3102_v47  ;;  %v922_v62 = vrot.slane %v908_v59, %v3102_v47  ;;  %v972_v5 = vshrl.u32 %v957_v60, 16  ;;  %v988_v13 = vshrl.u32 %v958_v63, 16 }
 0x2d3   : > { %v923_v1 = vcombine.high %v915_v61, %v2856_v18  ;;  %v924_v2 = vcombine.high %v922_v62, %v2856_v18  ;;  %v961_v3 = vpack.i.b16 %v949_v53, %v915_v61  ;;  %v963_v4 = vshrl.u32 %v915_v61, 16 }
 0x2d4   : > { %v977_v7 = vpack.i.b16 %v956_v56, %v922_v62  ;;  %v979_v8 = vshrl.u32 %v922_v62, 16  ;;  %v1068_v53 = vrot.slane %v1054_v48, %v3099_v44 }
 0x2d5   : > { %v965_v9 = vpack.i.b16 %v964_v0, %v963_v4  ;;  %v969_v10 = vpack.i.b16 %v957_v60, %v923_v1  ;;  %v971_v11 = vshrl.u32 %v923_v1, 16  ;;  %v985_v12 = vpack.i.b16 %v958_v63, %v924_v2 }
 0x2d6   : > { %v981_v14 = vpack.i.b16 %v980_v6, %v979_v8  ;;  %v987_v15 = vshrl.u32 %v924_v2, 16  ;;  %v991_v16 = vcombine.low %v961_v3, %v977_v7 }
 0x2d7   : > { %v973_v17 = vpack.i.b16 %v972_v5, %v971_v11  ;;  %v999_v19 = vcombine.low %v969_v10, %v985_v12 }
 0x2d8   : > { %v989_v20 = vpack.i.b16 %v988_v13, %v987_v15  ;;  %v1016_v21 = vcombine.low %v965_v9, %v981_v14  ;;  %v998_v22 = vrot.slane %v991_v16, %v3099_v44 }
 0x2d9   : > { %v1006_v23 = vrot.slane %v999_v19, %v3099_v44 }
 0x2da   : > { %v1024_v24 = vcombine.low %v973_v17, %v989_v20  ;;  %v1023_v27 = vrot.slane %v1016_v21, %v3099_v44 }
 0x2db   : > { %v1007_v26 = vcombine.low %v998_v22, %v1006_v23 }
 0x2dc   : > { %v1031_v29 = vrot.slane %v1024_v24, %v3099_v44 }
 0x2dd   : > { %v3127_v31 = vrot.slane %v1007_v26, %v3102_v47 }
 0x2de   : > { %v1032_v32 = vcombine.low %v1023_v27, %v1031_v29 }
 0x2df   : > { %v3134_v35 = vcombine.high %v3127_v31, %v2856_v18  ;;  %v1044_v38 = vshrl.u32 %v3127_v31, 16 }
 0x2e0   : > { %v3130_v33 = vrot.slane %v1032_v32, %v3102_v47 }
 0x2e1   : > { %v1050_v41 = vshrl.u32 %v3134_v35, 16 }
 0x2e2   : > { %v1043_v36 = vpack.i.b16 %v3130_v33, %v3127_v31  ;;  %v3140_v37 = vcombine.high %v3130_v33, %v2856_v18  ;;  %v1045_v39 = vshrl.u32 %v3130_v33, 16 }
 0x2e4   : > { %v1049_v40 = vpack.i.b16 %v3140_v37, %v3134_v35  ;;  %v1051_v42 = vshrl.u32 %v3140_v37, 16  ;;  %v3148_v43 = vpack.i.b16 %v1045_v39, %v1044_v38  ;;  %v2543_v35 = vld [vmem:[%s3436_s26] ss:$0 sm:$0xff]  ;;  %s3441_s26 = scalar_lea.vmem %s3394_s11, %s2989_s28 }
 0x2e6   : > { %v3150_v45 = vpack.i.b16 %v1051_v42, %v1050_v41 }
 0x33b   : > { %v1056_v46 = vpop.permute.xlu0 %1055 }
 0x33c   : > { %v1102_v50 = vrot.slane %v1056_v46, %v3099_v44 }
 0x33f   : > { %v1060_v49 = vpop.permute.xlu0 %1059  ;;  %v1058_v51 = vpop.permute.xlu1 %1057 }
 0x340   : > { %v1110_v52 = vrot.slane %v1060_v49, %v3099_v44  ;;  %v1076_v54 = vrot.slane %v1058_v51, %v3099_v44 }
 0x342   : > { %v1111_v55 = vcombine.low %v1102_v50, %v1110_v52  ;;  %v1112_v56 = vcombine.high %v1102_v50, %v1110_v52  ;;  %v1077_v58 = vcombine.low %v1068_v53, %v1076_v54  ;;  %v1078_v59 = vcombine.high %v1068_v53, %v1076_v54 }
 0x344   : > { %v1119_v60 = vrot.slane %v1111_v55, %v3102_v47  ;;  %v1126_v61 = vrot.slane %v1112_v56, %v3102_v47  ;;  %v1085_v62 = vrot.slane %v1077_v58, %v3102_v47  ;;  %v1092_v63 = vrot.slane %v1078_v59, %v3102_v47 }
 0x346   : > { %v1127_v0 = vcombine.high %v1119_v60, %v2856_v18  ;;  %v1128_v1 = vcombine.high %v1126_v61, %v2856_v18  ;;  %v1134_v2 = vshrl.u32 %v1119_v60, 16  ;;  %v1150_v3 = vshrl.u32 %v1126_v61, 16 }
 0x347   : > { %v1093_v4 = vcombine.high %v1085_v62, %v2856_v18  ;;  %v1094_v5 = vcombine.high %v1092_v63, %v2856_v18  ;;  %v1133_v6 = vshrl.u32 %v1085_v62, 16  ;;  %v1149_v7 = vshrl.u32 %v1092_v63, 16 }
 0x348   : > { %v1131_v8 = vpack.i.b16 %v1119_v60, %v1085_v62  ;;  %v1142_v9 = vshrl.u32 %v1127_v0, 16  ;;  %v1147_v10 = vpack.i.b16 %v1126_v61, %v1092_v63  ;;  %v1158_v11 = vshrl.u32 %v1128_v1, 16 }
 0x349   : > { %v1141_v12 = vshrl.u32 %v1093_v4, 16  ;;  %v1157_v13 = vshrl.u32 %v1094_v5, 16  ;;  %v1135_v14 = vpack.i.b16 %v1134_v2, %v1133_v6  ;;  %v1139_v15 = vpack.i.b16 %v1127_v0, %v1093_v4 }
 0x34a   : > { %v1151_v16 = vpack.i.b16 %v1150_v3, %v1149_v7  ;;  %v1155_v17 = vpack.i.b16 %v1128_v1, %v1094_v5  ;;  %v1161_v19 = vcombine.low %v1131_v8, %v1147_v10 }
 0x34b   : > { %v1143_v20 = vpack.i.b16 %v1142_v9, %v1141_v12  ;;  %v1159_v21 = vpack.i.b16 %v1158_v11, %v1157_v13 }
 0x34c   : > { %v1169_v22 = vcombine.low %v1139_v15, %v1155_v17  ;;  %v1186_v23 = vcombine.low %v1135_v14, %v1151_v16  ;;  %v1168_v26 = vrot.slane %v1161_v19, %v3099_v44  ;;  %v794_v15 = vsub.s32 1, %v3086_v28 }
 0x34d   : > { %v1194_v24 = vcombine.low %v1143_v20, %v1159_v21 }
 0x34e   : > { %v1176_v27 = vrot.slane %v1169_v22, %v3099_v44  ;;  %v1193_v29 = vrot.slane %v1186_v23, %v3099_v44  ;;  %v795_v16 = vrot.slane %v3090_v30, %v794_v15 }
 0x34f   : > { %v1201_v32 = vrot.slane %v1194_v24, %v3099_v44 }
 0x350   : > { %v1177_v38 = vcombine.low %v1168_v26, %v1176_v27  ;;  %v879_v17 = vadd.f32 %v3093_v34, %v795_v16 }
 0x351   : > { %v1202_v39 = vcombine.low %v1193_v29, %v1201_v32 }
 0x352   : > { %v1184_v41 = vrot.slane %v1177_v38, %v3102_v47  ;;  %v884_v19 = vpack.c.bf16 %v879_v17, %v879_v17 }
 0x353   : > { %v1209_v42 = vrot.slane %v1202_v39, %v3102_v47 }
 0x354   : > { %v1185_v48 = vcombine.high %v1184_v41, %v2856_v18  ;;  %v1214_v54 = vshrl.u32 %v1184_v41, 16 }
 0x355   : > { %v1213_v46 = vpack.i.b16 %v1209_v42, %v1184_v41  ;;  %v1210_v49 = vcombine.high %v1209_v42, %v2856_v18  ;;  %v1215_v52 = vshrl.u32 %v1209_v42, 16 }
 0x356   : > { %v1220_v59 = vshrl.u32 %v1185_v48, 16 }
 0x357   : > { %v1403_v50 = vsel %vm1398_vm3, %v1213_v46, 0  ;;  %v1219_v51 = vpack.i.b16 %v1210_v49, %v1185_v48  ;;  %v1216_v55 = vpack.i.b16 %v1215_v52, %v1214_v54  ;;  %v1221_v56 = vshrl.u32 %v1210_v49, 16 }
 0x358   : > { %2621 = vmatpush3.bf16.xpose.msra.mxu1 %v1403_v50 }
 0x359   : > { %v1495_v53 = vsel %vm1398_vm3, %v1219_v51, 0  ;;  %2626 = vmatprep.subr.bf16.mxu1 %v2863_v57  ;;  %v1449_v58 = vsel %vm1398_vm3, %v1216_v55, 0  ;;  %v1222_v31 = vpack.i.b16 %v1221_v56, %v1220_v59 }
 0x35a   : > { %2633 = vmatpush3.bf16.xpose.msra.mxu0 %v1495_v53  ;;  %v1236_v53 = vrot.slane %v884_v19, %v3099_v44 }
 0x35b   : > { %2644 = vmatprep.subr.bf16.mxu0 %v2863_v57  ;;  %v1541_v33 = vsel %vm1398_vm3, %v1222_v31, 0 }
 0x35f   : > { %2623 = vmatmul.mubr.msk.bf16.vlgmr.msra.gmra.mrb[4].mxu1 %vm1398_vm3, %v1043_v36 }
 0x360   : > { %2627 = vmatpush3.bf16.xpose.msra.mxu1 %v1449_v58  ;;  %2628 = vmatprep.mubr.msk.bf16.mxu1 %vm2864_vm2, %v2863_v57 }
 0x361   : > { %2635 = vmatmul.mubr.msk.bf16.vlgmr.msra.gmra.mrb[0].mxu0 %vm1398_vm3, %v1049_v40  ;;  %2638 = vmatprep.subr.bf16.mxu1 %v2863_v57 }
 0x362   : > { %2646 = vmatprep.mubr.msk.bf16.mxu0 %vm2864_vm2, %v2863_v57 }
 0x367   : > { %2629 = vmatmul.mubr.msk.bf16.vlgmr.msra.gmra.mrb[8].mxu1 %vm1398_vm3, %v3148_v43 }
 0x368   : > { %2639 = vmatpush3.bf16.xpose.msra.mxu1 %v1541_v33  ;;  %2640 = vmatprep.mubr.msk.bf16.mxu1 %vm2864_vm2, %v2863_v57 }
 0x369   : > { %2650 = vmatprep.subr.bf16.mxu1 %v2863_v57 }
 0x36f   : > { %2641 = vmatmul.mubr.msk.bf16.vlgmr.msra.gmra.mrb[12].mxu1 %vm1398_vm3, %v3150_v45 }
 0x370   : > { %2652 = vmatprep.mubr.msk.bf16.mxu1 %vm2864_vm2, %v2863_v57 }
 0x432   : > { %v1439_v36 = vpop.f32.mrb[4].mxu1 }
 0x433   : > { %v1440_v37 = vadd.f32 %v2543_v35, %v1439_v36  ;;  %v2624_v40 = vpop.f32.mrb[5].mxu1 }
 0x434   : > { %v1442_v43 = vpop.f32.mrb[6].mxu1  ;;  %v1531_v60 = vpop.f32.mrb[0].mxu0 }
 0x435   : > { %v2625_v61 = vpop.f32.mrb[7].mxu1  ;;  %v2636_v62 = vpop.f32.mrb[1].mxu0  ;;  %v1584_v63 = vsel %vm1583_vm4, %v1440_v37, -inf  ;;  %v1532_v5 = vadd.f32 %v2543_v35, %v1531_v60 }
 0x436   : > { %1585 = vmax.xlane.f32.xlu1 %v1584_v63  ;;  %v1534_v45 = vpop.f32.mrb[2].mxu0 }
 0x437   : > { %v2637_v0 = vpop.f32.mrb[3].mxu0  ;;  %v1590_v8 = vsel %vm1583_vm4, %v1532_v5, -inf }
 0x43a   : > { %v1485_v1 = vpop.f32.mrb[8].mxu1 }
 0x43b   : > { %v1486_v2 = vadd.f32 %v2543_v35, %v1485_v1  ;;  %v2630_v3 = vpop.f32.mrb[9].mxu1 }
 0x43c   : > { %v1488_v4 = vpop.f32.mrb[10].mxu1 }
 0x43d   : > { %v2631_v6 = vpop.f32.mrb[11].mxu1  ;;  %v1587_v7 = vsel %vm1583_vm4, %v1486_v2, -inf }
 0x43e   : > { %1588 = vmax.xlane.f32.xlu0 %v1587_v7 }
 0x442   : > { %v1577_v9 = vpop.f32.mrb[12].mxu1  ;;  %1591 = vmax.xlane.f32.xlu0 %v1590_v8 }
 0x443   : > { %v1578_v10 = vadd.f32 %v2543_v35, %v1577_v9  ;;  %v2642_v11 = vpop.f32.mrb[13].mxu1 }
 0x444   : > { %v1580_v12 = vpop.f32.mrb[14].mxu1 }
 0x445   : > { %v2643_v13 = vpop.f32.mrb[15].mxu1  ;;  %v1593_v14 = vsel %vm1583_vm4, %v1578_v10, -inf }
 0x446   : > { %1594 = vmax.xlane.f32.xlu1 %v1593_v14 }
 0x457   : > { %1226 = vrot.lane.b32.xlu1 %v884_v19, %s2860_s30  ;;  %s3439_s30 = scalar_lea.vmem %s3391_s8, %s2989_s28 }
 0x4c3   : > { %v1586_v20 = vpop.xlane.xlu1 %1585 }
 0x4c4   : > { %v1596_v21 = vsub.f32 %v1440_v37, %v1586_v20 }
 0x4c6   : > { %v1600_v22 = vmul.f32 1.442695, %v1596_v21 }
 0x4c8   : > { %2794 = vpow2.f32 %v1600_v22 }
 0x4cb   : > { %v1589_v23 = vpop.xlane.xlu0 %1588 }
 0x4cc   : > { %v1597_v24 = vsub.f32 %v1486_v2, %v1589_v23 }
 0x4ce   : > { %v1602_v26 = vmul.f32 1.442695, %v1597_v24 }
 0x4cf   : > { %v1592_v29 = vpop.xlane.xlu0 %1591 }
 0x4d0   : > { %2796 = vpow2.f32 %v1602_v26  ;;  %v1598_v32 = vsub.f32 %v1532_v5, %v1592_v29 }
 0x4d2   : > { %v3213_v27 = vpop.eup %2794  ;;  %v1604_v38 = vmul.f32 1.442695, %v1598_v32 }
 0x4d3   : > { %v1608_v28 = vsel %vm1583_vm4, %v3213_v27, 0.0  ;;  %v1595_v39 = vpop.xlane.xlu1 %1594 }
 0x4d4   : > { %1609 = vadd.xlane.f32.xlu0 %v1608_v28  ;;  %2798 = vpow2.f32 %v1604_v38  ;;  %v1599_v41 = vsub.f32 %v1578_v10, %v1595_v39 }
 0x4d6   : > { %v1606_v42 = vmul.f32 1.442695, %v1599_v41 }
 0x4d7   : > { %v1227_v51 = vpop.permute.xlu1 %1226 }
 0x4d8   : > { %2800 = vpow2.f32 %v1606_v42  ;;  %v1244_v52 = vrot.slane %v1227_v51, %v3099_v44 }
 0x4da   : > { %v3217_v30 = vpop.eup %2796  ;;  %v1245_v55 = vcombine.low %v1236_v53, %v1244_v52  ;;  %v1246_v56 = vcombine.high %v1236_v53, %v1244_v52 }
 0x4db   : > { %v1611_v34 = vsel %vm1583_vm4, %v3217_v30, 0.0 }
 0x4dc   : > { %1612 = vadd.xlane.f32.xlu1 %v1611_v34  ;;  %v1253_v59 = vrot.slane %v1245_v55, %v3102_v47  ;;  %v1260_v33 = vrot.slane %v1246_v56, %v3102_v47 }
 0x4de   : > { %v3223_v46 = vpop.eup %2798  ;;  %v1261_v40 = vcombine.high %v1253_v59, %v2856_v18  ;;  %v1262_v61 = vcombine.high %v1260_v33, %v2856_v18  ;;  %v1301_v45 = vshrl.u32 %v1253_v59, 16  ;;  %v1317_v1 = vshrl.u32 %v1260_v33, 16 }
 0x4df   : > { %v1614_v48 = vsel %vm1583_vm4, %v3223_v46, 0.0 }
 0x4e0   : > { %v1309_v0 = vshrl.u32 %v1261_v40, 16  ;;  %v1325_v6 = vshrl.u32 %v1262_v61, 16 }
 0x4e2   : > { %v3227_v49 = vpop.eup %2800 }
 0x4e3   : > { %v1617_v50 = vsel %vm1583_vm4, %v3227_v49, 0.0 }
 0x4ea   : > { %1224 = vrot.lane.b32.xlu0 %v884_v19, %s2858_s25 }
 0x4ed   : > { %1228 = vrot.lane.b32.xlu1 %v884_v19, %s2857_s4  ;;  %s3438_s4 = scalar_lea.vmem %s3390_s7, %s2989_s28 }
 0x509   : > { %1615 = vadd.xlane.f32.xlu0 %v1614_v48 }
 0x511   : > { %1618 = vadd.xlane.f32.xlu1 %v1617_v50 }
 0x561   : > { %v1610_v54 = vpop.xlane.xlu0 %1609 }
 0x562   : > { %2802 = vrcp.f32 %v1610_v54 }
 0x565   : > { %v1225_v31 = vpop.permute.xlu0 %1224 }
 0x566   : > { %v1270_v36 = vrot.slane %v1225_v31, %v3099_v44 }
 0x569   : > { %v1613_v58 = vpop.xlane.xlu1 %1612 }
 0x56a   : > { %2804 = vrcp.f32 %v1613_v58 }
 0x56c   : > { %v2803_v29 = vpop.eup %2802 }
 0x56d   : > { %v1229_v35 = vpop.permute.xlu1 %1228  ;;  %v1624_v42 = vmul.f32 %v2803_v29, %v3213_v27  ;;  %v2780_v29 = vld [vmem:[%s3437_s29 + $0x10] sm:$0xff]  }
 0x56e   : > { %v1278_v37 = vrot.slane %v1229_v35, %v3099_v44 }
 0x570   : > { %v1279_v43 = vcombine.low %v1270_v36, %v1278_v37  ;;  %v1280_v60 = vcombine.high %v1270_v36, %v1278_v37 }
 0x572   : > { %v1287_v62 = vrot.slane %v1279_v43, %v3102_v47  ;;  %v1294_v63 = vrot.slane %v1280_v60, %v3102_v47 }
 0x574   : > { %v1295_v2 = vcombine.high %v1287_v62, %v2856_v18  ;;  %v1296_v3 = vcombine.high %v1294_v63, %v2856_v18  ;;  %v1299_v4 = vpack.i.b16 %v1287_v62, %v1253_v59  ;;  %v1302_v5 = vshrl.u32 %v1287_v62, 16  ;;  %v2805_v39 = vpop.eup %2804 }
 0x575   : > { %v1315_v7 = vpack.i.b16 %v1294_v63, %v1260_v33  ;;  %v1318_v8 = vshrl.u32 %v1294_v63, 16  ;;  %v1625_v53 = vmul.f32 %v2805_v39, %v3217_v30  ;;  %v1628_v33 = vpack.c.bf16 %v1624_v42, %v1624_v42 }
 0x576   : > { %v1303_v9 = vpack.i.b16 %v1302_v5, %v1301_v45  ;;  %v1307_v10 = vpack.i.b16 %v1295_v2, %v1261_v40  ;;  %v1310_v11 = vshrl.u32 %v1295_v2, 16  ;;  %v1323_v12 = vpack.i.b16 %v1296_v3, %v1262_v61  ;;  %v2778_v45 = vld [vmem:[%s3437_s29] sm:$0xff]  }
 0x577   : > { %v1319_v13 = vpack.i.b16 %v1318_v8, %v1317_v1  ;;  %v1326_v14 = vshrl.u32 %v1296_v3, 16  ;;  %v1329_v15 = vcombine.low %v1299_v4, %v1315_v7  ;;  %v1629_v35 = vpack.c.bf16 %v1625_v53, %v1625_v53 }
 0x578   : > { %v1311_v16 = vpack.i.b16 %v1310_v11, %v1309_v0  ;;  %v1337_v17 = vcombine.low %v1307_v10, %v1323_v12  ;;  %v2779_v0 = vld [vmem:[%s3437_s29 + $0x8] sm:$0xff]  }
 0x579   : > { %v1327_v19 = vpack.i.b16 %v1326_v14, %v1325_v6  ;;  %v1354_v20 = vcombine.low %v1303_v9, %v1319_v13  ;;  %v1336_v21 = vrot.slane %v1329_v15, %v3099_v44 }
 0x57a   : > { %v1344_v22 = vrot.slane %v1337_v17, %v3099_v44 }
 0x57b   : > { %v1362_v23 = vcombine.low %v1311_v16, %v1327_v19  ;;  %v1361_v26 = vrot.slane %v1354_v20, %v3099_v44 }
 0x57c   : > { %v1345_v24 = vcombine.low %v1336_v21, %v1344_v22 }
 0x57d   : > { %v1369_v28 = vrot.slane %v1362_v23, %v3099_v44 }
 0x57e   : > { %v1352_v34 = vrot.slane %v1345_v24, %v3102_v47 }
 0x57f   : > { %v1370_v32 = vcombine.low %v1361_v26, %v1369_v28 }
 0x580   : > { %v1353_v38 = vcombine.high %v1352_v34, %v2856_v18  ;;  %v1382_v50 = vshrl.u32 %v1352_v34, 16 }
 0x581   : > { %v1377_v41 = vrot.slane %v1370_v32, %v3102_v47 }
 0x582   : > { %v1388_v54 = vshrl.u32 %v1353_v38, 16 }
 0x583   : > { %v1381_v48 = vpack.i.b16 %v1377_v41, %v1352_v34  ;;  %v1383_v51 = vshrl.u32 %v1377_v41, 16  ;;  %v1378_v52 = vcombine.high %v1377_v41, %v2856_v18 }
 0x585   : > { %v1637_v55 = vsel %vm1635_vm5, %v1381_v48, 0  ;;  %v1384_v56 = vpack.i.b16 %v1383_v51, %v1382_v50  ;;  %v1387_v58 = vpack.i.b16 %v1378_v52, %v1353_v38  ;;  %v1389_v59 = vshrl.u32 %v1378_v52, 16  ;;  %v2781_v52 = vld [vmem:[%s3437_s29 + $0x18] sm:$0xff]  }
 0x586   : > { %2645 = vmatpush3.bf16.msra.mxu0 %v1637_v55 }
 0x587   : > { %v1683_v31 = vsel %vm1635_vm5, %v1384_v56, 0  ;;  %2656 = vmatprep.subr.bf16.mxu0 %v2863_v57  ;;  %v1390_v27 = vpack.i.b16 %v1389_v59, %v1388_v54  ;;  %v1729_v18 = vsel %vm1635_vm5, %v1387_v58, 0 }
 0x588   : > { %2651 = vmatpush3.bf16.msra.mxu1 %v1683_v31 }
 0x589   : > { %2647 = vmatmul.mubr.msk.bf16.vlgmr.msra.gmra.mrb[4].mxu0 %vm1583_vm4, %v1628_v33  ;;  %2662 = vmatprep.subr.bf16.mxu1 %v2863_v57  ;;  %v1775_v30 = vsel %vm1635_vm5, %v1390_v27, 0 }
 0x58a   : > { %2657 = vmatpush3.bf16.msra.mxu0 %v1729_v18  ;;  %2658 = vmatprep.mubr.msk.bf16.mxu0 %vm2864_vm2, %v2863_v57 }
 0x58b   : > { %2653 = vmatmul.mubr.msk.bf16.vlgmr.msra.gmra.mrb[16].mxu1 %vm1583_vm4, %v1629_v35  ;;  %2668 = vmatprep.subr.bf16.mxu0 %v2863_v57 }
 0x58c   : > { %2663 = vmatpush3.bf16.msra.mxu1 %v1775_v30  ;;  %2664 = vmatprep.mubr.msk.bf16.mxu1 %vm2864_vm2, %v2863_v57 }
 0x58d   : > { %2680 = vmatprep.subr.bf16.mxu1 %v2863_v57 }
 0x596   : > { %v1616_v36 = vpop.xlane.xlu0 %1615 }
 0x597   : > { %2806 = vrcp.f32 %v1616_v36 }
 0x59e   : > { %v1619_v37 = vpop.xlane.xlu1 %1618 }
 0x59f   : > { %2808 = vrcp.f32 %v1619_v37 }
 0x5a1   : > { %v2807_v40 = vpop.eup %2806 }
 0x5a2   : > { %v1626_v43 = vmul.f32 %v2807_v40, %v3223_v46 }
 0x5a4   : > { %v1630_v60 = vpack.c.bf16 %v1626_v43, %v1626_v43 }
 0x5a6   : > { %2659 = vmatmul.mubr.msk.bf16.vlgmr.msra.gmra.mrb[8].mxu0 %vm1583_vm4, %v1630_v60 }
 0x5a7   : > { %2676 = vmatprep.mubr.msk.bf16.mxu0 %vm2864_vm2, %v2863_v57  ;;  %2669 = vmatpush3.bf16.msra.mxu0 %v2778_v45 }
 0x5a8   : > { %2670 = vmatprep.subr.bf16.mxu0 %v2863_v57 }
 0x5a9   : > { %v2809_v61 = vpop.eup %2808 }
 0x5aa   : > { %v1627_v62 = vmul.f32 %v2809_v61, %v3227_v49 }
 0x5ab   : > { %2671 = vmatpush3.bf16.msra.mxu0 %v2779_v0  ;;  %v2554_v0 = vld [vmem:[%s3438_s4] ss:$0 sm:$0xff] }
 0x5ac   : > { %v1631_v63 = vpack.c.bf16 %v1627_v62, %v1627_v62  ;;  %2672 = vmatprep.subr.bf16.mxu0 %v2863_v57 }
 0x5ae   : > { %2665 = vmatmul.mubr.msk.bf16.vlgmr.msra.gmra.mrb[20].mxu1 %vm1583_vm4, %v1631_v63 }
 0x5af   : > { %2688 = vmatprep.mubr.msk.bf16.mxu1 %vm2864_vm2, %v2863_v57  ;;  %2673 = vmatpush3.bf16.msra.mxu0 %v2780_v29  ;;  %v2789_v29 = vld [vmem:[%s3041_s19 + $0x18] sm:$0xff]  }
 0x5b0   : > { %2674 = vmatprep.subr.bf16.mxu0 %v2863_v57 }
 0x5b3   : > { %2675 = vmatpush3.bf16.msra.mxu0 %v2781_v52 }
 0x5b4   : > { %2692 = vmatprep.subr.bf16.mxu0 %v2863_v57 }
 0x65c   : > { %v1673_v46 = vpop.f32.mrb[4].mxu0 }
 0x65d   : > { %v2648_v1 = vpop.f32.mrb[5].mxu0 }
 0x65e   : > { %v1676_v2 = vpop.f32.mrb[6].mxu0  ;;  %v1719_v3 = vpop.f32.mrb[16].mxu1 }
 0x65f   : > { %v2649_v4 = vpop.f32.mrb[7].mxu0  ;;  %v2654_v49 = vpop.f32.mrb[17].mxu1 }
 0x660   : > { %v1722_v5 = vpop.f32.mrb[18].mxu1 }
 0x661   : > { %v2655_v6 = vpop.f32.mrb[19].mxu1 }
 0x679   : > { %v1765_v7 = vpop.f32.mrb[8].mxu0 }
 0x67a   : > { %v1817_v8 = vcombine.low %v1673_v46, %v1765_v7  ;;  %v1818_v9 = vcombine.high %v1673_v46, %v1765_v7  ;;  %v2660_v10 = vpop.f32.mrb[9].mxu0 }
 0x67b   : > { %v1768_v11 = vpop.f32.mrb[10].mxu0 }
 0x67c   : > { %v2661_v12 = vpop.f32.mrb[11].mxu0  ;;  %v1825_v19 = vrot.slane %v1817_v8, %v3099_v44  ;;  %v1832_v20 = vrot.slane %v1818_v9, %v3099_v44  ;;  %v2782_v11 = vld [vmem:[%s3032_s5] sm:$0xff]  }
 0x67d   : > { %2681 = vmatpush3.bf16.msra.mxu1 %v2782_v11  ;;  %v2783_v12 = vld [vmem:[%s3032_s5 + $0x8] sm:$0xff]  }
 0x67e   : > { %2682 = vmatprep.subr.bf16.mxu1 %v2863_v57 }
 0x681   : > { %v1811_v13 = vpop.f32.mrb[20].mxu1  ;;  %2683 = vmatpush3.bf16.msra.mxu1 %v2783_v12 }
 0x682   : > { %v1833_v14 = vcombine.low %v1719_v3, %v1811_v13  ;;  %v1834_v15 = vcombine.high %v1719_v3, %v1811_v13  ;;  %v2666_v16 = vpop.f32.mrb[21].mxu1  ;;  %2684 = vmatprep.subr.bf16.mxu1 %v2863_v57  ;;  %v2785_v13 = vld [vmem:[%s3032_s5 + $0x18] sm:$0xff]  }
 0x683   : > { %v1814_v17 = vpop.f32.mrb[22].mxu1 }
 0x684   : > { %v1841_v21 = vrot.slane %v1833_v14, %v3099_v44  ;;  %v1848_v22 = vrot.slane %v1834_v15, %v3099_v44  ;;  %v2667_v23 = vpop.f32.mrb[23].mxu1  ;;  %v2786_v14 = vld [vmem:[%s3041_s19] sm:$0xff]  }
 0x686   : > { %v1849_v24 = vcombine.low %v1825_v19, %v1841_v21  ;;  %v1850_v26 = vcombine.high %v1825_v19, %v1841_v21  ;;  %v1865_v28 = vcombine.low %v1832_v20, %v1848_v22  ;;  %v1866_v34 = vcombine.high %v1832_v20, %v1848_v22  ;;  %v2560_v20 = vld [vmem:[%s3439_s30] ss:$0 sm:$0xff] }
 0x687   : > { %v2561_v22 = vld [vmem:[%s3440_s17] ss:$0 sm:$0xff] }
 0x688   : > { %v1857_v32 = vrot.slane %v1849_v24, %v3102_v47  ;;  %v1864_v38 = vrot.slane %v1850_v26, %v3102_v47  ;;  %v1873_v39 = vrot.slane %v1865_v28, %v3102_v47  ;;  %v1880_v41 = vrot.slane %v1866_v34, %v3102_v47  ;;  %v2787_v28 = vld [vmem:[%s3041_s19 + $0x8] sm:$0xff]   ;;  %v2788_v34 = vld [vmem:[%s3041_s19 + $0x10] sm:$0xff]  }
 0x68a   : > { %v1885_v42 = vcombine.low %v1857_v32, %v1864_v38  ;;  %v2552_v48 = vcombine.high %v1857_v32, %v1864_v38  ;;  %v1901_v50 = vcombine.low %v1873_v39, %v1880_v41  ;;  %v2553_v51 = vcombine.high %v1873_v39, %v1880_v41  ;;  %v2790_v32 = vld [vmem:[%s3041_s19 + $0x20] sm:$0xff]   ;;  %v2791_v38 = vld [vmem:[%s3041_s19 + $0x28] sm:$0xff]   ;;  %v2792_v39 = vld [vmem:[%s3041_s19 + $0x30] sm:$0xff]  }
 0x68b   : > { %v2793_v41 = vld [vmem:[%s3041_s19 + $0x38] sm:$0xff]  }
 0x68c   : > { %v1892_v53 = vrot.slane %v1885_v42, %v3099_v44  ;;  %v1900_v54 = vrot.slane %v2552_v48, %v3099_v44  ;;  %v1908_v55 = vrot.slane %v1901_v50, %v3099_v44  ;;  %v1916_v56 = vrot.slane %v2553_v51, %v3099_v44  ;;  %v2562_v42 = vld [vmem:[%s3441_s26] ss:$0 sm:$0xff] }
 0x68e   : > { %v1918_v58 = vcombine.high %v1892_v53, %v1900_v54  ;;  %v1934_v59 = vcombine.high %v1908_v55, %v1916_v56  ;;  %v1917_v31 = vcombine.low %v1892_v53, %v1900_v54  ;;  %v1933_v33 = vcombine.low %v1908_v55, %v1916_v56 }
 0x690   : > { %v1932_v27 = vrot.slane %v1918_v58, %v3102_v47  ;;  %v1948_v18 = vrot.slane %v1934_v59, %v3102_v47  ;;  %v1925_v35 = vrot.slane %v1917_v31, %v3102_v47  ;;  %v1941_v30 = vrot.slane %v1933_v33, %v3102_v47 }
 0x692   : > { %v1951_v36 = vcombine.low %v1932_v27, %v1948_v18  ;;  %v1950_v37 = vcombine.high %v1925_v35, %v1941_v30  ;;  %v1952_v40 = vcombine.high %v1932_v27, %v1948_v18  ;;  %v1949_v43 = vcombine.low %v1925_v35, %v1941_v30  ;;  %v2568_v35 = vld [vmem:[%s727_s24] ss:$0 sm:$0xff] }
 0x694   : > { %1958 = vrot.lane.b32.xlu1 %v1951_v36, %s2865_s27  ;;  %1954 = vrot.lane.b32.xlu0 %v1950_v37, %s2866_s20 }
 0x698   : > { %1962 = vrot.lane.b32.xlu0 %v1952_v40, %s2867_s18 }
 0x706   : > { %v1955_v44 = vpop.permute.xlu0 %1954  ;;  %v1959_v60 = vpop.permute.xlu1 %1958 }
 0x707   : > { %v1965_v61 = vsel %vm1398_vm3, %v1949_v43, %v1955_v44 }
 0x708   : > { %v1967_v63 = vsel %vm1966_vm6, %v1965_v61, %v1959_v60 }
 0x70a   : > { %v1963_v62 = vpop.permute.xlu0 %1962 }
 0x70b   : > { %v1969_v47 = vsel %vm1968_vm7, %v1967_v63, %v1963_v62 }
 0x70c   : > { %v1970_v45 = vpack.c.bf16 %v1969_v47, %v1969_v47 }
 0x70e   : > { %2677 = vmatmul.mubr.msk.bf16.vlgmr.msra.gmra.mrb[12].mxu0 %vm838_vm1, %v1970_v45 }
 0x70f   : > { %2708 = vmatprep.mubr.msk.bf16.mxu0 %vm2864_vm2, %v2863_v57  ;;  %2693 = vmatpush3.bf16.msra.mxu0 %v2786_v14 }
 0x710   : > { %2694 = vmatprep.subr.bf16.mxu0 %v2863_v57 }
 0x713   : > { %2695 = vmatpush3.bf16.msra.mxu0 %v2787_v28 }
 0x714   : > { %2696 = vmatprep.subr.bf16.mxu0 %v2863_v57 }
 0x717   : > { %2697 = vmatpush3.bf16.msra.mxu0 %v2788_v34 }
 0x718   : > { %2698 = vmatprep.subr.bf16.mxu0 %v2863_v57 }
 0x71b   : > { %2699 = vmatpush3.bf16.msra.mxu0 %v2789_v29 }
 0x71c   : > { %2700 = vmatprep.subr.bf16.mxu0 %v2863_v57 }
 0x71f   : > { %2701 = vmatpush3.bf16.msra.mxu0 %v2790_v32 }
 0x720   : > { %2702 = vmatprep.subr.bf16.mxu0 %v2863_v57 }
 0x723   : > { %2703 = vmatpush3.bf16.msra.mxu0 %v2791_v38 }
 0x724   : > { %2704 = vmatprep.subr.bf16.mxu0 %v2863_v57 }
 0x727   : > { %2705 = vmatpush3.bf16.msra.mxu0 %v2792_v39 }
 0x728   : > { %2706 = vmatprep.subr.bf16.mxu0 %v2863_v57 }
 0x72b   : > { %2707 = vmatpush3.bf16.msra.mxu0 %v2793_v41 }
 0x7e1   : > { %v2047_v46 = vpop.f32.mrb[12].mxu0 }
 0x7e2   : > { %v2048_v1 = vadd.f32 %v2554_v0, %v2047_v46  ;;  %v2678_v2 = vpop.f32.mrb[13].mxu0 }
 0x7e3   : > { %v2050_v3 = vpop.f32.mrb[14].mxu0 }
 0x7e4   : > { %v2679_v4 = vpop.f32.mrb[15].mxu0  ;;  %v2053_v49 = vadd.f32 %v2048_v1, %v3081_v25  ;;  %v2784_v25 = vld [vmem:[%s3032_s5 + $0x10] sm:$0xff]   ;;  %v2577_v3 = vld [vmem:[%s730_s2] ss:$0 sm:$0xff] }
 0x7e5   : > { %2685 = vmatpush3.bf16.msra.mxu1 %v2784_v25 }
 0x7e6   : > { %v2056_v5 = vsel %vm838_vm1, %v2053_v49, 0.0  ;;  %2686 = vmatprep.subr.bf16.mxu1 %v2863_v57 }
 0x7e7   : > { %2057 = vadd.xlane.f32.xlu1 %v2056_v5 }
 0x7e9   : > { %2687 = vmatpush3.bf16.msra.mxu1 %v2785_v13 }
 0x874   : > { %v2058_v6 = vpop.xlane.xlu1 %2057 }
 0x875   : > { %v2060_v7 = vmul.f32 0.015625, %v2058_v6 }
 0x877   : > { %v2061_v8 = vsub.f32 %v2053_v49, %v2060_v7  ;;  %v2578_v49 = vld [vmem:[%s733_s21] ss:$0 sm:$0xff] }
 0x879   : > { %v2062_v9 = vmul.f32 %v2061_v8, %v2061_v8 }
 0x87b   : > { %v2063_v10 = vsel %vm838_vm1, %v2062_v9, 0.0 }
 0x87c   : > { %2064 = vadd.xlane.f32.xlu0 %v2063_v10 }
 0x909   : > { %v2065_v15 = vpop.xlane.xlu0 %2064 }
 0x90a   : > { %v2066_v16 = vmul.f32 0.015625, %v2065_v15 }
 0x90c   : > { %v2067_v17 = vadd.f32 1e-12, %v2066_v16 }
 0x90e   : > { %2810 = vrsqrt.f32 %v2067_v17 }
 0x918   : > { %v2811_v19 = vpop.eup %2810 }
 0x919   : > { %v2069_v21 = vmul.f32 %v2811_v19, %v2061_v8 }
 0x91b   : > { %v2076_v23 = vmul.f32 %v2560_v20, %v2069_v21 }
 0x91d   : > { %v2083_v24 = vadd.f32 %v2561_v22, %v2076_v23 }
 0x91f   : > { %v2084_v26 = vpack.c.bf16 %v2083_v24, %v2083_v24 }
 0x921   : > { %2689 = vmatmul.mubr.msk.bf16.vlgmr.msra.gmra.mrb[24].mxu1 %vm838_vm1, %v2084_v26 }
 0x9f4   : > { %v2161_v48 = vpop.f32.mrb[24].mxu1 }
 0x9f5   : > { %v2162_v50 = vadd.f32 %v2562_v42, %v2161_v48  ;;  %v2690_v51 = vpop.f32.mrb[25].mxu1 }
 0x9f6   : > { %v2164_v52 = vpop.f32.mrb[26].mxu1 }
 0x9f7   : > { %v2168_v53 = vmul.f32 0.044715, %v2162_v50  ;;  %v2691_v54 = vpop.f32.mrb[27].mxu1  ;;  %v2167_v57 = vmul.f32 0.5, %v2162_v50 }
 0x9f9   : > { %v2169_v55 = vmul.f32 %v2168_v53, %v2162_v50 }
 0x9fb   : > { %v2170_v56 = vmul.f32 %v2169_v55, %v2162_v50 }
 0x9fd   : > { %v2171_v58 = vadd.f32 %v2170_v56, %v2162_v50 }
 0x9ff   : > { %v2172_v59 = vmul.f32 0.7978846, %v2171_v58 }
 0xa01   : > { %2812 = vtanh.f32 %v2172_v59 }
 0xa0b   : > { %v2813_v31 = vpop.eup %2812 }
 0xa0c   : > { %v2174_v33 = vadd.f32 1.0, %v2813_v31 }
 0xa0e   : > { %v2175_v27 = vmul.f32 %v2174_v33, %v2167_v57 }
 0xa10   : > { %v2176_v18 = vpack.c.bf16 %v2175_v27, %v2175_v27 }
 0xa12   : > { %2709 = vmatmul.mubr.bf16.vlgmr.msra.gmra.mrb[16].mxu0 %v2176_v18 }
 0xae5   : > { %v2282_v30 = vpop.f32.mrb[16].mxu0 }
 0xae6   : > { %v2283_v36 = vadd.f32 %v2568_v35, %v2282_v30  ;;  %v2710_v37 = vpop.f32.mrb[17].mxu0 }
 0xae7   : > { %v2285_v40 = vpop.f32.mrb[18].mxu0 }
 0xae8   : > { %v2711_v43 = vpop.f32.mrb[19].mxu0  ;;  %v2288_v44 = vadd.f32 %v2283_v36, %v2083_v24 }
 0xaea   : > { %v2291_v60 = vsel %vm838_vm1, %v2288_v44, 0.0 }
 0xaeb   : > { %2292 = vadd.xlane.f32.xlu0 %v2291_v60 }
 0xb78   : > { %v2293_v61 = vpop.xlane.xlu0 %2292 }
 0xb79   : > { %v2294_v62 = vmul.f32 0.015625, %v2293_v61 }
 0xb7b   : > { %v2295_v63 = vsub.f32 %v2288_v44, %v2294_v62 }
 0xb7d   : > { %v2296_v47 = vmul.f32 %v2295_v63, %v2295_v63 }
 0xb7f   : > { %v2297_v45 = vsel %vm838_vm1, %v2296_v47, 0.0 }
 0xb80   : > { %2298 = vadd.xlane.f32.xlu1 %v2297_v45 }
 0xc0d   : > { %v2299_v0 = vpop.xlane.xlu1 %2298 }
 0xc0e   : > { %v2300_v46 = vmul.f32 0.015625, %v2299_v0 }
 0xc10   : > { %v2301_v1 = vadd.f32 1e-12, %v2300_v46 }
 0xc12   : > { %2814 = vrsqrt.f32 %v2301_v1 }
 0xc1c   : > { %v2815_v2 = vpop.eup %2814 }
 0xc1d   : > { %v2303_v4 = vmul.f32 %v2815_v2, %v2295_v63 }
 0xc1f   : > { %v2310_v5 = vmul.f32 %v2577_v3, %v2303_v4 }
 0xc21   : > { %v2317_v6 = vadd.f32 %v2578_v49, %v2310_v5 }
 0xc23   : > { %2318 = vst.msk [vmem:[%s3058_s6] sm:$0xff] %vm838_vm1, %v2317_v6 }
 0xc24 PF: > { %s3442_s22 = sld [smem:[#allocation5_spill]]  ;;  %s3443_s21 = sld [smem:[#allocation3_spill]] }
 0xc25   : > { %s3445_s23 = sld [smem:[#allocation6_spill]]  ;;  %s3446_s24 = sld [smem:[#allocation7_spill]] }
 0xc2a   : > { %s26_s25 = sadd.s32 1, %s3442_s22   ;;  %s3444_s22 = sld [smem:[#allocation4_spill]] }
 0xc2b   : > { %p23_p8 = scmp.ge.s32.totalorder %s26_s25, 6  }
 0xc2d   :  { %25 = sbr.rel (!%p23_p8) target bundleno = 9 (0x9), region = 157 }

// kernel: bert_ner_forward.3
= control target key start
LH: loop header
LB: loop body
LE: loop exit
PB: predicated region body
PF: predicated region fallthrough
CT: control target
= control target key end

     0   :  { %v2807_v0 = vmov 0.0   ;;  %vm2808_vm0 = vmmov 0   ;;  %vm69_vm1 = vcmask 523264   ;;  %v2809_v16 = vmov 0   ;;  %s2811_s8 = smov 32   ;;  %s3385_s1 = inlined_call_operand.vmem [shape: bf16[2,64,128], index: 1, kind: input, shape index: {}]   ;;  %s3386_s0 = inlined_call_operand.vmem [shape: f32[16,64], index: 0, kind: input, shape index: {}]   ;;  %s3387_s2 = inlined_call_operand.vmem [shape: bf16[2,32,128], index: 2, kind: input, shape index: {}]   ;;  %s3388_s3 = inlined_call_operand.vmem [shape: f32[2,1,128], index: 3, kind: input, shape index: {}]   ;;  %s3389_s4 = inlined_call_operand.vmem [shape: bf16[32,128], index: 4, kind: input, shape index: {}]   ;;  %s3390_s5 = inlined_call_operand.vmem [shape: bf16[32,128], index: 5, kind: input, shape index: {}]   ;;  %s3391_s7 = inlined_call_operand.vmem [shape: f32[16,128], index: 7, kind: output, shape index: {}]   ;;  %s3392_s6 = inlined_call_operand.vmem [shape: f32[1,128], index: 6, kind: input, shape index: {}]  }
   0x1   :  { %2370 = vmatprep.subr.bf16.mxu0 %v2807_v0  ;;  %2382 = vmatprep.subr.bf16.mxu1 %v2807_v0  ;;  %v2655_v1 = vld [vmem:[%s3385_s1] sm:$0xff]   ;;  %v2657_v3 = vld [vmem:[%s3385_s1 + $0x8] sm:$0xff]   ;;  %v2659_v5 = vld [vmem:[%s3385_s1 + $0x10] sm:$0xff]   ;;  %vm225_vm2 = vcmask 261120  }
   0x2   :  { %v2656_v2 = vld [vmem:[%s3385_s1 + $0x20] sm:$0xff]   ;;  %2378 = vmatprep.mubr.msk.bf16.mxu0 %vm2808_vm0, %v2807_v0  ;;  %2390 = vmatprep.mubr.msk.bf16.mxu1 %vm2808_vm0, %v2807_v0  ;;  %v2658_v4 = vld [vmem:[%s3385_s1 + $0x28] sm:$0xff]   ;;  %v2660_v6 = vld [vmem:[%s3385_s1 + $0x30] sm:$0xff]  }
   0x3   :  { %2371 = vmatpush3.bf16.msra.mxu0 %v2655_v1  ;;  %2383 = vmatpush3.bf16.msra.mxu1 %v2656_v2  ;;  %v2661_v7 = vld [vmem:[%s3385_s1 + $0x18] sm:$0xff]   ;;  %v27_v8 = vld [vmem:[%s3386_s0] sm:$0xff]  ;;  %v28_v9 = vld [vmem:[%s3386_s0 + $0x8] sm:$0xff] }
   0x4   :  { %2372 = vmatprep.subr.bf16.mxu0 %v2807_v0  ;;  %2384 = vmatprep.subr.bf16.mxu1 %v2807_v0  ;;  %v2662_v10 = vld [vmem:[%s3385_s1 + $0x38] sm:$0xff]   ;;  %v29_v11 = vpack.c.bf16 %v28_v9, %v27_v8  ;;  %v2897_v12 = vld [vmem:[%s3387_s2] sm:$0xff]   ;;  %v2903_v13 = vld [vmem:[%s3387_s2 + $0x10] sm:$0xff]  }
   0x5   :  { %v2910_v14 = vld [vmem:[%s3387_s2 + $0x8] sm:$0xff]   ;;  %v2917_v15 = vld [vmem:[%s3387_s2 + $0x18] sm:$0xff]   ;;  %v2199_v17 = vld [vmem:[%s3388_s3 + $0x1] ss:$0 sm:$0xff] }
   0x6   :  { %v2184_v21 = vld [vmem:[%s3388_s3] ss:$0 sm:$0xff]  ;;  %s2810_s3 = smov 64   ;;  %v2966_v1 = vld [vmem:[%s3389_s4 + $0x8] sm:$0xff]  }
   0x7   :  { %2373 = vmatpush3.bf16.msra.mxu0 %v2657_v3  ;;  %2385 = vmatpush3.bf16.msra.mxu1 %v2658_v4  ;;  %v2961_v62 = vld [vmem:[%s3389_s4] sm:$0xff]   ;;  %v2984_v4 = vld [vmem:[%s3390_s5 + $0x8] sm:$0xff]  }
   0x8   :  { %2374 = vmatprep.subr.bf16.mxu0 %v2807_v0  ;;  %2386 = vmatprep.subr.bf16.mxu1 %v2807_v0  ;;  %v2973_v2 = vld [vmem:[%s3390_s5] sm:$0xff]  }
   0xb   :  { %2375 = vmatpush3.bf16.msra.mxu0 %v2659_v5  ;;  %2387 = vmatpush3.bf16.msra.mxu1 %v2660_v6 }
   0xc   :  { %2376 = vmatprep.subr.bf16.mxu0 %v2807_v0  ;;  %2388 = vmatprep.subr.bf16.mxu1 %v2807_v0 }
   0xf   :  { %2377 = vmatpush3.bf16.msra.mxu0 %v2661_v7  ;;  %2389 = vmatpush3.bf16.msra.mxu1 %v2662_v10 }
  0x10   :  { %2394 = vmatprep.subr.bf16.mxu0 %v2807_v0  ;;  %2402 = vmatprep.subr.bf16.mxu1 %v2807_v0 }
  0x12   :  { %2379 = vmatmul.mubr.msk.bf16.vlgmr.msra.gmra.mrb[0].mxu0 %vm69_vm1, %v29_v11  ;;  %2391 = vmatmul.mubr.msk.bf16.vlgmr.msra.gmra.mrb[0].mxu1 %vm69_vm1, %v29_v11 }
  0x13   :  { %2395 = vmatpush3.bf16.msra.mxu0 %v2897_v12  ;;  %2403 = vmatpush3.bf16.msra.mxu1 %v2903_v13 }
  0x14   :  { %2396 = vmatprep.subr.bf16.mxu0 %v2807_v0  ;;  %2404 = vmatprep.subr.bf16.mxu1 %v2807_v0 }
  0x15   :  { %2398 = vmatprep.mubr.msk.bf16.mxu0 %vm2808_vm0, %v2807_v0  ;;  %2406 = vmatprep.mubr.msk.bf16.mxu1 %vm2808_vm0, %v2807_v0 }
  0x17   :  { %2397 = vmatpush3.bf16.msra.mxu0 %v2910_v14  ;;  %2405 = vmatpush3.bf16.msra.mxu1 %v2917_v15 }
  0x18   :  { %2410 = vmatprep.subr.bf16.mxu0 %v2807_v0  ;;  %2418 = vmatprep.subr.bf16.mxu1 %v2807_v0 }
  0x1a   :  { %2399 = vmatmul.mubr.bf16.vlgmr.msra.gmra.mrb[4].mxu0 %v2809_v16  ;;  %2407 = vmatmul.mubr.bf16.vlgmr.msra.gmra.mrb[4].mxu1 %v2809_v16 }
  0x1b   :  { %2414 = vmatprep.mubr.msk.bf16.mxu0 %vm2808_vm0, %v2807_v0  ;;  %2422 = vmatprep.mubr.msk.bf16.mxu1 %vm2808_vm0, %v2807_v0 }
  0x1c   :  { %2411 = vmatpush3.bf16.msra.mxu0 %v2961_v62  ;;  %2419 = vmatpush3.bf16.msra.mxu1 %v2973_v2 }
  0x1d   :  { %2412 = vmatprep.subr.bf16.mxu0 %v2807_v0  ;;  %2420 = vmatprep.subr.bf16.mxu1 %v2807_v0 }
  0x20   :  { %2413 = vmatpush3.bf16.msra.mxu0 %v2966_v1  ;;  %2421 = vmatpush3.bf16.msra.mxu1 %v2984_v4 }
  0x21   :  { %2426 = vmatprep.subr.bf16.mxu0 %v2807_v0  ;;  %2434 = vmatprep.subr.bf16.mxu1 %v2807_v0 }
  0xe5   :  { %v107_v18 = vpop.f32.mrb[0].mxu0  ;;  %v189_v19 = vpop.f32.mrb[0].mxu1 }
  0xe6   :  { %v2380_v20 = vpop.f32.mrb[1].mxu0  ;;  %v2938_v22 = vadd.f32 %v2199_v17, %v189_v19  ;;  %v2392_v23 = vpop.f32.mrb[1].mxu1  ;;  %v2942_v29 = vadd.f32 %v2184_v21, %v107_v18 }
  0xe7   :  { %v110_v24 = vpop.f32.mrb[2].mxu0  ;;  %v192_v26 = vpop.f32.mrb[2].mxu1 }
  0xe8   :  { %v2940_v25 = vadd.f32 %v2184_v21, %v110_v24  ;;  %v2381_v27 = vpop.f32.mrb[3].mxu0  ;;  %v2393_v28 = vpop.f32.mrb[3].mxu1  ;;  %v2945_v34 = vadd.f32 %v2199_v17, %v192_v26 }
  0xed   :  { %v263_v30 = vpop.f32.mrb[4].mxu0  ;;  %v340_v32 = vpop.f32.mrb[4].mxu1 }
  0xee   :  { %v269_v31 = vadd.f32 %v263_v30, %v2942_v29  ;;  %v2400_v33 = vpop.f32.mrb[5].mxu0  ;;  %v347_v35 = vrot.slane %v340_v32, 2  ;;  %v2408_v36 = vpop.f32.mrb[5].mxu1 }
  0xef   :  { %v266_v37 = vpop.f32.mrb[6].mxu0  ;;  %v343_v38 = vpop.f32.mrb[6].mxu1 }
  0xf0   :  { %2671 = vtanh.f32 %v269_v31  ;;  %v2401_v39 = vpop.f32.mrb[7].mxu0  ;;  %v349_v40 = vadd.f32 %v347_v35, %v2945_v34  ;;  %v2409_v41 = vpop.f32.mrb[7].mxu1  ;;  %v2211_v44 = vmul.f32 -1.442695, %v269_v31 }
  0xf2   :  { %2673 = vtanh.f32 %v349_v40  ;;  %v2214_v45 = vmul.f32 -1.442695, %v349_v40 }
  0xf3   :  { %2675 = vpow2.f32 %v2211_v44 }
  0xf4   :  { %2677 = vpow2.f32 %v2214_v45 }
  0xfa   :  { %v2672_v42 = vpop.eup %2671 }
  0xfb   :  { %279 = vrot.lane.b32.xlu0 %v2672_v42, %s2810_s3 }
  0xfc   :  { %v2674_v43 = vpop.eup %2673 }
  0xfd   :  { %v2676_v46 = vpop.eup %2675 }
  0xfe   :  { %v273_v47 = vadd.f32 1.0, %v2676_v46  ;;  %v2678_v48 = vpop.eup %2677 }
  0xff   :  { %359 = vrot.lane.b32.xlu0 %v2674_v43, %s2810_s3  ;;  %v353_v49 = vadd.f32 1.0, %v2678_v48 }
 0x100   :  { %2679 = vrcp.f32 %v273_v47 }
 0x101   :  { %2681 = vrcp.f32 %v353_v49 }
 0x10a   :  { %v2680_v50 = vpop.eup %2679 }
 0x10b   :  { %v2682_v53 = vpop.eup %2681  ;;  %v277_v56 = vmul.f32 0.0, %v2680_v50 }
 0x10c   :  { %v357_v59 = vmul.f32 0.0, %v2682_v53 }
 0x16d   :  { %v280_v51 = vpop.permute.xlu0 %279 }
 0x16e   :  { %v282_v52 = vmul.f32 %v2680_v50, %v280_v51 }
 0x170   :  { %284 = vrot.lane.b32.xlu1 %v282_v52, %s2811_s8 }
 0x171   :  { %v360_v54 = vpop.permute.xlu0 %359 }
 0x172   :  { %v362_v55 = vmul.f32 %v2682_v53, %v360_v54 }
 0x174   :  { %364 = vrot.lane.b32.xlu1 %v362_v55, %s2811_s8 }
 0x1e2   :  { %v285_v57 = vpop.permute.xlu1 %284 }
 0x1e3   :  { %v2952_v58 = vadd.f32 %v285_v57, %v277_v56 }
 0x1e5   :  { %2683 = vtanh.f32 %v2952_v58  ;;  %v547_v56 = vrot.slane %v2952_v58, 6 }
 0x1e6   :  { %v365_v60 = vpop.permute.xlu1 %364 }
 0x1e7   :  { %v2955_v61 = vadd.f32 %v365_v60, %v357_v59 }
 0x1e9   :  { %2685 = vtanh.f32 %v2955_v61 }
 0x1ef   :  { %v2684_v63 = vpop.eup %2683 }
 0x1f0   :  { %290 = vrot.lane.b32.xlu0 %v2684_v63, %s2810_s3  ;;  %v618_v63 = vrot.slane %v2955_v61, 2 }
 0x1f3   :  { %v2686_v3 = vpop.eup %2685 }
 0x1f4   :  { %370 = vrot.lane.b32.xlu1 %v2686_v3, %s2810_s3 }
 0x262   :  { %v291_v5 = vpop.permute.xlu0 %290 }
 0x263   :  { %v293_v6 = vmul.f32 %v2680_v50, %v291_v5 }
 0x265   :  { %v374_v7 = vpack.c.bf16 %v293_v6, %v293_v6 }
 0x266   :  { %v371_v8 = vpop.permute.xlu1 %370 }
 0x267   :  { %v373_v9 = vmul.f32 %v2682_v53, %v371_v8  ;;  %376 = vrot.lane.b32.xlu0 %v374_v7, %s2811_s8 }
 0x269   :  { %v434_v10 = vpack.c.bf16 %v373_v9, %v373_v9 }
 0x26b   :  { %v436_v11 = vrot.slane %v434_v10, 3 }
 0x26d   :  { %437 = vrot.lane.b32.xlu1 %v436_v11, %s2811_s8 }
 0x2d9   :  { %v377_v16 = vpop.permute.xlu0 %376 }
 0x2da   :  { %2415 = vmatmul.mubr.msk.bf16.vlgmr.msra.gmra.mrb[8].mxu0 %vm225_vm2, %v377_v16 }
 0x2db   :  { %2427 = vmatpush3.bf16.msra.mxu0 %v2897_v12  ;;  %2430 = vmatprep.mubr.msk.bf16.mxu0 %vm2808_vm0, %v2807_v0 }
 0x2dc   :  { %2428 = vmatprep.subr.bf16.mxu0 %v2807_v0 }
 0x2df   :  { %v438_v17 = vpop.permute.xlu1 %437  ;;  %2429 = vmatpush3.bf16.msra.mxu0 %v2910_v14 }
 0x2e0   :  { %2423 = vmatmul.mubr.msk.bf16.vlgmr.msra.gmra.mrb[8].mxu1 %vm225_vm2, %v438_v17  ;;  %2442 = vmatprep.subr.bf16.mxu0 %v2807_v0 }
 0x2e1   :  { %2435 = vmatpush3.bf16.msra.mxu1 %v2903_v13  ;;  %2438 = vmatprep.mubr.msk.bf16.mxu1 %vm2808_vm0, %v2807_v0 }
 0x2e2   :  { %2431 = vmatmul.mubr.msk.bf16.vlgmr.msra.gmra.mrb[12].mxu0 %vm225_vm2, %v377_v16  ;;  %2436 = vmatprep.subr.bf16.mxu1 %v2807_v0 }
 0x2e3   :  { %2443 = vmatpush3.bf16.msra.mxu0 %v2961_v62  ;;  %2446 = vmatprep.mubr.msk.bf16.mxu0 %vm2808_vm0, %v2807_v0 }
 0x2e4   :  { %2444 = vmatprep.subr.bf16.mxu0 %v2807_v0 }
 0x2e5   :  { %2437 = vmatpush3.bf16.msra.mxu1 %v2917_v15 }
 0x2e6   :  { %2450 = vmatprep.subr.bf16.mxu1 %v2807_v0 }
 0x2e7   :  { %2445 = vmatpush3.bf16.msra.mxu0 %v2966_v1 }
 0x2e8   :  { %2439 = vmatmul.mubr.msk.bf16.vlgmr.msra.gmra.mrb[12].mxu1 %vm225_vm2, %v438_v17  ;;  %2458 = vmatprep.subr.bf16.mxu0 %v2807_v0 }
 0x2e9   :  { %2451 = vmatpush3.bf16.msra.mxu1 %v2973_v2  ;;  %2454 = vmatprep.mubr.msk.bf16.mxu1 %vm2808_vm0, %v2807_v0 }
 0x2ea   :  { %2452 = vmatprep.subr.bf16.mxu1 %v2807_v0 }
 0x2ed   :  { %2453 = vmatpush3.bf16.msra.mxu1 %v2984_v4 }
 0x2ee   :  { %2466 = vmatprep.subr.bf16.mxu1 %v2807_v0 }
 0x3ad   :  { %v427_v18 = vpop.f32.mrb[8].mxu0 }
 0x3ae   :  { %433 = vst [vmem:[%s3391_s7] sm:$0x3] %v427_v18  ;;  %v2416_v19 = vpop.f32.mrb[9].mxu0 }
 0x3af   :  { %v430_v20 = vpop.f32.mrb[10].mxu0 }
 0x3b0   :  { %v2417_v21 = vpop.f32.mrb[11].mxu0 }
 0x3b3   :  { %v488_v23 = vpop.f32.mrb[8].mxu1 }
 0x3b4   :  { %494 = vst [vmem:[#allocation2 + $0xe] sm:$0x3] %v488_v23  ;;  %v2424_v24 = vpop.f32.mrb[9].mxu1 }
 0x3b5   :  { %v491_v26 = vpop.f32.mrb[10].mxu1  ;;  %v529_v27 = vpop.f32.mrb[12].mxu0 }
 0x3b6   :  { %v536_v28 = vrot.slane %v529_v27, 6  ;;  %v2425_v30 = vpop.f32.mrb[11].mxu1  ;;  %v2432_v31 = vpop.f32.mrb[13].mxu0 }
 0x3b7   :  { %v532_v32 = vpop.f32.mrb[14].mxu0 }
 0x3b8   :  { %v538_v33 = vadd.f32 %v536_v28, %v2942_v29  ;;  %v2433_v35 = vpop.f32.mrb[15].mxu0 }
 0x3ba   :  { %2687 = vtanh.f32 %v538_v33  ;;  %v2222_v44 = vmul.f32 -1.442695, %v538_v33 }
 0x3bb   :  { %v600_v36 = vpop.f32.mrb[12].mxu1 }
 0x3bc   :  { %v607_v37 = vrot.slane %v600_v36, 4  ;;  %v2440_v38 = vpop.f32.mrb[13].mxu1 }
 0x3bd   :  { %v603_v39 = vpop.f32.mrb[14].mxu1 }
 0x3be   :  { %v609_v40 = vadd.f32 %v607_v37, %v2945_v34  ;;  %v2441_v41 = vpop.f32.mrb[15].mxu1 }
 0x3c0   :  { %2689 = vtanh.f32 %v609_v40  ;;  %v2224_v45 = vmul.f32 -1.442695, %v609_v40 }
 0x3c1   :  { %2691 = vpow2.f32 %v2222_v44 }
 0x3c2   :  { %2693 = vpow2.f32 %v2224_v45 }
 0x3c4   :  { %v2688_v42 = vpop.eup %2687 }
 0x3c5   :  { %551 = vrot.lane.b32.xlu0 %v2688_v42, %s2810_s3 }
 0x3ca   :  { %v2690_v43 = vpop.eup %2689 }
 0x3cb   :  { %622 = vrot.lane.b32.xlu1 %v2690_v43, %s2810_s3  ;;  %v2692_v46 = vpop.eup %2691 }
 0x3cc   :  { %v542_v47 = vadd.f32 1.0, %v2692_v46  ;;  %v2694_v48 = vpop.eup %2693 }
 0x3cd   :  { %v613_v49 = vadd.f32 1.0, %v2694_v48 }
 0x3ce   :  { %2695 = vrcp.f32 %v542_v47 }
 0x3cf   :  { %2697 = vrcp.f32 %v613_v49 }
 0x3d8   :  { %v2696_v50 = vpop.eup %2695 }
 0x3d9   :  { %v2698_v53 = vpop.eup %2697  ;;  %v549_v57 = vmul.f32 %v2696_v50, %v547_v56 }
 0x3da   :  { %v620_v3 = vmul.f32 %v2698_v53, %v618_v63 }
 0x437   :  { %v552_v51 = vpop.permute.xlu0 %551 }
 0x438   :  { %v554_v52 = vmul.f32 %v2696_v50, %v552_v51 }
 0x43a   :  { %556 = vrot.lane.b32.xlu0 %v554_v52, %s2811_s8 }
 0x43d   :  { %v623_v54 = vpop.permute.xlu1 %622 }
 0x43e   :  { %v625_v55 = vmul.f32 %v2698_v53, %v623_v54 }
 0x440   :  { %627 = vrot.lane.b32.xlu1 %v625_v55, %s2811_s8 }
 0x4ac   :  { %v557_v59 = vpop.permute.xlu0 %556 }
 0x4ad   :  { %v3028_v60 = vadd.f32 %v557_v59, %v549_v57 }
 0x4af   :  { %2699 = vtanh.f32 %v3028_v60  ;;  %v787_v63 = vrot.slane %v3028_v60, 6 }
 0x4b2   :  { %v628_v5 = vpop.permute.xlu1 %627 }
 0x4b3   :  { %v3032_v6 = vadd.f32 %v628_v5, %v620_v3 }
 0x4b5   :  { %2701 = vtanh.f32 %v3032_v6 }
 0x4b9   :  { %v2700_v7 = vpop.eup %2699 }
 0x4ba   :  { %562 = vrot.lane.b32.xlu0 %v2700_v7, %s2810_s3 }
 0x4bf   :  { %v2702_v8 = vpop.eup %2701 }
 0x4c0   :  { %633 = vrot.lane.b32.xlu1 %v2702_v8, %s2810_s3  ;;  %v858_v8 = vrot.slane %v3032_v6, 2 }
 0x52c   :  { %v563_v58 = vpop.permute.xlu0 %562 }
 0x52d   :  { %v565_v9 = vmul.f32 %v2696_v50, %v563_v58 }
 0x52f   :  { %v637_v10 = vpack.c.bf16 %v565_v9, %v565_v9 }
 0x531   :  { %v639_v11 = vrot.slane %v637_v10, 1 }
 0x532   :  { %v634_v16 = vpop.permute.xlu1 %633 }
 0x533   :  { %v636_v61 = vmul.f32 %v2698_v53, %v634_v16  ;;  %640 = vrot.lane.b32.xlu0 %v639_v11, %s2811_s8 }
 0x535   :  { %v686_v17 = vpack.c.bf16 %v636_v61, %v636_v61 }
 0x537   :  { %v688_v18 = vrot.slane %v686_v17, 2 }
 0x539   :  { %689 = vrot.lane.b32.xlu1 %v688_v18, %s2811_s8 }
 0x5a5   :  { %v641_v19 = vpop.permute.xlu0 %640 }
 0x5a6   :  { %2447 = vmatmul.mubr.msk.bf16.vlgmr.msra.gmra.mrb[16].mxu0 %vm225_vm2, %v641_v19 }
 0x5a7   :  { %2459 = vmatpush3.bf16.msra.mxu0 %v2897_v12  ;;  %2462 = vmatprep.mubr.msk.bf16.mxu0 %vm2808_vm0, %v2807_v0 }
 0x5a8   :  { %2460 = vmatprep.subr.bf16.mxu0 %v2807_v0 }
 0x5ab   :  { %v690_v20 = vpop.permute.xlu1 %689  ;;  %2461 = vmatpush3.bf16.msra.mxu0 %v2910_v14 }
 0x5ac   :  { %2455 = vmatmul.mubr.msk.bf16.vlgmr.msra.gmra.mrb[16].mxu1 %vm225_vm2, %v690_v20  ;;  %2474 = vmatprep.subr.bf16.mxu0 %v2807_v0 }
 0x5ad   :  { %2467 = vmatpush3.bf16.msra.mxu1 %v2903_v13  ;;  %2470 = vmatprep.mubr.msk.bf16.mxu1 %vm2808_vm0, %v2807_v0 }
 0x5ae   :  { %2463 = vmatmul.mubr.msk.bf16.vlgmr.msra.gmra.mrb[20].mxu0 %vm225_vm2, %v641_v19  ;;  %2468 = vmatprep.subr.bf16.mxu1 %v2807_v0 }
 0x5af   :  { %2475 = vmatpush3.bf16.msra.mxu0 %v2961_v62  ;;  %2478 = vmatprep.mubr.msk.bf16.mxu0 %vm2808_vm0, %v2807_v0 }
 0x5b0   :  { %2476 = vmatprep.subr.bf16.mxu0 %v2807_v0 }
 0x5b1   :  { %2469 = vmatpush3.bf16.msra.mxu1 %v2917_v15 }
 0x5b2   :  { %2482 = vmatprep.subr.bf16.mxu1 %v2807_v0 }
 0x5b3   :  { %2477 = vmatpush3.bf16.msra.mxu0 %v2966_v1 }
 0x5b4   :  { %2471 = vmatmul.mubr.msk.bf16.vlgmr.msra.gmra.mrb[20].mxu1 %vm225_vm2, %v690_v20  ;;  %2490 = vmatprep.subr.bf16.mxu0 %v2807_v0 }
 0x5b5   :  { %2483 = vmatpush3.bf16.msra.mxu1 %v2973_v2  ;;  %2486 = vmatprep.mubr.msk.bf16.mxu1 %vm2808_vm0, %v2807_v0 }
 0x5b6   :  { %2484 = vmatprep.subr.bf16.mxu1 %v2807_v0 }
 0x5b9   :  { %2485 = vmatpush3.bf16.msra.mxu1 %v2984_v4 }
 0x5ba   :  { %2498 = vmatprep.subr.bf16.mxu1 %v2807_v0 }
 0x679   :  { %v679_v21 = vpop.f32.mrb[16].mxu0 }
 0x67a   :  { %685 = vst [vmem:[%s3391_s7 + $0x2] sm:$0x3] %v679_v21  ;;  %v2448_v23 = vpop.f32.mrb[17].mxu0 }
 0x67b   :  { %v682_v24 = vpop.f32.mrb[18].mxu0 }
 0x67c   :  { %v2449_v26 = vpop.f32.mrb[19].mxu0 }
 0x67f   :  { %v728_v27 = vpop.f32.mrb[16].mxu1 }
 0x680   :  { %734 = vst [vmem:[#allocation2 + $0xc] sm:$0x3] %v728_v27  ;;  %v2456_v28 = vpop.f32.mrb[17].mxu1 }
 0x681   :  { %v731_v30 = vpop.f32.mrb[18].mxu1  ;;  %v769_v31 = vpop.f32.mrb[20].mxu0 }
 0x682   :  { %v776_v32 = vrot.slane %v769_v31, 4  ;;  %v2457_v33 = vpop.f32.mrb[19].mxu1  ;;  %v2464_v35 = vpop.f32.mrb[21].mxu0 }
 0x683   :  { %v772_v36 = vpop.f32.mrb[22].mxu0 }
 0x684   :  { %v778_v37 = vadd.f32 %v776_v32, %v2942_v29  ;;  %v2465_v38 = vpop.f32.mrb[23].mxu0 }
 0x686   :  { %2703 = vtanh.f32 %v778_v37  ;;  %v2228_v47 = vmul.f32 -1.442695, %v778_v37 }
 0x687   :  { %v840_v39 = vpop.f32.mrb[20].mxu1 }
 0x688   :  { %v847_v40 = vrot.slane %v840_v39, 6  ;;  %v2472_v41 = vpop.f32.mrb[21].mxu1 }
 0x689   :  { %v843_v42 = vpop.f32.mrb[22].mxu1 }
 0x68a   :  { %v849_v43 = vadd.f32 %v847_v40, %v2945_v34  ;;  %v2473_v44 = vpop.f32.mrb[23].mxu1 }
 0x68c   :  { %2705 = vtanh.f32 %v849_v43  ;;  %v2230_v48 = vmul.f32 -1.442695, %v849_v43 }
 0x68d   :  { %2707 = vpow2.f32 %v2228_v47 }
 0x68e   :  { %2709 = vpow2.f32 %v2230_v48 }
 0x690   :  { %v2704_v45 = vpop.eup %2703 }
 0x691   :  { %791 = vrot.lane.b32.xlu0 %v2704_v45, %s2810_s3 }
 0x696   :  { %v2706_v46 = vpop.eup %2705 }
 0x697   :  { %862 = vrot.lane.b32.xlu1 %v2706_v46, %s2810_s3  ;;  %v2708_v49 = vpop.eup %2707 }
 0x698   :  { %v782_v50 = vadd.f32 1.0, %v2708_v49  ;;  %v2710_v51 = vpop.eup %2709 }
 0x699   :  { %v853_v52 = vadd.f32 1.0, %v2710_v51 }
 0x69a   :  { %2711 = vrcp.f32 %v782_v50 }
 0x69b   :  { %2713 = vrcp.f32 %v853_v52 }
 0x6a4   :  { %v2712_v53 = vpop.eup %2711 }
 0x6a5   :  { %v2714_v56 = vpop.eup %2713  ;;  %v789_v3 = vmul.f32 %v2712_v53, %v787_v63 }
 0x6a6   :  { %v860_v58 = vmul.f32 %v2714_v56, %v858_v8 }
 0x703   :  { %v792_v54 = vpop.permute.xlu0 %791 }
 0x704   :  { %v794_v55 = vmul.f32 %v2712_v53, %v792_v54 }
 0x706   :  { %796 = vrot.lane.b32.xlu0 %v794_v55, %s2811_s8 }
 0x709   :  { %v863_v57 = vpop.permute.xlu1 %862 }
 0x70a   :  { %v865_v59 = vmul.f32 %v2714_v56, %v863_v57 }
 0x70c   :  { %867 = vrot.lane.b32.xlu1 %v865_v59, %s2811_s8 }
 0x778   :  { %v797_v5 = vpop.permute.xlu0 %796 }
 0x779   :  { %v3077_v7 = vadd.f32 %v797_v5, %v789_v3 }
 0x77b   :  { %2715 = vtanh.f32 %v3077_v7  ;;  %v1027_v63 = vrot.slane %v3077_v7, 6 }
 0x77e   :  { %v868_v9 = vpop.permute.xlu1 %867 }
 0x77f   :  { %v3081_v10 = vadd.f32 %v868_v9, %v860_v58 }
 0x781   :  { %2717 = vtanh.f32 %v3081_v10  ;;  %v1095_v8 = vrot.slane %v3081_v10, 2 }
 0x785   :  { %v2716_v11 = vpop.eup %2715 }
 0x786   :  { %802 = vrot.lane.b32.xlu0 %v2716_v11, %s2810_s3 }
 0x78b   :  { %v2718_v16 = vpop.eup %2717 }
 0x78c   :  { %873 = vrot.lane.b32.xlu1 %v2718_v16, %s2810_s3 }
 0x7f8   :  { %v803_v60 = vpop.permute.xlu0 %802 }
 0x7f9   :  { %v805_v61 = vmul.f32 %v2712_v53, %v803_v60 }
 0x7fb   :  { %v877_v17 = vpack.c.bf16 %v805_v61, %v805_v61 }
 0x7fd   :  { %v879_v18 = vrot.slane %v877_v17, 2 }
 0x7fe   :  { %v874_v19 = vpop.permute.xlu1 %873 }
 0x7ff   :  { %v876_v6 = vmul.f32 %v2714_v56, %v874_v19  ;;  %880 = vrot.lane.b32.xlu0 %v879_v18, %s2811_s8 }
 0x801   :  { %v926_v20 = vpack.c.bf16 %v876_v6, %v876_v6 }
 0x803   :  { %v928_v21 = vrot.slane %v926_v20, 1 }
 0x805   :  { %929 = vrot.lane.b32.xlu1 %v928_v21, %s2811_s8 }
 0x871   :  { %v881_v23 = vpop.permute.xlu0 %880 }
 0x872   :  { %2479 = vmatmul.mubr.msk.bf16.vlgmr.msra.gmra.mrb[24].mxu0 %vm225_vm2, %v881_v23 }
 0x873   :  { %2491 = vmatpush3.bf16.msra.mxu0 %v2897_v12  ;;  %2494 = vmatprep.mubr.msk.bf16.mxu0 %vm2808_vm0, %v2807_v0 }
 0x874   :  { %2492 = vmatprep.subr.bf16.mxu0 %v2807_v0 }
 0x877   :  { %v930_v24 = vpop.permute.xlu1 %929  ;;  %2493 = vmatpush3.bf16.msra.mxu0 %v2910_v14 }
 0x878   :  { %2487 = vmatmul.mubr.msk.bf16.vlgmr.msra.gmra.mrb[24].mxu1 %vm225_vm2, %v930_v24  ;;  %2506 = vmatprep.subr.bf16.mxu0 %v2807_v0 }
 0x879   :  { %2499 = vmatpush3.bf16.msra.mxu1 %v2903_v13  ;;  %2502 = vmatprep.mubr.msk.bf16.mxu1 %vm2808_vm0, %v2807_v0 }
 0x87a   :  { %2495 = vmatmul.mubr.msk.bf16.vlgmr.msra.gmra.mrb[28].mxu0 %vm225_vm2, %v881_v23  ;;  %2500 = vmatprep.subr.bf16.mxu1 %v2807_v0 }
 0x87b   :  { %2507 = vmatpush3.bf16.msra.mxu0 %v2961_v62  ;;  %2510 = vmatprep.mubr.msk.bf16.mxu0 %vm2808_vm0, %v2807_v0 }
 0x87c   :  { %2508 = vmatprep.subr.bf16.mxu0 %v2807_v0 }
 0x87d   :  { %2501 = vmatpush3.bf16.msra.mxu1 %v2917_v15 }
 0x87e   :  { %2514 = vmatprep.subr.bf16.mxu1 %v2807_v0 }
 0x87f   :  { %2509 = vmatpush3.bf16.msra.mxu0 %v2966_v1 }
 0x880   :  { %2503 = vmatmul.mubr.msk.bf16.vlgmr.msra.gmra.mrb[28].mxu1 %vm225_vm2, %v930_v24  ;;  %2522 = vmatprep.subr.bf16.mxu0 %v2807_v0 }
 0x881   :  { %2515 = vmatpush3.bf16.msra.mxu1 %v2973_v2  ;;  %2518 = vmatprep.mubr.msk.bf16.mxu1 %vm2808_vm0, %v2807_v0 }
 0x882   :  { %2516 = vmatprep.subr.bf16.mxu1 %v2807_v0 }
 0x885   :  { %2517 = vmatpush3.bf16.msra.mxu1 %v2984_v4 }
 0x886   :  { %2530 = vmatprep.subr.bf16.mxu1 %v2807_v0 }
 0x945   :  { %v919_v26 = vpop.f32.mrb[24].mxu0 }
 0x946   :  { %925 = vst [vmem:[%s3391_s7 + $0x4] sm:$0x3] %v919_v26  ;;  %v2480_v27 = vpop.f32.mrb[25].mxu0 }
 0x947   :  { %v922_v28 = vpop.f32.mrb[26].mxu0 }
 0x948   :  { %v2481_v30 = vpop.f32.mrb[27].mxu0 }
 0x94b   :  { %v968_v31 = vpop.f32.mrb[24].mxu1 }
 0x94c   :  { %974 = vst [vmem:[#allocation2 + $0xa] sm:$0x3] %v968_v31  ;;  %v2488_v32 = vpop.f32.mrb[25].mxu1 }
 0x94d   :  { %v971_v33 = vpop.f32.mrb[26].mxu1  ;;  %v1009_v35 = vpop.f32.mrb[28].mxu0 }
 0x94e   :  { %v1016_v36 = vrot.slane %v1009_v35, 2  ;;  %v2489_v37 = vpop.f32.mrb[27].mxu1  ;;  %v2496_v38 = vpop.f32.mrb[29].mxu0 }
 0x94f   :  { %v1012_v39 = vpop.f32.mrb[30].mxu0 }
 0x950   :  { %v1018_v40 = vadd.f32 %v1016_v36, %v2942_v29  ;;  %v2497_v41 = vpop.f32.mrb[31].mxu0 }
 0x952   :  { %2719 = vtanh.f32 %v1018_v40  ;;  %v2234_v49 = vmul.f32 -1.442695, %v1018_v40 }
 0x953   :  { %v1080_v42 = vpop.f32.mrb[28].mxu1 }
 0x954   :  { %v1086_v43 = vadd.f32 %v1080_v42, %v2945_v34  ;;  %v2504_v44 = vpop.f32.mrb[29].mxu1 }
 0x955   :  { %v1083_v45 = vpop.f32.mrb[30].mxu1 }
 0x956   :  { %2721 = vtanh.f32 %v1086_v43  ;;  %v2505_v46 = vpop.f32.mrb[31].mxu1  ;;  %v2236_v50 = vmul.f32 -1.442695, %v1086_v43 }
 0x957   :  { %2723 = vpow2.f32 %v2234_v49 }
 0x958   :  { %2725 = vpow2.f32 %v2236_v50 }
 0x95c   :  { %v2720_v47 = vpop.eup %2719 }
 0x95d   :  { %1031 = vrot.lane.b32.xlu0 %v2720_v47, %s2810_s3 }
 0x960   :  { %v2722_v48 = vpop.eup %2721 }
 0x961   :  { %1099 = vrot.lane.b32.xlu1 %v2722_v48, %s2810_s3  ;;  %v2724_v29 = vpop.eup %2723 }
 0x962   :  { %v1022_v51 = vadd.f32 1.0, %v2724_v29  ;;  %v2726_v52 = vpop.eup %2725 }
 0x963   :  { %v1090_v53 = vadd.f32 1.0, %v2726_v52 }
 0x964   :  { %2727 = vrcp.f32 %v1022_v51 }
 0x965   :  { %2729 = vrcp.f32 %v1090_v53 }
 0x96e   :  { %v2728_v34 = vpop.eup %2727 }
 0x96f   :  { %v2730_v56 = vpop.eup %2729  ;;  %v1029_v3 = vmul.f32 %v2728_v34, %v1027_v63 }
 0x970   :  { %v1097_v9 = vmul.f32 %v2730_v56, %v1095_v8 }
 0x9cf   :  { %v1032_v54 = vpop.permute.xlu0 %1031 }
 0x9d0   :  { %v1034_v55 = vmul.f32 %v2728_v34, %v1032_v54 }
 0x9d2   :  { %1036 = vrot.lane.b32.xlu0 %v1034_v55, %s2811_s8 }
 0x9d3   :  { %v1100_v57 = vpop.permute.xlu1 %1099 }
 0x9d4   :  { %v1102_v59 = vmul.f32 %v2730_v56, %v1100_v57 }
 0x9d6   :  { %1104 = vrot.lane.b32.xlu1 %v1102_v59, %s2811_s8 }
 0xa44   :  { %v1037_v5 = vpop.permute.xlu0 %1036 }
 0xa45   :  { %v3127_v58 = vadd.f32 %v1037_v5, %v1029_v3 }
 0xa47   :  { %2731 = vtanh.f32 %v3127_v58  ;;  %v1260_v59 = vrot.slane %v3127_v58, 6 }
 0xa48   :  { %v1105_v11 = vpop.permute.xlu1 %1104 }
 0xa49   :  { %v3130_v16 = vadd.f32 %v1105_v11, %v1097_v9 }
 0xa4b   :  { %2733 = vtanh.f32 %v3130_v16  ;;  %v1331_v5 = vrot.slane %v3130_v16, 2 }
 0xa51   :  { %v2732_v60 = vpop.eup %2731 }
 0xa52   :  { %1042 = vrot.lane.b32.xlu0 %v2732_v60, %s2810_s3 }
 0xa55   :  { %v2734_v61 = vpop.eup %2733 }
 0xa56   :  { %1110 = vrot.lane.b32.xlu1 %v2734_v61, %s2810_s3 }
 0xac4   :  { %v1043_v7 = vpop.permute.xlu0 %1042 }
 0xac5   :  { %v1045_v17 = vmul.f32 %v2728_v34, %v1043_v7 }
 0xac7   :  { %v1114_v18 = vpack.c.bf16 %v1045_v17, %v1045_v17 }
 0xac8   :  { %v1111_v10 = vpop.permute.xlu1 %1110 }
 0xac9   :  { %v1116_v19 = vrot.slane %v1114_v18, 3  ;;  %v1113_v6 = vmul.f32 %v2730_v56, %v1111_v10 }
 0xacb   :  { %v1163_v20 = vpack.c.bf16 %v1113_v6, %v1113_v6  ;;  %1117 = vrot.lane.b32.xlu0 %v1116_v19, %s2811_s8 }
 0xacd   :  { %1165 = vrot.lane.b32.xlu1 %v1163_v20, %s2811_s8 }
 0xb3d   :  { %v1118_v21 = vpop.permute.xlu0 %1117 }
 0xb3e   :  { %2511 = vmatmul.mubr.msk.bf16.vlgmr.msra.gmra.mrb[32].mxu0 %vm225_vm2, %v1118_v21 }
 0xb3f   :  { %v1166_v23 = vpop.permute.xlu1 %1165  ;;  %2523 = vmatpush3.bf16.msra.mxu0 %v2897_v12  ;;  %2526 = vmatprep.mubr.msk.bf16.mxu0 %vm2808_vm0, %v2807_v0 }
 0xb40   :  { %2519 = vmatmul.mubr.msk.bf16.vlgmr.msra.gmra.mrb[32].mxu1 %vm225_vm2, %v1166_v23  ;;  %2524 = vmatprep.subr.bf16.mxu0 %v2807_v0 }
 0xb41   :  { %2531 = vmatpush3.bf16.msra.mxu1 %v2903_v13  ;;  %2534 = vmatprep.mubr.msk.bf16.mxu1 %vm2808_vm0, %v2807_v0 }
 0xb42   :  { %2532 = vmatprep.subr.bf16.mxu1 %v2807_v0 }
 0xb43   :  { %2525 = vmatpush3.bf16.msra.mxu0 %v2910_v14 }
 0xb44   :  { %2538 = vmatprep.subr.bf16.mxu0 %v2807_v0 }
 0xb45   :  { %2533 = vmatpush3.bf16.msra.mxu1 %v2917_v15 }
 0xb46   :  { %2527 = vmatmul.mubr.msk.bf16.vlgmr.msra.gmra.mrb[36].mxu0 %vm225_vm2, %v1118_v21  ;;  %2546 = vmatprep.subr.bf16.mxu1 %v2807_v0 }
 0xb47   :  { %2539 = vmatpush3.bf16.msra.mxu0 %v2961_v62  ;;  %2542 = vmatprep.mubr.msk.bf16.mxu0 %vm2808_vm0, %v2807_v0 }
 0xb48   :  { %2535 = vmatmul.mubr.msk.bf16.vlgmr.msra.gmra.mrb[36].mxu1 %vm225_vm2, %v1166_v23  ;;  %2540 = vmatprep.subr.bf16.mxu0 %v2807_v0 }
 0xb49   :  { %2547 = vmatpush3.bf16.msra.mxu1 %v2973_v2  ;;  %2550 = vmatprep.mubr.msk.bf16.mxu1 %vm2808_vm0, %v2807_v0 }
 0xb4a   :  { %2548 = vmatprep.subr.bf16.mxu1 %v2807_v0 }
 0xb4b   :  { %2541 = vmatpush3.bf16.msra.mxu0 %v2966_v1 }
 0xb4c   :  { %2554 = vmatprep.subr.bf16.mxu0 %v2807_v0 }
 0xb4d   :  { %2549 = vmatpush3.bf16.msra.mxu1 %v2984_v4 }
 0xb4e   :  { %2562 = vmatprep.subr.bf16.mxu1 %v2807_v0 }
 0xc11   :  { %v1156_v24 = vpop.f32.mrb[32].mxu0 }
 0xc12   :  { %1162 = vst [vmem:[%s3391_s7 + $0x6] sm:$0x3] %v1156_v24  ;;  %v2512_v26 = vpop.f32.mrb[33].mxu0 }
 0xc13   :  { %v1159_v27 = vpop.f32.mrb[34].mxu0  ;;  %v1204_v28 = vpop.f32.mrb[32].mxu1 }
 0xc14   :  { %1210 = vst [vmem:[#allocation2 + $0x8] sm:$0x3] %v1204_v28  ;;  %v2513_v30 = vpop.f32.mrb[35].mxu0  ;;  %v2520_v31 = vpop.f32.mrb[33].mxu1 }
 0xc15   :  { %v1207_v32 = vpop.f32.mrb[34].mxu1 }
 0xc16   :  { %v2521_v33 = vpop.f32.mrb[35].mxu1 }
 0xc19   :  { %v1245_v35 = vpop.f32.mrb[36].mxu0 }
 0xc1a   :  { %v1251_v36 = vadd.f32 %v1245_v35, %v2940_v25  ;;  %v2528_v37 = vpop.f32.mrb[37].mxu0 }
 0xc1b   :  { %v1248_v38 = vpop.f32.mrb[38].mxu0  ;;  %v1313_v39 = vpop.f32.mrb[36].mxu1 }
 0xc1c   :  { %2735 = vtanh.f32 %v1251_v36  ;;  %v1320_v40 = vrot.slane %v1313_v39, 2  ;;  %v2529_v41 = vpop.f32.mrb[39].mxu0  ;;  %v2536_v42 = vpop.f32.mrb[37].mxu1  ;;  %v2240_v48 = vmul.f32 -1.442695, %v1251_v36 }
 0xc1d   :  { %v1316_v43 = vpop.f32.mrb[38].mxu1 }
 0xc1e   :  { %v1322_v44 = vadd.f32 %v1320_v40, %v2938_v22  ;;  %v2537_v45 = vpop.f32.mrb[39].mxu1 }
 0xc20   :  { %2737 = vtanh.f32 %v1322_v44  ;;  %v2242_v49 = vmul.f32 -1.442695, %v1322_v44 }
 0xc21   :  { %2739 = vpow2.f32 %v2240_v48 }
 0xc22   :  { %2741 = vpow2.f32 %v2242_v49 }
 0xc26   :  { %v2736_v46 = vpop.eup %2735 }
 0xc27   :  { %1264 = vrot.lane.b32.xlu0 %v2736_v46, %s2810_s3 }
 0xc2a   :  { %v2738_v47 = vpop.eup %2737 }
 0xc2b   :  { %1335 = vrot.lane.b32.xlu1 %v2738_v47, %s2810_s3  ;;  %v2740_v50 = vpop.eup %2739 }
 0xc2c   :  { %v1255_v29 = vadd.f32 1.0, %v2740_v50  ;;  %v2742_v51 = vpop.eup %2741 }
 0xc2d   :  { %v1326_v52 = vadd.f32 1.0, %v2742_v51 }
 0xc2e   :  { %2743 = vrcp.f32 %v1255_v29 }
 0xc2f   :  { %2745 = vrcp.f32 %v1326_v52 }
 0xc38   :  { %v2744_v53 = vpop.eup %2743 }
 0xc39   :  { %v2746_v55 = vpop.eup %2745  ;;  %v1262_v63 = vmul.f32 %v2744_v53, %v1260_v59 }
 0xc3a   :  { %v1333_v9 = vmul.f32 %v2746_v55, %v1331_v5 }
 0xc99   :  { %v1265_v34 = vpop.permute.xlu0 %1264 }
 0xc9a   :  { %v1267_v54 = vmul.f32 %v2744_v53, %v1265_v34 }
 0xc9c   :  { %1269 = vrot.lane.b32.xlu0 %v1267_v54, %s2811_s8 }
 0xc9d   :  { %v1336_v56 = vpop.permute.xlu1 %1335 }
 0xc9e   :  { %v1338_v57 = vmul.f32 %v2746_v55, %v1336_v56 }
 0xca0   :  { %1340 = vrot.lane.b32.xlu1 %v1338_v57, %s2811_s8 }
 0xd0e   :  { %v1270_v3 = vpop.permute.xlu0 %1269 }
 0xd0f   :  { %v3176_v8 = vadd.f32 %v1270_v3, %v1262_v63 }
 0xd11   :  { %2747 = vtanh.f32 %v3176_v8  ;;  %v1499_v51 = vrot.slane %v3176_v8, 6 }
 0xd12   :  { %v1341_v11 = vpop.permute.xlu1 %1340 }
 0xd13   :  { %v3179_v60 = vadd.f32 %v1341_v11, %v1333_v9 }
 0xd15   :  { %2749 = vtanh.f32 %v3179_v60  ;;  %v1570_v54 = vrot.slane %v3179_v60, 2 }
 0xd1b   :  { %v2748_v61 = vpop.eup %2747 }
 0xd1c   :  { %1275 = vrot.lane.b32.xlu0 %v2748_v61, %s2810_s3 }
 0xd1f   :  { %v2750_v7 = vpop.eup %2749 }
 0xd20   :  { %1346 = vrot.lane.b32.xlu1 %v2750_v7, %s2810_s3 }
 0xd8e   :  { %v1276_v58 = vpop.permute.xlu0 %1275 }
 0xd8f   :  { %v1278_v17 = vmul.f32 %v2744_v53, %v1276_v58 }
 0xd91   :  { %v1350_v18 = vpack.c.bf16 %v1278_v17, %v1278_v17  ;;  %v3239_v17 = vld [vmem:[%s3387_s2] sm:$0xff]  }
 0xd92   :  { %v1347_v16 = vpop.permute.xlu1 %1346 }
 0xd93   :  { %v1349_v10 = vmul.f32 %v2746_v55, %v1347_v16  ;;  %1352 = vrot.lane.b32.xlu0 %v1350_v18, %s2811_s8  ;;  %v3248_v16 = vld [vmem:[%s3387_s2 + $0x8] sm:$0xff]  }
 0xd95   :  { %v1398_v19 = vpack.c.bf16 %v1349_v10, %v1349_v10  ;;  %v3256_v10 = vld [vmem:[%s3387_s2 + $0x10] sm:$0xff]  }
 0xd97   :  { %v1400_v6 = vrot.slane %v1398_v19, 3  ;;  %v3266_v19 = vld [vmem:[%s3389_s4] sm:$0xff]  }
 0xd99   :  { %1401 = vrot.lane.b32.xlu1 %v1400_v6, %s2811_s8  ;;  %v3275_v6 = vld [vmem:[%s3387_s2 + $0x18] sm:$0xff]  }
 0xe05   :  { %v1353_v20 = vpop.permute.xlu0 %1352 }
 0xe06   :  { %2543 = vmatmul.mubr.msk.bf16.vlgmr.msra.gmra.mrb[40].mxu0 %vm225_vm2, %v1353_v20 }
 0xe07   :  { %2555 = vmatpush3.bf16.msra.mxu0 %v2897_v12  ;;  %2558 = vmatprep.mubr.msk.bf16.mxu0 %vm2808_vm0, %v2807_v0 }
 0xe08   :  { %2556 = vmatprep.subr.bf16.mxu0 %v2807_v0 }
 0xe0b   :  { %v1402_v21 = vpop.permute.xlu1 %1401  ;;  %2557 = vmatpush3.bf16.msra.mxu0 %v2910_v14 }
 0xe0c   :  { %2551 = vmatmul.mubr.msk.bf16.vlgmr.msra.gmra.mrb[40].mxu1 %vm225_vm2, %v1402_v21  ;;  %2570 = vmatprep.subr.bf16.mxu0 %v2807_v0 }
 0xe0d   :  { %2563 = vmatpush3.bf16.msra.mxu1 %v2903_v13  ;;  %2566 = vmatprep.mubr.msk.bf16.mxu1 %vm2808_vm0, %v2807_v0 }
 0xe0e   :  { %2559 = vmatmul.mubr.msk.bf16.vlgmr.msra.gmra.mrb[44].mxu0 %vm225_vm2, %v1353_v20  ;;  %2564 = vmatprep.subr.bf16.mxu1 %v2807_v0  ;;  %v3282_v20 = vld [vmem:[%s3389_s4 + $0x8] sm:$0xff]  }
 0xe0f   :  { %2571 = vmatpush3.bf16.msra.mxu0 %v2961_v62  ;;  %2574 = vmatprep.mubr.msk.bf16.mxu0 %vm2808_vm0, %v2807_v0 }
 0xe10   :  { %2572 = vmatprep.subr.bf16.mxu0 %v2807_v0 }
 0xe11   :  { %2565 = vmatpush3.bf16.msra.mxu1 %v2917_v15 }
 0xe12   :  { %2578 = vmatprep.subr.bf16.mxu1 %v2807_v0 }
 0xe13   :  { %2573 = vmatpush3.bf16.msra.mxu0 %v2966_v1 }
 0xe14   :  { %2567 = vmatmul.mubr.msk.bf16.vlgmr.msra.gmra.mrb[44].mxu1 %vm225_vm2, %v1402_v21  ;;  %2586 = vmatprep.subr.bf16.mxu0 %v2807_v0  ;;  %v3290_v21 = vld [vmem:[%s3390_s5] sm:$0xff]  }
 0xe15   :  { %2579 = vmatpush3.bf16.msra.mxu1 %v2973_v2  ;;  %2582 = vmatprep.mubr.msk.bf16.mxu1 %vm2808_vm0, %v2807_v0 }
 0xe16   :  { %2580 = vmatprep.subr.bf16.mxu1 %v2807_v0 }
 0xe19   :  { %2581 = vmatpush3.bf16.msra.mxu1 %v2984_v4 }
 0xe1a   :  { %2594 = vmatprep.subr.bf16.mxu1 %v2807_v0 }
 0xed9   :  { %v1391_v12 = vpop.f32.mrb[40].mxu0 }
 0xeda   :  { %1397 = vst [vmem:[%s3391_s7 + $0x8] sm:$0x3] %v1391_v12  ;;  %v2544_v13 = vpop.f32.mrb[41].mxu0  ;;  %v3299_v12 = vld [vmem:[%s3390_s5 + $0x8] sm:$0xff]  }
 0xedb   :  { %v1394_v14 = vpop.f32.mrb[42].mxu0 }
 0xedc   :  { %v2545_v15 = vpop.f32.mrb[43].mxu0 }
 0xedf   :  { %v1440_v62 = vpop.f32.mrb[40].mxu1 }
 0xee0   :  { %1446 = vst [vmem:[#allocation2 + $0x6] sm:$0x3] %v1440_v62  ;;  %v2552_v1 = vpop.f32.mrb[41].mxu1 }
 0xee1   :  { %v1443_v2 = vpop.f32.mrb[42].mxu1  ;;  %v1481_v23 = vpop.f32.mrb[44].mxu0 }
 0xee2   :  { %v1488_v24 = vrot.slane %v1481_v23, 6  ;;  %v2553_v26 = vpop.f32.mrb[43].mxu1  ;;  %v2560_v27 = vpop.f32.mrb[45].mxu0 }
 0xee3   :  { %v1484_v28 = vpop.f32.mrb[46].mxu0 }
 0xee4   :  { %v1490_v4 = vadd.f32 %v1488_v24, %v2940_v25  ;;  %v2561_v30 = vpop.f32.mrb[47].mxu0 }
 0xee6   :  { %2751 = vtanh.f32 %v1490_v4  ;;  %v2246_v40 = vmul.f32 -1.442695, %v1490_v4 }
 0xee7   :  { %v1552_v31 = vpop.f32.mrb[44].mxu1 }
 0xee8   :  { %v1559_v32 = vrot.slane %v1552_v31, 4  ;;  %v2568_v33 = vpop.f32.mrb[45].mxu1 }
 0xee9   :  { %v1555_v35 = vpop.f32.mrb[46].mxu1 }
 0xeea   :  { %v1561_v36 = vadd.f32 %v1559_v32, %v2938_v22  ;;  %v2569_v37 = vpop.f32.mrb[47].mxu1 }
 0xeec   :  { %2753 = vtanh.f32 %v1561_v36  ;;  %v2248_v41 = vmul.f32 -1.442695, %v1561_v36 }
 0xeed   :  { %2755 = vpow2.f32 %v2246_v40 }
 0xeee   :  { %2757 = vpow2.f32 %v2248_v41 }
 0xef0   :  { %v2752_v38 = vpop.eup %2751 }
 0xef1   :  { %1503 = vrot.lane.b32.xlu0 %v2752_v38, %s2810_s3 }
 0xef6   :  { %v2754_v39 = vpop.eup %2753 }
 0xef7   :  { %1574 = vrot.lane.b32.xlu1 %v2754_v39, %s2810_s3  ;;  %v2756_v42 = vpop.eup %2755 }
 0xef8   :  { %v1494_v43 = vadd.f32 1.0, %v2756_v42  ;;  %v2758_v44 = vpop.eup %2757 }
 0xef9   :  { %v1565_v45 = vadd.f32 1.0, %v2758_v44 }
 0xefa   :  { %2759 = vrcp.f32 %v1494_v43 }
 0xefb   :  { %2761 = vrcp.f32 %v1565_v45 }
 0xf04   :  { %v2760_v46 = vpop.eup %2759 }
 0xf05   :  { %v2762_v49 = vpop.eup %2761  ;;  %v1501_v52 = vmul.f32 %v2760_v46, %v1499_v51 }
 0xf06   :  { %v1572_v55 = vmul.f32 %v2762_v49, %v1570_v54 }
 0xf63   :  { %v1504_v47 = vpop.permute.xlu0 %1503 }
 0xf64   :  { %v1506_v48 = vmul.f32 %v2760_v46, %v1504_v47 }
 0xf66   :  { %1508 = vrot.lane.b32.xlu0 %v1506_v48, %s2811_s8 }
 0xf69   :  { %v1575_v50 = vpop.permute.xlu1 %1574 }
 0xf6a   :  { %v1577_v29 = vmul.f32 %v2762_v49, %v1575_v50 }
 0xf6c   :  { %1579 = vrot.lane.b32.xlu1 %v1577_v29, %s2811_s8 }
 0xfd8   :  { %v1509_v53 = vpop.permute.xlu0 %1508 }
 0xfd9   :  { %v3224_v34 = vadd.f32 %v1509_v53, %v1501_v52 }
 0xfdb   :  { %2763 = vtanh.f32 %v3224_v34  ;;  %v1739_v52 = vrot.slane %v3224_v34, 6 }
 0xfde   :  { %v1580_v56 = vpop.permute.xlu1 %1579 }
 0xfdf   :  { %v3228_v57 = vadd.f32 %v1580_v56, %v1572_v55 }
 0xfe1   :  { %2765 = vtanh.f32 %v3228_v57  ;;  %v1810_v56 = vrot.slane %v3228_v57, 2 }
 0xfe5   :  { %v2764_v59 = vpop.eup %2763 }
 0xfe6   :  { %1514 = vrot.lane.b32.xlu0 %v2764_v59, %s2810_s3 }
 0xfeb   :  { %v2766_v63 = vpop.eup %2765 }
 0xfec   :  { %1585 = vrot.lane.b32.xlu1 %v2766_v63, %s2810_s3 }
0x1058   :  { %v1515_v3 = vpop.permute.xlu0 %1514 }
0x1059   :  { %v1517_v5 = vmul.f32 %v2760_v46, %v1515_v3 }
0x105b   :  { %v1589_v8 = vpack.c.bf16 %v1517_v5, %v1517_v5 }
0x105d   :  { %v1591_v9 = vrot.slane %v1589_v8, 1 }
0x105e   :  { %v1586_v11 = vpop.permute.xlu1 %1585 }
0x105f   :  { %v1588_v60 = vmul.f32 %v2762_v49, %v1586_v11  ;;  %1592 = vrot.lane.b32.xlu0 %v1591_v9, %s2811_s8 }
0x1061   :  { %v1638_v61 = vpack.c.bf16 %v1588_v60, %v1588_v60 }
0x1063   :  { %v1640_v7 = vrot.slane %v1638_v61, 2 }
0x1065   :  { %1641 = vrot.lane.b32.xlu1 %v1640_v7, %s2811_s8 }
0x10d1   :  { %v1593_v58 = vpop.permute.xlu0 %1592 }
0x10d2   :  { %2575 = vmatmul.mubr.msk.bf16.vlgmr.msra.gmra.mrb[48].mxu0 %vm225_vm2, %v1593_v58 }
0x10d3   :  { %2587 = vmatpush3.bf16.msra.mxu0 %v3239_v17  ;;  %2590 = vmatprep.mubr.msk.bf16.mxu0 %vm2808_vm0, %v2807_v0 }
0x10d4   :  { %2588 = vmatprep.subr.bf16.mxu0 %v2807_v0 }
0x10d7   :  { %v1642_v18 = vpop.permute.xlu1 %1641  ;;  %2589 = vmatpush3.bf16.msra.mxu0 %v3248_v16 }
0x10d8   :  { %2583 = vmatmul.mubr.msk.bf16.vlgmr.msra.gmra.mrb[48].mxu1 %vm225_vm2, %v1642_v18  ;;  %2602 = vmatprep.subr.bf16.mxu0 %v2807_v0 }
0x10d9   :  { %2595 = vmatpush3.bf16.msra.mxu1 %v3256_v10  ;;  %2598 = vmatprep.mubr.msk.bf16.mxu1 %vm2808_vm0, %v2807_v0 }
0x10da   :  { %2591 = vmatmul.mubr.msk.bf16.vlgmr.msra.gmra.mrb[52].mxu0 %vm225_vm2, %v1593_v58  ;;  %2596 = vmatprep.subr.bf16.mxu1 %v2807_v0 }
0x10db   :  { %2603 = vmatpush3.bf16.msra.mxu0 %v3266_v19  ;;  %2606 = vmatprep.mubr.msk.bf16.mxu0 %vm2808_vm0, %v2807_v0 }
0x10dc   :  { %2604 = vmatprep.subr.bf16.mxu0 %v2807_v0 }
0x10dd   :  { %2597 = vmatpush3.bf16.msra.mxu1 %v3275_v6 }
0x10de   :  { %2610 = vmatprep.subr.bf16.mxu1 %v2807_v0 }
0x10df   :  { %2605 = vmatpush3.bf16.msra.mxu0 %v3282_v20 }
0x10e0   :  { %2599 = vmatmul.mubr.msk.bf16.vlgmr.msra.gmra.mrb[52].mxu1 %vm225_vm2, %v1642_v18  ;;  %2618 = vmatprep.subr.bf16.mxu0 %v2807_v0 }
0x10e1   :  { %2611 = vmatpush3.bf16.msra.mxu1 %v3290_v21  ;;  %2614 = vmatprep.mubr.msk.bf16.mxu1 %vm2808_vm0, %v2807_v0 }
0x10e2   :  { %2612 = vmatprep.subr.bf16.mxu1 %v2807_v0 }
0x10e5   :  { %2613 = vmatpush3.bf16.msra.mxu1 %v3299_v12 }
0x10e6   :  { %2626 = vmatprep.subr.bf16.mxu1 %v2807_v0 }
0x11a5   :  { %v1631_v13 = vpop.f32.mrb[48].mxu0 }
0x11a6   :  { %1637 = vst [vmem:[%s3391_s7 + $0xa] sm:$0x3] %v1631_v13  ;;  %v2576_v14 = vpop.f32.mrb[49].mxu0 }
0x11a7   :  { %v1634_v15 = vpop.f32.mrb[50].mxu0 }
0x11a8   :  { %v2577_v62 = vpop.f32.mrb[51].mxu0 }
0x11ab   :  { %v1680_v1 = vpop.f32.mrb[48].mxu1 }
0x11ac   :  { %1686 = vst [vmem:[#allocation2 + $0x4] sm:$0x3] %v1680_v1  ;;  %v2584_v2 = vpop.f32.mrb[49].mxu1 }
0x11ad   :  { %v1683_v23 = vpop.f32.mrb[50].mxu1  ;;  %v1721_v24 = vpop.f32.mrb[52].mxu0 }
0x11ae   :  { %v1728_v26 = vrot.slane %v1721_v24, 4  ;;  %v2585_v27 = vpop.f32.mrb[51].mxu1  ;;  %v2592_v28 = vpop.f32.mrb[53].mxu0 }
0x11af   :  { %v1724_v4 = vpop.f32.mrb[54].mxu0 }
0x11b0   :  { %v1730_v30 = vadd.f32 %v1728_v26, %v2940_v25  ;;  %v2593_v31 = vpop.f32.mrb[55].mxu0 }
0x11b2   :  { %2767 = vtanh.f32 %v1730_v30  ;;  %v2252_v41 = vmul.f32 -1.442695, %v1730_v30 }
0x11b3   :  { %v1792_v32 = vpop.f32.mrb[52].mxu1 }
0x11b4   :  { %v1799_v33 = vrot.slane %v1792_v32, 6  ;;  %v2600_v35 = vpop.f32.mrb[53].mxu1 }
0x11b5   :  { %v1795_v36 = vpop.f32.mrb[54].mxu1 }
0x11b6   :  { %v1801_v37 = vadd.f32 %v1799_v33, %v2938_v22  ;;  %v2601_v38 = vpop.f32.mrb[55].mxu1 }
0x11b8   :  { %2769 = vtanh.f32 %v1801_v37  ;;  %v2254_v42 = vmul.f32 -1.442695, %v1801_v37 }
0x11b9   :  { %2771 = vpow2.f32 %v2252_v41 }
0x11ba   :  { %2773 = vpow2.f32 %v2254_v42 }
0x11bc   :  { %v2768_v39 = vpop.eup %2767 }
0x11bd   :  { %1743 = vrot.lane.b32.xlu0 %v2768_v39, %s2810_s3 }
0x11c2   :  { %v2770_v40 = vpop.eup %2769 }
0x11c3   :  { %1814 = vrot.lane.b32.xlu1 %v2770_v40, %s2810_s3  ;;  %v2772_v43 = vpop.eup %2771 }
0x11c4   :  { %v1734_v44 = vadd.f32 1.0, %v2772_v43  ;;  %v2774_v45 = vpop.eup %2773 }
0x11c5   :  { %v1805_v46 = vadd.f32 1.0, %v2774_v45 }
0x11c6   :  { %2775 = vrcp.f32 %v1734_v44 }
0x11c7   :  { %2777 = vrcp.f32 %v1805_v46 }
0x11d0   :  { %v2776_v47 = vpop.eup %2775 }
0x11d1   :  { %v2778_v50 = vpop.eup %2777  ;;  %v1741_v53 = vmul.f32 %v2776_v47, %v1739_v52 }
0x11d2   :  { %v1812_v59 = vmul.f32 %v2778_v50, %v1810_v56 }
0x122f   :  { %v1744_v48 = vpop.permute.xlu0 %1743 }
0x1230   :  { %v1746_v49 = vmul.f32 %v2776_v47, %v1744_v48 }
0x1232   :  { %1748 = vrot.lane.b32.xlu0 %v1746_v49, %s2811_s8 }
0x1235   :  { %v1815_v29 = vpop.permute.xlu1 %1814 }
0x1236   :  { %v1817_v51 = vmul.f32 %v2778_v50, %v1815_v29 }
0x1238   :  { %1819 = vrot.lane.b32.xlu1 %v1817_v51, %s2811_s8 }
0x12a4   :  { %v1749_v54 = vpop.permute.xlu0 %1748 }
0x12a5   :  { %v3313_v55 = vadd.f32 %v1749_v54, %v1741_v53 }
0x12a7   :  { %2779 = vtanh.f32 %v3313_v55  ;;  %v1979_v42 = vrot.slane %v3313_v55, 6 }
0x12aa   :  { %v1820_v63 = vpop.permute.xlu1 %1819 }
0x12ab   :  { %v3317_v3 = vadd.f32 %v1820_v63, %v1812_v59 }
0x12ad   :  { %2781 = vtanh.f32 %v3317_v3  ;;  %v2047_v45 = vrot.slane %v3317_v3, 2 }
0x12b1   :  { %v2780_v5 = vpop.eup %2779 }
0x12b2   :  { %1754 = vrot.lane.b32.xlu0 %v2780_v5, %s2810_s3 }
0x12b7   :  { %v2782_v8 = vpop.eup %2781 }
0x12b8   :  { %1825 = vrot.lane.b32.xlu1 %v2782_v8, %s2810_s3 }
0x1324   :  { %v1755_v34 = vpop.permute.xlu0 %1754 }
0x1325   :  { %v1757_v9 = vmul.f32 %v2776_v47, %v1755_v34 }
0x1327   :  { %v1829_v11 = vpack.c.bf16 %v1757_v9, %v1757_v9 }
0x1329   :  { %v1831_v60 = vrot.slane %v1829_v11, 2 }
0x132a   :  { %v1826_v61 = vpop.permute.xlu1 %1825 }
0x132b   :  { %v1828_v57 = vmul.f32 %v2778_v50, %v1826_v61  ;;  %1832 = vrot.lane.b32.xlu0 %v1831_v60, %s2811_s8 }
0x132d   :  { %v1878_v7 = vpack.c.bf16 %v1828_v57, %v1828_v57 }
0x132f   :  { %v1880_v58 = vrot.slane %v1878_v7, 1 }
0x1331   :  { %1881 = vrot.lane.b32.xlu1 %v1880_v58, %s2811_s8  ;;  %v2166_v58 = vld [vmem:[#allocation2 + $0x8] sm:$0xff] }
0x139d   :  { %v1833_v18 = vpop.permute.xlu0 %1832 }
0x139e   :  { %2607 = vmatmul.mubr.msk.bf16.vlgmr.msra.gmra.mrb[56].mxu0 %vm225_vm2, %v1833_v18 }
0x139f   :  { %2619 = vmatpush3.bf16.msra.mxu0 %v3239_v17  ;;  %2622 = vmatprep.mubr.msk.bf16.mxu0 %vm2808_vm0, %v2807_v0 }
0x13a0   :  { %2620 = vmatprep.subr.bf16.mxu0 %v2807_v0 }
0x13a3   :  { %v1882_v13 = vpop.permute.xlu1 %1881  ;;  %2621 = vmatpush3.bf16.msra.mxu0 %v3248_v16 }
0x13a4   :  { %2615 = vmatmul.mubr.msk.bf16.vlgmr.msra.gmra.mrb[56].mxu1 %vm225_vm2, %v1882_v13  ;;  %2634 = vmatprep.subr.bf16.mxu0 %v2807_v0 }
0x13a5   :  { %2627 = vmatpush3.bf16.msra.mxu1 %v3256_v10  ;;  %2630 = vmatprep.mubr.msk.bf16.mxu1 %vm2808_vm0, %v2807_v0 }
0x13a6   :  { %2623 = vmatmul.mubr.msk.bf16.vlgmr.msra.gmra.mrb[60].mxu0 %vm225_vm2, %v1833_v18  ;;  %2628 = vmatprep.subr.bf16.mxu1 %v2807_v0  ;;  %v2263_v18 = vld [vmem:[%s3392_s6] ss:$0 sm:$0xff] }
0x13a7   :  { %2635 = vmatpush3.bf16.msra.mxu0 %v3266_v19  ;;  %2638 = vmatprep.mubr.msk.bf16.mxu0 %vm2808_vm0, %v2807_v0 }
0x13a8   :  { %2636 = vmatprep.subr.bf16.mxu0 %v2807_v0 }
0x13a9   :  { %2629 = vmatpush3.bf16.msra.mxu1 %v3275_v6 }
0x13aa   :  { %2642 = vmatprep.subr.bf16.mxu1 %v2807_v0 }
0x13ab   :  { %2637 = vmatpush3.bf16.msra.mxu0 %v3282_v20 }
0x13ac   :  { %2631 = vmatmul.mubr.msk.bf16.vlgmr.msra.gmra.mrb[60].mxu1 %vm225_vm2, %v1882_v13 }
0x13ad   :  { %2643 = vmatpush3.bf16.msra.mxu1 %v3290_v21  ;;  %2646 = vmatprep.mubr.msk.bf16.mxu1 %vm2808_vm0, %v2807_v0 }
0x13ae   :  { %2644 = vmatprep.subr.bf16.mxu1 %v2807_v0 }
0x13b1   :  { %2645 = vmatpush3.bf16.msra.mxu1 %v3299_v12 }
0x1471   :  { %v1871_v17 = vpop.f32.mrb[56].mxu0 }
0x1472   :  { %1877 = vst [vmem:[%s3391_s7 + $0xc] sm:$0x3] %v1871_v17  ;;  %v2608_v16 = vpop.f32.mrb[57].mxu0  ;;  %v2163_v17 = vld [vmem:[%s3391_s7] sm:$0xff] }
0x1473   :  { %v1874_v10 = vpop.f32.mrb[58].mxu0 }
0x1474   :  { %v2609_v19 = vpop.f32.mrb[59].mxu0 }
0x1477   :  { %v1920_v6 = vpop.f32.mrb[56].mxu1 }
0x1478   :  { %1926 = vst [vmem:[#allocation2 + $0x2] sm:$0x3] %v1920_v6  ;;  %v2616_v20 = vpop.f32.mrb[57].mxu1 }
0x1479   :  { %v1923_v14 = vpop.f32.mrb[58].mxu1  ;;  %v1961_v21 = vpop.f32.mrb[60].mxu0 }
0x147a   :  { %v1968_v15 = vrot.slane %v1961_v21, 2  ;;  %v2617_v62 = vpop.f32.mrb[59].mxu1  ;;  %v2624_v1 = vpop.f32.mrb[61].mxu0 }
0x147b   :  { %v1964_v2 = vpop.f32.mrb[62].mxu0 }
0x147c   :  { %v1970_v0 = vadd.f32 %v1968_v15, %v2940_v25  ;;  %v2625_v12 = vpop.f32.mrb[63].mxu0 }
0x147e   :  { %2783 = vtanh.f32 %v1970_v0  ;;  %v2258_v31 = vmul.f32 -1.442695, %v1970_v0 }
0x147f   :  { %v2032_v23 = vpop.f32.mrb[60].mxu1 }
0x1480   :  { %v2038_v24 = vadd.f32 %v2032_v23, %v2938_v22  ;;  %v2632_v26 = vpop.f32.mrb[61].mxu1 }
0x1481   :  { %v2035_v27 = vpop.f32.mrb[62].mxu1 }
0x1482   :  { %2785 = vtanh.f32 %v2038_v24  ;;  %v2633_v28 = vpop.f32.mrb[63].mxu1  ;;  %v2260_v32 = vmul.f32 -1.442695, %v2038_v24 }
0x1483   :  { %2787 = vpow2.f32 %v2258_v31 }
0x1484   :  { %2789 = vpow2.f32 %v2260_v32 }
0x1488   :  { %v2784_v4 = vpop.eup %2783 }
0x1489   :  { %1983 = vrot.lane.b32.xlu0 %v2784_v4, %s2810_s3 }
0x148c   :  { %v2786_v30 = vpop.eup %2785 }
0x148d   :  { %2051 = vrot.lane.b32.xlu1 %v2786_v30, %s2810_s3  ;;  %v2788_v25 = vpop.eup %2787 }
0x148e   :  { %v1974_v33 = vadd.f32 1.0, %v2788_v25  ;;  %v2790_v35 = vpop.eup %2789 }
0x148f   :  { %v2042_v36 = vadd.f32 1.0, %v2790_v35 }
0x1490   :  { %2791 = vrcp.f32 %v1974_v33 }
0x1491   :  { %2793 = vrcp.f32 %v2042_v36 }
0x149a   :  { %v2792_v22 = vpop.eup %2791 }
0x149b   :  { %v2794_v39 = vpop.eup %2793  ;;  %v1981_v43 = vmul.f32 %v2792_v22, %v1979_v42 }
0x149c   :  { %v2049_v47 = vmul.f32 %v2794_v39, %v2047_v45 }
0x14fb   :  { %v1984_v37 = vpop.permute.xlu0 %1983 }
0x14fc   :  { %v1986_v38 = vmul.f32 %v2792_v22, %v1984_v37 }
0x14fe   :  { %1988 = vrot.lane.b32.xlu0 %v1986_v38, %s2811_s8 }
0x14ff   :  { %v2052_v40 = vpop.permute.xlu1 %2051 }
0x1500   :  { %v2054_v41 = vmul.f32 %v2794_v39, %v2052_v40 }
0x1502   :  { %2056 = vrot.lane.b32.xlu1 %v2054_v41, %s2811_s8 }
0x1570   :  { %v1989_v44 = vpop.permute.xlu0 %1988 }
0x1571   :  { %v1991_v46 = vadd.f32 %v1989_v44, %v1981_v43 }
0x1573   :  { %2795 = vtanh.f32 %v1991_v46 }
0x1574   :  { %v2057_v48 = vpop.permute.xlu1 %2056 }
0x1575   :  { %v2059_v49 = vadd.f32 %v2057_v48, %v2049_v47 }
0x1577   :  { %2797 = vtanh.f32 %v2059_v49 }
0x157d   :  { %v2796_v50 = vpop.eup %2795 }
0x157e   :  { %1994 = vrot.lane.b32.xlu0 %v2796_v50, %s2810_s3 }
0x1581   :  { %v2798_v29 = vpop.eup %2797 }
0x1582   :  { %2062 = vrot.lane.b32.xlu1 %v2798_v29, %s2810_s3 }
0x15f0   :  { %v1995_v51 = vpop.permute.xlu0 %1994 }
0x15f1   :  { %v1997_v52 = vmul.f32 %v2792_v22, %v1995_v51 }
0x15f3   :  { %v2066_v53 = vpack.c.bf16 %v1997_v52, %v1997_v52 }
0x15f4   :  { %v2063_v54 = vpop.permute.xlu1 %2062 }
0x15f5   :  { %v2068_v55 = vrot.slane %v2066_v53, 3  ;;  %v2065_v56 = vmul.f32 %v2794_v39, %v2063_v54 }
0x15f7   :  { %v2115_v59 = vpack.c.bf16 %v2065_v56, %v2065_v56  ;;  %2069 = vrot.lane.b32.xlu0 %v2068_v55, %s2811_s8 }
0x15f9   :  { %2117 = vrot.lane.b32.xlu1 %v2115_v59, %s2811_s8 }
0x1669   :  { %v2070_v63 = vpop.permute.xlu0 %2069 }
0x166a   :  { %2639 = vmatmul.mubr.msk.bf16.vlgmr.msra.gmra.mrb[64].mxu0 %vm225_vm2, %v2070_v63 }
0x166b   :  { %v2118_v3 = vpop.permute.xlu1 %2117 }
0x166c   :  { %2647 = vmatmul.mubr.msk.bf16.vlgmr.msra.gmra.mrb[64].mxu1 %vm225_vm2, %v2118_v3 }
0x173d   :  { %v2108_v5 = vpop.f32.mrb[64].mxu0 }
0x173e   :  { %2114 = vst [vmem:[%s3391_s7 + $0xe] sm:$0x3] %v2108_v5  ;;  %v2640_v8 = vpop.f32.mrb[65].mxu0 }
0x173f   :  { %v2111_v34 = vpop.f32.mrb[66].mxu0  ;;  %v2156_v9 = vpop.f32.mrb[64].mxu1 }
0x1740   :  { %2162 = vst [vmem:[#allocation2] sm:$0x3] %v2156_v9  ;;  %v2641_v11 = vpop.f32.mrb[67].mxu0  ;;  %v2648_v60 = vpop.f32.mrb[65].mxu1 }
0x1741   :  { %v2159_v61 = vpop.f32.mrb[66].mxu1 }
0x1742   :  { %v2649_v57 = vpop.f32.mrb[67].mxu1 }
0x1745   :  { %v2164_v7 = vld [vmem:[%s3391_s7 + $0x8] sm:$0xff] }
0x1746   :  { %v2168_v13 = vadd.f32 %v2166_v58, %v2164_v7 }
0x1747   :  { %v2165_v16 = vld [vmem:[#allocation2] sm:$0xff] }
0x1748   :  { %v2177_v10 = vadd.f32 %v2263_v18, %v2168_v13  ;;  %v2167_v19 = vadd.f32 %v2165_v16, %v2163_v17 }
0x174a   :  { %2179 = vst [vmem:[%s3391_s7 + $0x8] sm:$0xff] %v2177_v10  ;;  %v2176_v6 = vadd.f32 %v2263_v18, %v2167_v19 }
0x174c   :  { %2178 = vst [vmem:[%s3391_s7] sm:$0xff] %v2176_v6 }

</bundles_post_ra>
